<compile_context>
chip_gen: v5e
topology: v5e:2x2
jax: 0.10.0
libtpu: 0.0.40
codegen_flags: <defaults>
</compile_context>

<pallas_src>
import jax
import jax.numpy as jnp
from jax import lax
from jax.experimental import pallas as pl
from jax.experimental.pallas import tpu as pltpu


def dnn_kernel(ids_ref, vals_ref, emb_blk_ref, w1_ref, b1_ref, w2_ref, b2_ref, out_ref):
    """One batch tile: in-kernel embedding gather + scale, then the 2-layer MLP.

    ids_ref    : (tb, nfield)       int32
    vals_ref   : (tb, nfield)       f32
    emb_blk_ref: (nfield*nfeat, D)  bf16   block-diagonal embedding (VMEM-resident)
    w1_ref     : (D, hid)           bf16   (VMEM-resident)
    b1_ref     : (1, hid)           f32
    w2_ref     : (1, hid)           f32    second-layer weight as a row vector
    b2_ref     : (1, 1)             f32
    out_ref    : (1, tb)            f32    lane-dense output (batch on the lane axis)
    """
    tb, nfield = ids_ref.shape
    ncols = emb_blk_ref.shape[0]            # nfield * nfeat
    nfeat = ncols // nfield

    ids = ids_ref[...]                      # (tb, nfield) int32
    vals = vals_ref[...]                    # (tb, nfield) f32

    # Scaled one-hot selector S: S[b, f*nfeat + id[b,f]] = value[b,f].
    # Built in f32 (native VPU on all gens) with a static loop over the small field
    # count; each field owns a disjoint nfeat-wide column range, so adds never collide.
    lane = lax.broadcasted_iota(jnp.int32, (tb, ncols), 1)
    s = jnp.zeros((tb, ncols), jnp.float32)
    for f in range(nfield):
        col = ids[:, f:f + 1] + f * nfeat                       # (tb, 1)
        s = s + jnp.where(lane == col, vals[:, f:f + 1], 0.0)

    # Gather + per-field scale + flatten on the MXU:
    #   x[b, f*nemb + e] = value[b,f] * emb[id[b,f], e]
    x = jnp.dot(s.astype(jnp.bfloat16), emb_blk_ref[...],
                preferred_element_type=jnp.float32)             # (tb, D) f32

    # Layer 1 (MXU, bf16 x bf16 -> f32 accumulation); bias + ReLU in f32.
    h = jnp.dot(x.astype(jnp.bfloat16), w1_ref[...],
                preferred_element_type=jnp.float32)             # (tb, hid)
    h = jnp.maximum(h + b1_ref[...], 0.0)
    # Dropout(p=0) is the identity -> nothing to do.

    # Layer 2 (hid -> 1): VPU multiply + XLU lane reduction (an N=1 MXU matmul would
    # waste >99% of the MXU output lanes).
    y = jnp.sum(h * w2_ref[...], axis=-1)                       # (tb,)
    out_ref[...] = (y[None, :] + b2_ref[...]).astype(out_ref.dtype)


def _round_up(x, m):
    return ((x + m - 1) // m) * m


def dnn_forward(ids, vals, emb_table, w1, b1, w2, b2, *, tb_cap=1024):
    """ids, vals: (B, nfield). Returns y of shape (B,) (== PyTorch .squeeze(1))."""
    B, nfield = ids.shape
    nfeat, nemb = emb_table.shape
    D = nfield * nemb
    hid = w1.shape[1]

    # Block-diagonal embedding: row f*nfeat + n, cols f*nemb:(f+1)*nemb hold emb[n].
    # One scaled-one-hot matmul against it == gather + per-field scale + flatten.
    # TODO(synk): for very large nfeat this table (nfield^2 * nfeat * nemb) is
    # impractical; switch to scalar-prefetch ids + DMA gather of the raw (nfeat, nemb)
    # table in that regime.
    emb_blk = jnp.kron(jnp.eye(nfield, dtype=emb_table.dtype), emb_table).astype(jnp.bfloat16)

    w1_bf = w1.astype(jnp.bfloat16)
    b1_f = b1.reshape(1, hid).astype(jnp.float32)
    w2_row = w2.reshape(1, hid).astype(jnp.float32)      # (hid, 1) -> (1, hid)
    b2_f = b2.reshape(1, 1).astype(jnp.float32)
    ids_i = ids.astype(jnp.int32)
    vals_f = vals.astype(jnp.float32)

    # Batch tile: multiple of 128 (lane-dense output), capped at 1024, and chosen so
    # the grid has >=2 steps whenever B allows it ("parallel" only uses both v7x TCs
    # with >=2 grid steps).
    tb = min(tb_cap, max(128, _round_up(pl.cdiv(B, 2), 128)))
    tb = min(tb, _round_up(B, 128))
    grid = (pl.cdiv(B, tb),)

    ncols = nfield * nfeat
    flops = 2 * B * ncols * D + 2 * B * D * hid + 3 * B * hid
    bytes_accessed = (B * nfield * (4 + 4)            # ids + vals
                      + ncols * D * 2 + D * hid * 2   # emb_blk + W1 (bf16)
                      + 2 * hid * 4 + 4               # b1 + w2 row + b2
                      + B * 4)                        # output

    out = pl.pallas_call(
        dnn_kernel,
        out_shape=jax.ShapeDtypeStruct((1, B), jnp.float32),
        grid_spec=pltpu.PrefetchScalarGridSpec(
            num_scalar_prefetch=0,
            grid=grid,
            in_specs=[
                pl.BlockSpec((tb, nfield), lambda i: (i, 0)),    # ids   (pipelined)
                pl.BlockSpec((tb, nfield), lambda i: (i, 0)),    # vals  (pipelined)
                pl.BlockSpec((ncols, D), lambda i: (0, 0)),      # emb_blk (VMEM-resident)
                pl.BlockSpec((D, hid), lambda i: (0, 0)),        # W1      (VMEM-resident)
                pl.BlockSpec((1, hid), lambda i: (0, 0)),        # b1
                pl.BlockSpec((1, hid), lambda i: (0, 0)),        # w2^T
                pl.BlockSpec((1, 1), lambda i: (0, 0)),          # b2
            ],
            out_specs=pl.BlockSpec((1, tb), lambda i: (0, i)),   # lane-dense output
        ),
        compiler_params=pltpu.CompilerParams(
            dimension_semantics=("parallel",),     # shard batch tiles over v7x's 2 TCs
            vmem_limit_bytes=32 * 1024 * 1024,     # explicit (v5e scoped default = 16 MiB)
        ),
        cost_estimate=pl.CostEstimate(
            flops=flops, transcendentals=0, bytes_accessed=bytes_accessed),
    )(ids_i, vals_f, emb_blk, w1_bf, b1_f, w2_row, b2_f)

    return out[0, :]                                             # .squeeze(1)


def _reference(ids, vals, emb_table, w1, b1, w2, b2):
    B, nfield = ids.shape
    nemb = emb_table.shape[1]
    x = emb_table[ids] * vals[:, :, None]                        # (B, nfield, nemb)
    x = x.reshape(B, nfield * nemb)
    h = jnp.maximum(x @ w1 + b1.reshape(1, -1), 0.0)
    return (h @ w2 + b2.reshape(1, -1))[:, 0]


if __name__ == "__main__":
    # small but tiling-friendly, forward-consistent shapes
    B, nfield, nfeat, nemb = 256, 8, 64, 16
    hid_size, output_size = 128, 1
    D = nfield * nemb

    key = jax.random.PRNGKey(0)
    k_emb, k_id, k_val, k_w1, k_b1, k_w2, k_b2 = jax.random.split(key, 7)

    # deterministic parameter init (synthetic; no checkpoint loading)
    emb_table = jax.random.normal(k_emb, (nfeat, nemb), jnp.float32) * 0.1
    w1 = jax.random.normal(k_w1, (D, hid_size), jnp.float32) * (1.0 / jnp.sqrt(D))
    b1 = jax.random.normal(k_b1, (hid_size,), jnp.float32) * 0.01
    w2 = jax.random.normal(k_w2, (hid_size, output_size), jnp.float32) * (1.0 / jnp.sqrt(hid_size))
    b2 = jax.random.normal(k_b2, (output_size,), jnp.float32) * 0.01

    # inputs: x = {'id': LongTensor B*nfield, 'value': FloatTensor B*nfield}
    ids = jax.random.randint(k_id, (B, nfield), 0, nfeat, dtype=jnp.int32)
    vals = jax.random.uniform(k_val, (B, nfield), jnp.float32)

    y = dnn_forward(ids, vals, emb_table, w1, b1, w2, b2)
    y = jax.block_until_ready(y)

    y_ref = _reference(ids, vals, emb_table, w1, b1, w2, b2)
    assert y.shape == (B,)
    # bf16 MXU inputs with f32 accumulation -> loosened tolerance vs f32 reference.
    assert jnp.allclose(y, y_ref, atol=2e-2, rtol=2e-2), float(jnp.max(jnp.abs(y - y_ref)))

    print("KERNEL_OK")
</pallas_src>

<mosaic_0001>
module attributes {stable_mosaic.version = 11 : i64} {
  func.func @dnn_kernel(%arg0: i32, %arg1: memref<128x8xi32, #tpu.memory_space<vmem>>, %arg2: memref<128x8xf32, #tpu.memory_space<vmem>>, %arg3: memref<512x128xbf16, #tpu.memory_space<vmem>>, %arg4: memref<128x128xbf16, #tpu.memory_space<vmem>>, %arg5: memref<1x128xf32, #tpu.memory_space<vmem>>, %arg6: memref<1x128xf32, #tpu.memory_space<vmem>>, %arg7: memref<1x1xf32, #tpu.memory_space<vmem>>, %arg8: memref<1x128xf32, #tpu.memory_space<vmem>>) attributes {dimension_semantics = [#tpu.dimension_semantics<parallel>], iteration_bounds = array<i64: 2>, scalar_prefetch = 0 : i64, scratch_operands = 0 : i64, tpu.core_type = #tpu.core_type<tc>, window_params = [{transform_indices = @transform_0, window_bounds = array<i64: 128, 8>}, {transform_indices = @transform_1, window_bounds = array<i64: 128, 8>}, {pipeline_mode = #tpu.pipeline_mode<synchronous>, transform_indices = @transform_2, window_bounds = array<i64: 512, 128>}, {pipeline_mode = #tpu.pipeline_mode<synchronous>, transform_indices = @transform_3, window_bounds = array<i64: 128, 128>}, {pipeline_mode = #tpu.pipeline_mode<synchronous>, transform_indices = @transform_4, window_bounds = array<i64: 1, 128>}, {pipeline_mode = #tpu.pipeline_mode<synchronous>, transform_indices = @transform_5, window_bounds = array<i64: 1, 128>}, {pipeline_mode = #tpu.pipeline_mode<synchronous>, transform_indices = @transform_6, window_bounds = array<i64: 1, 1>}, {transform_indices = @transform_7, window_bounds = array<i64: 1, 128>}]} {
    %c0 = arith.constant 0 : index
    %c0_0 = arith.constant 0 : index
    %0 = vector.load %arg1[%c0, %c0_0] : memref<128x8xi32, #tpu.memory_space<vmem>>, vector<128x8xi32>
    %c0_1 = arith.constant 0 : index
    %c0_2 = arith.constant 0 : index
    %1 = vector.load %arg2[%c0_1, %c0_2] : memref<128x8xf32, #tpu.memory_space<vmem>>, vector<128x8xf32>
    %2 = tpu.iota {dimensions = array<i32: 1>} : vector<128x512xi32>
    %cst = arith.constant 0.000000e+00 : f32
    %3 = vector.broadcast %cst : f32 to vector<128x512xf32>
    %4 = vector.extract_strided_slice %0 {offsets = [0, 0], sizes = [128, 1], strides = [1, 1]} : vector<128x8xi32> to vector<128x1xi32>
    %c0_i32 = arith.constant 0 : i32
    %5 = vector.broadcast %c0_i32 : i32 to vector<128x1xi32>
    %6 = arith.addi %4, %5 : vector<128x1xi32>
    %7 = vector.broadcast %6 : vector<128x1xi32> to vector<128x512xi32>
    %8 = arith.cmpi eq, %2, %7 : vector<128x512xi32>
    %9 = vector.extract_strided_slice %1 {offsets = [0, 0], sizes = [128, 1], strides = [1, 1]} : vector<128x8xf32> to vector<128x1xf32>
    %cst_3 = arith.constant 0.000000e+00 : f32
    %10 = vector.shape_cast %9 : vector<128x1xf32> to vector<128x1xf32>
    %11 = vector.broadcast %10 : vector<128x1xf32> to vector<128x512xf32>
    %12 = vector.broadcast %cst_3 : f32 to vector<128x512xf32>
    %13 = arith.select %8, %11, %12 : vector<128x512xi1>, vector<128x512xf32>
    %14 = arith.addf %3, %13 : vector<128x512xf32>
    %15 = vector.extract_strided_slice %0 {offsets = [0, 1], sizes = [128, 1], strides = [1, 1]} : vector<128x8xi32> to vector<128x1xi32>
    %c64_i32 = arith.constant 64 : i32
    %16 = vector.broadcast %c64_i32 : i32 to vector<128x1xi32>
    %17 = arith.addi %15, %16 : vector<128x1xi32>
    %18 = vector.broadcast %17 : vector<128x1xi32> to vector<128x512xi32>
    %19 = arith.cmpi eq, %2, %18 : vector<128x512xi32>
    %20 = vector.extract_strided_slice %1 {offsets = [0, 1], sizes = [128, 1], strides = [1, 1]} : vector<128x8xf32> to vector<128x1xf32>
    %cst_4 = arith.constant 0.000000e+00 : f32
    %21 = vector.shape_cast %20 : vector<128x1xf32> to vector<128x1xf32>
    %22 = vector.broadcast %21 : vector<128x1xf32> to vector<128x512xf32>
    %23 = vector.broadcast %cst_4 : f32 to vector<128x512xf32>
    %24 = arith.select %19, %22, %23 : vector<128x512xi1>, vector<128x512xf32>
    %25 = arith.addf %14, %24 : vector<128x512xf32>
    %26 = vector.extract_strided_slice %0 {offsets = [0, 2], sizes = [128, 1], strides = [1, 1]} : vector<128x8xi32> to vector<128x1xi32>
    %c128_i32 = arith.constant 128 : i32
    %27 = vector.broadcast %c128_i32 : i32 to vector<128x1xi32>
    %28 = arith.addi %26, %27 : vector<128x1xi32>
    %29 = vector.broadcast %28 : vector<128x1xi32> to vector<128x512xi32>
    %30 = arith.cmpi eq, %2, %29 : vector<128x512xi32>
    %31 = vector.extract_strided_slice %1 {offsets = [0, 2], sizes = [128, 1], strides = [1, 1]} : vector<128x8xf32> to vector<128x1xf32>
    %cst_5 = arith.constant 0.000000e+00 : f32
    %32 = vector.shape_cast %31 : vector<128x1xf32> to vector<128x1xf32>
    %33 = vector.broadcast %32 : vector<128x1xf32> to vector<128x512xf32>
    %34 = vector.broadcast %cst_5 : f32 to vector<128x512xf32>
    %35 = arith.select %30, %33, %34 : vector<128x512xi1>, vector<128x512xf32>
    %36 = arith.addf %25, %35 : vector<128x512xf32>
    %37 = vector.extract_strided_slice %0 {offsets = [0, 3], sizes = [128, 1], strides = [1, 1]} : vector<128x8xi32> to vector<128x1xi32>
    %c192_i32 = arith.constant 192 : i32
    %38 = vector.broadcast %c192_i32 : i32 to vector<128x1xi32>
    %39 = arith.addi %37, %38 : vector<128x1xi32>
    %40 = vector.broadcast %39 : vector<128x1xi32> to vector<128x512xi32>
    %41 = arith.cmpi eq, %2, %40 : vector<128x512xi32>
    %42 = vector.extract_strided_slice %1 {offsets = [0, 3], sizes = [128, 1], strides = [1, 1]} : vector<128x8xf32> to vector<128x1xf32>
    %cst_6 = arith.constant 0.000000e+00 : f32
    %43 = vector.shape_cast %42 : vector<128x1xf32> to vector<128x1xf32>
    %44 = vector.broadcast %43 : vector<128x1xf32> to vector<128x512xf32>
    %45 = vector.broadcast %cst_6 : f32 to vector<128x512xf32>
    %46 = arith.select %41, %44, %45 : vector<128x512xi1>, vector<128x512xf32>
    %47 = arith.addf %36, %46 : vector<128x512xf32>
    %48 = vector.extract_strided_slice %0 {offsets = [0, 4], sizes = [128, 1], strides = [1, 1]} : vector<128x8xi32> to vector<128x1xi32>
    %c256_i32 = arith.constant 256 : i32
    %49 = vector.broadcast %c256_i32 : i32 to vector<128x1xi32>
    %50 = arith.addi %48, %49 : vector<128x1xi32>
    %51 = vector.broadcast %50 : vector<128x1xi32> to vector<128x512xi32>
    %52 = arith.cmpi eq, %2, %51 : vector<128x512xi32>
    %53 = vector.extract_strided_slice %1 {offsets = [0, 4], sizes = [128, 1], strides = [1, 1]} : vector<128x8xf32> to vector<128x1xf32>
    %cst_7 = arith.constant 0.000000e+00 : f32
    %54 = vector.shape_cast %53 : vector<128x1xf32> to vector<128x1xf32>
    %55 = vector.broadcast %54 : vector<128x1xf32> to vector<128x512xf32>
    %56 = vector.broadcast %cst_7 : f32 to vector<128x512xf32>
    %57 = arith.select %52, %55, %56 : vector<128x512xi1>, vector<128x512xf32>
    %58 = arith.addf %47, %57 : vector<128x512xf32>
    %59 = vector.extract_strided_slice %0 {offsets = [0, 5], sizes = [128, 1], strides = [1, 1]} : vector<128x8xi32> to vector<128x1xi32>
    %c320_i32 = arith.constant 320 : i32
    %60 = vector.broadcast %c320_i32 : i32 to vector<128x1xi32>
    %61 = arith.addi %59, %60 : vector<128x1xi32>
    %62 = vector.broadcast %61 : vector<128x1xi32> to vector<128x512xi32>
    %63 = arith.cmpi eq, %2, %62 : vector<128x512xi32>
    %64 = vector.extract_strided_slice %1 {offsets = [0, 5], sizes = [128, 1], strides = [1, 1]} : vector<128x8xf32> to vector<128x1xf32>
    %cst_8 = arith.constant 0.000000e+00 : f32
    %65 = vector.shape_cast %64 : vector<128x1xf32> to vector<128x1xf32>
    %66 = vector.broadcast %65 : vector<128x1xf32> to vector<128x512xf32>
    %67 = vector.broadcast %cst_8 : f32 to vector<128x512xf32>
    %68 = arith.select %63, %66, %67 : vector<128x512xi1>, vector<128x512xf32>
    %69 = arith.addf %58, %68 : vector<128x512xf32>
    %70 = vector.extract_strided_slice %0 {offsets = [0, 6], sizes = [128, 1], strides = [1, 1]} : vector<128x8xi32> to vector<128x1xi32>
    %c384_i32 = arith.constant 384 : i32
    %71 = vector.broadcast %c384_i32 : i32 to vector<128x1xi32>
    %72 = arith.addi %70, %71 : vector<128x1xi32>
    %73 = vector.broadcast %72 : vector<128x1xi32> to vector<128x512xi32>
    %74 = arith.cmpi eq, %2, %73 : vector<128x512xi32>
    %75 = vector.extract_strided_slice %1 {offsets = [0, 6], sizes = [128, 1], strides = [1, 1]} : vector<128x8xf32> to vector<128x1xf32>
    %cst_9 = arith.constant 0.000000e+00 : f32
    %76 = vector.shape_cast %75 : vector<128x1xf32> to vector<128x1xf32>
    %77 = vector.broadcast %76 : vector<128x1xf32> to vector<128x512xf32>
    %78 = vector.broadcast %cst_9 : f32 to vector<128x512xf32>
    %79 = arith.select %74, %77, %78 : vector<128x512xi1>, vector<128x512xf32>
    %80 = arith.addf %69, %79 : vector<128x512xf32>
    %81 = vector.extract_strided_slice %0 {offsets = [0, 7], sizes = [128, 1], strides = [1, 1]} : vector<128x8xi32> to vector<128x1xi32>
    %c448_i32 = arith.constant 448 : i32
    %82 = vector.broadcast %c448_i32 : i32 to vector<128x1xi32>
    %83 = arith.addi %81, %82 : vector<128x1xi32>
    %84 = vector.broadcast %83 : vector<128x1xi32> to vector<128x512xi32>
    %85 = arith.cmpi eq, %2, %84 : vector<128x512xi32>
    %86 = vector.extract_strided_slice %1 {offsets = [0, 7], sizes = [128, 1], strides = [1, 1]} : vector<128x8xf32> to vector<128x1xf32>
    %cst_10 = arith.constant 0.000000e+00 : f32
    %87 = vector.shape_cast %86 : vector<128x1xf32> to vector<128x1xf32>
    %88 = vector.broadcast %87 : vector<128x1xf32> to vector<128x512xf32>
    %89 = vector.broadcast %cst_10 : f32 to vector<128x512xf32>
    %90 = arith.select %85, %88, %89 : vector<128x512xi1>, vector<128x512xf32>
    %91 = arith.addf %80, %90 : vector<128x512xf32>
    %92 = arith.truncf %91 : vector<128x512xf32> to vector<128x512xbf16>
    %c0_11 = arith.constant 0 : index
    %c0_12 = arith.constant 0 : index
    %93 = vector.load %arg3[%c0_11, %c0_12] : memref<512x128xbf16, #tpu.memory_space<vmem>>, vector<512x128xbf16>
    %cst_13 = arith.constant dense<0.000000e+00> : vector<128x128xf32>
    %94 = tpu.matmul %92, %93, %cst_13 {dimension_numbers = #tpu.dot_dimension_numbers<[1], [0], [0], [1], [0, 0, 1, 1], [], []>} : vector<128x512xbf16>, vector<512x128xbf16>, vector<128x128xf32> -> vector<128x128xf32>
    %95 = arith.truncf %94 : vector<128x128xf32> to vector<128x128xbf16>
    %c0_14 = arith.constant 0 : index
    %c0_15 = arith.constant 0 : index
    %96 = vector.load %arg4[%c0_14, %c0_15] : memref<128x128xbf16, #tpu.memory_space<vmem>>, vector<128x128xbf16>
    %cst_16 = arith.constant dense<0.000000e+00> : vector<128x128xf32>
    %97 = tpu.matmul %95, %96, %cst_16 {dimension_numbers = #tpu.dot_dimension_numbers<[1], [0], [0], [1], [0, 0, 1, 1], [], []>} : vector<128x128xbf16>, vector<128x128xbf16>, vector<128x128xf32> -> vector<128x128xf32>
    %c0_17 = arith.constant 0 : index
    %c0_18 = arith.constant 0 : index
    %98 = vector.load %arg5[%c0_17, %c0_18] : memref<1x128xf32, #tpu.memory_space<vmem>>, vector<1x128xf32>
    %99 = vector.broadcast %98 : vector<1x128xf32> to vector<128x128xf32>
    %100 = arith.addf %97, %99 : vector<128x128xf32>
    %cst_19 = arith.constant 0.000000e+00 : f32
    %101 = vector.broadcast %cst_19 : f32 to vector<128x128xf32>
    %102 = arith.maximumf %100, %101 : vector<128x128xf32>
    %c0_20 = arith.constant 0 : index
    %c0_21 = arith.constant 0 : index
    %103 = vector.load %arg6[%c0_20, %c0_21] : memref<1x128xf32, #tpu.memory_space<vmem>>, vector<1x128xf32>
    %104 = vector.broadcast %103 : vector<1x128xf32> to vector<128x128xf32>
    %105 = arith.mulf %102, %104 : vector<128x128xf32>
    %cst_22 = arith.constant dense<0.000000e+00> : vector<128xf32>
    %106 = vector.multi_reduction <add>, %105, %cst_22 [1] : vector<128x128xf32> to vector<128xf32>
    %107 = vector.shape_cast %106 : vector<128xf32> to vector<1x128xf32>
    %c0_23 = arith.constant 0 : index
    %c0_24 = arith.constant 0 : index
    %108 = vector.load %arg7[%c0_23, %c0_24] : memref<1x1xf32, #tpu.memory_space<vmem>>, vector<1x1xf32>
    %109 = vector.broadcast %108 : vector<1x1xf32> to vector<1x128xf32>
    %110 = arith.addf %107, %109 : vector<1x128xf32>
    %c0_25 = arith.constant 0 : index
    %c0_26 = arith.constant 0 : index
    %111 = vector.load %arg8[%c0_25, %c0_26] : memref<1x128xf32, #tpu.memory_space<vmem>>, vector<1x128xf32>
    tpu.vector_store %arg8[%c0_25, %c0_26], %110 {strides = array<i32>} : memref<1x128xf32, #tpu.memory_space<vmem>>, vector<1x128xf32>,
    return
  }
  func.func @transform_0(%arg0: i32) -> (i32, i32) {
    %c0_i32 = arith.constant 0 : i32
    %c0_i32_0 = arith.constant 0 : i32
    return %arg0, %c0_i32 : i32, i32
  }
  func.func @transform_1(%arg0: i32) -> (i32, i32) {
    %c0_i32 = arith.constant 0 : i32
    %c0_i32_0 = arith.constant 0 : i32
    return %arg0, %c0_i32 : i32, i32
  }
  func.func @transform_2(%arg0: i32) -> (i32, i32) {
    %c0_i32 = arith.constant 0 : i32
    %c0_i32_0 = arith.constant 0 : i32
    %c0_i32_1 = arith.constant 0 : i32
    return %c0_i32, %c0_i32_0 : i32, i32
  }
  func.func @transform_3(%arg0: i32) -> (i32, i32) {
    %c0_i32 = arith.constant 0 : i32
    %c0_i32_0 = arith.constant 0 : i32
    %c0_i32_1 = arith.constant 0 : i32
    return %c0_i32, %c0_i32_0 : i32, i32
  }
  func.func @transform_4(%arg0: i32) -> (i32, i32) {
    %c0_i32 = arith.constant 0 : i32
    %c0_i32_0 = arith.constant 0 : i32
    %c0_i32_1 = arith.constant 0 : i32
    return %c0_i32, %c0_i32_0 : i32, i32
  }
  func.func @transform_5(%arg0: i32) -> (i32, i32) {
    %c0_i32 = arith.constant 0 : i32
    %c0_i32_0 = arith.constant 0 : i32
    %c0_i32_1 = arith.constant 0 : i32
    return %c0_i32, %c0_i32_0 : i32, i32
  }
  func.func @transform_6(%arg0: i32) -> (i32, i32) {
    %c0_i32 = arith.constant 0 : i32
    %c0_i32_0 = arith.constant 0 : i32
    %c0_i32_1 = arith.constant 0 : i32
    return %c0_i32, %c0_i32_0 : i32, i32
  }
  func.func @transform_7(%arg0: i32) -> (i32, i32) {
    %c0_i32 = arith.constant 0 : i32
    %c0_i32_0 = arith.constant 0 : i32
    return %c0_i32, %arg0 : i32, i32
  }
}

</mosaic_0001>

<bundles_post_ra>
// kernel: tpu_custom_call.1
= control target key start
LH: loop header
LB: loop body
LE: loop exit
PB: predicated region body
PF: predicated region fallthrough
CT: control target
= control target key end

     0   :  { %s8705_s0 = inlined_call_operand.vmem [shape: s32[256,8], index: 0, kind: input, shape index: {}]   ;;  %s8706_s1 = inlined_call_operand.vmem [shape: f32[256,8], index: 1, kind: input, shape index: {}]   ;;  %s8707_s2 = inlined_call_operand.vmem [shape: bf16[512,128], index: 2, kind: input, shape index: {}]   ;;  %s8708_s3 = inlined_call_operand.vmem [shape: bf16[128,128], index: 3, kind: input, shape index: {}]   ;;  %s8709_s4 = inlined_call_operand.vmem [shape: f32[1,128], index: 4, kind: input, shape index: {}]   ;;  %s8710_s5 = inlined_call_operand.vmem [shape: f32[1,128], index: 5, kind: input, shape index: {}]   ;;  %s8711_s6 = inlined_call_operand.<no memory space> [shape: f32[1,1], index: 6, kind: input, shape index: {}]   ;;  %s8712_s7 = inlined_call_operand.hbm [shape: f32[1,256], index: 7, kind: output, shape index: {}]  }
   0x1   :  { %v12_v0 = vstv %s8711_s6 }
   0x2   :  { %13 = vst [vmem:[#allocation2] sm:$0x1] %v12_v0 }
   0x3   :  { %14 = vsyncpa [#allocation4], 0 }
   0x4   :  { %16 = vsyncpa [#allocation4 + $0x1], 0  ;;  %s4265_s26 = smov 0   ;;  %s4267_s27 = smov 0  }
   0x5   :  { %s4269_s28 = smov 0   ;;  %s4271_s29 = smov 0  }
   0x6 LB: > { %s4286_s6 = sadd.s32 4294967295, %s4212_s29   ;;  %s3758_s30 = sadd.s32 4294967294, %s4212_s29   ;;  %s4212_s29 = sphi %s4271_s29, %s9439_s29   ;;  %s4208_s28 = sphi %s4269_s28, %s9438_s28   ;;  %s4204_s27 = sphi %s4267_s27, %s9437_s27   ;;  %s4200_s26 = sphi %s4265_s26, %s9436_s26  }
   0x7   : > { %s4290_s8 = sadd.s32 1, %s4212_s29   ;;  %s186_s9 = sadd.s32 1, %s4208_s28 }
   0x8   : > { %s183_s10 = ssub.s32 %s4212_s29, %s4290_s8  ;;  %p196_p0 = scmp.ne.s32.totalorder %s4208_s28, %s4204_s27 }
   0x9   : > { %p184_p1 = scmp.eq.s32.totalorder %s183_s10, 0  ;;  %p197_p2 = scmp.eq.s32.totalorder %s4286_s6, 1 }
   0xa   : > { %p202_p3 = scmp.ne.s32.totalorder %s4204_s27, %s4200_s26  ;;  %p203_p4 = scmp.eq.s32.totalorder %s3758_s30, 1 }
   0xb   : > { %s4301_s11 = scalar_select %p184_p1, %s4208_s28, %s186_s9  }
   0xc   : > { %p4303_p5 = por %p197_p2, %p196_p0  ;;  %p4307_p6 = por %p203_p4, %p202_p3 }
   0xd   : > { %p3761_p7 = scmp.ge.s32.totalorder %s4212_s29, 1  ;;  %p254_p8 = scmp.lt.s32.totalorder %s4212_s29, 3 }
   0xf   : > { %p255_p9 = pnand %p3761_p7, %p254_p8 }
  0x11   : > { %258 = sbr.rel (%p255_p9) target bundleno = 1419 (0x58b), region = 48 }
  0x16   : > { %s3762_s14 = sshll.u32 %s4286_s6, 4  ;;  %v8713_v1 = vmov 0   ;;  %v4215_v35 = vmov 1   ;;  %s288_s16 = sand.u32 1, %s4204_s27  }
  0x17   : > { %4041 = vset.pattern.permute.xlu2 %v8713_v1  ;;  %4040 = vset.pattern.permute.xlu1 %v8713_v1  ;;  %p291_p10 = scmp.lt.s32.totalorder %s3762_s14, 31  ;;  %s3687_s20 = scalar_lea.hbm %s8712_s7, %s4286_s6 }
  0x18   : > { %4039 = vset.pattern.permute.xlu0 %v8713_v1  ;;  %s289_s22 = scalar_lea.vmem [#allocation3], %s288_s16  ;;  %s3691_s6 = sshll.u32 %s3687_s20, 4  ;;  %s3692_s6 = int_to_ptr.hbm [resolvable:$true] %s3691_s6 }
  0x19   : > { %s9441_s14 = smov (!%p291_p10, %s3762_s14), 31  ;;  %s3689_s23 = sshll.u32 %s289_s22, 4  ;;  %s3690_s23 = int_to_ptr.vmem [resolvable:$true] %s3689_s23 }
  0x1a   : > { %s3763_s15 = sshll.u32 %s9441_s14, 3  ;;  %s3679_s24 = scalar_lea.sflag [#allocation4], %s288_s16 }
  0x1b   : > { %s4325_s18 = scalar_lea.vmem %s8705_s0, %s3763_s15  ;;  %s4392_s21 = scalar_lea.vmem %s8706_s1, %s3763_s15 }
  0x1c   : > { %v4328_v2 = vld [vmem:[%s4325_s18 + $0x20] sm:$0xff]  ;;  %v4331_v3 = vld [vmem:[%s4325_s18 + $0x10] sm:$0xff]  ;;  %v4340_v5 = vld [vmem:[%s4325_s18 + $0x28] sm:$0xff]  ;;  %s4170_s9 = scalar_lea.hbm %s8712_s7, 2 }
  0x1d   : > { %v4334_v4 = vld [vmem:[%s4325_s18] sm:$0xff]  ;;  %352 = vperm.xlu2 %4041, %v4328_v2   ;;  %346 = vperm.xlu1 %4040, %v4331_v3   ;;  %v4343_v6 = vld [vmem:[%s4325_s18 + $0x18] sm:$0xff]  ;;  %v4346_v7 = vld [vmem:[%s4325_s18 + $0x8] sm:$0xff]  ;;  %v661_v36 = vadd.s32 64, %v4331_v3  ;;  %v663_v40 = vadd.s32 64, %v4328_v2  ;;  %v664_v42 = vadd.s32 64, %v4340_v5 }
  0x1e   : > { %340 = vperm.xlu0 %4039, %v4334_v4   ;;  %v4352_v8 = vld [vmem:[%s4325_s18 + $0x40] sm:$0xff]  ;;  %v4355_v9 = vld [vmem:[%s4325_s18 + $0x38] sm:$0xff]  ;;  %v4358_v10 = vld [vmem:[%s4325_s18 + $0x30] sm:$0xff]  ;;  %v659_v33 = vadd.s32 64, %v4334_v4  ;;  %v660_v37 = vadd.s32 64, %v4346_v7  ;;  %v662_v38 = vadd.s32 64, %v4343_v6 }
  0x1f   : > { %v4364_v11 = vld [vmem:[%s4325_s18 + $0x58] sm:$0xff]  ;;  %v4367_v12 = vld [vmem:[%s4325_s18 + $0x50] sm:$0xff]  ;;  %v4370_v13 = vld [vmem:[%s4325_s18 + $0x48] sm:$0xff]  ;;  %v665_v41 = vadd.s32 64, %v4358_v10  ;;  %v666_v44 = vadd.s32 64, %v4355_v9  ;;  %v667_v46 = vadd.s32 64, %v4352_v8 }
  0x20   : > { %v4376_v14 = vld [vmem:[%s4325_s18 + $0x70] sm:$0xff]  ;;  %v4379_v15 = vld [vmem:[%s4325_s18 + $0x68] sm:$0xff]  ;;  %v4382_v16 = vld [vmem:[%s4325_s18 + $0x60] sm:$0xff]  ;;  %v668_v45 = vadd.s32 64, %v4370_v13  ;;  %v669_v48 = vadd.s32 64, %v4367_v12  ;;  %v670_v50 = vadd.s32 64, %v4364_v11 }
  0x21   : > { %v4395_v17 = vld [vmem:[%s4392_s21 + $0x8] sm:$0xff]  ;;  %v4398_v18 = vld [vmem:[%s4392_s21] sm:$0xff]  ;;  %v4401_v19 = vld [vmem:[%s4325_s18 + $0x78] sm:$0xff]  ;;  %v671_v49 = vadd.s32 64, %v4382_v16  ;;  %v672_v54 = vadd.s32 64, %v4379_v15  ;;  %v673_v56 = vadd.s32 64, %v4376_v14 }
  0x22   : > { %v4407_v20 = vld [vmem:[%s4392_s21 + $0x20] sm:$0xff]  ;;  %v4410_v21 = vld [vmem:[%s4392_s21 + $0x18] sm:$0xff]  ;;  %v4413_v22 = vld [vmem:[%s4392_s21 + $0x10] sm:$0xff]  ;;  %v674_v55 = vadd.s32 64, %v4401_v19  ;;  %v985_v1 = vadd.s32 128, %v4358_v10 }
  0x23   : > { %v4419_v23 = vld [vmem:[%s4392_s21 + $0x38] sm:$0xff]  ;;  %v4422_v24 = vld [vmem:[%s4392_s21 + $0x30] sm:$0xff]  ;;  %v4425_v25 = vld [vmem:[%s4392_s21 + $0x28] sm:$0xff] }
  0x24   : > { %v4431_v26 = vld [vmem:[%s4392_s21 + $0x50] sm:$0xff]  ;;  %v4434_v27 = vld [vmem:[%s4392_s21 + $0x48] sm:$0xff]  ;;  %v4437_v28 = vld [vmem:[%s4392_s21 + $0x40] sm:$0xff] }
  0x25   : > { %355 = vperm.xlu2 %4041, %v4340_v5   ;;  %349 = vperm.xlu1 %4040, %v4343_v6   ;;  %v4443_v29 = vld [vmem:[%s4392_s21 + $0x68] sm:$0xff]  ;;  %v4446_v30 = vld [vmem:[%s4392_s21 + $0x60] sm:$0xff]  ;;  %v4449_v31 = vld [vmem:[%s4392_s21 + $0x58] sm:$0xff] }
  0x26   : > { %343 = vperm.xlu0 %4039, %v4346_v7   ;;  %v4455_v32 = vld [vmem:[%s4392_s21 + $0x78] sm:$0xff]  ;;  %v4459_v34 = vld [vmem:[%s4392_s21 + $0x70] sm:$0xff] }
  0x2d   : > { %364 = vperm.xlu2 %4041, %v4352_v8   ;;  %361 = vperm.xlu1 %4040, %v4355_v9  }
  0x2e   : > { %358 = vperm.xlu0 %4039, %v4358_v10  }
  0x35   : > { %373 = vperm.xlu2 %4041, %v4364_v11   ;;  %370 = vperm.xlu1 %4040, %v4367_v12  }
  0x36   : > { %367 = vperm.xlu0 %4039, %v4370_v13  }
  0x3d   : > { %382 = vperm.xlu2 %4041, %v4376_v14   ;;  %379 = vperm.xlu1 %4040, %v4379_v15  }
  0x3e   : > { %376 = vperm.xlu0 %4039, %v4382_v16  }
  0x45   : > { %458 = vperm.xlu2 %4041, %v4395_v17   ;;  %453 = vperm.xlu1 %4040, %v4398_v18  }
  0x46   : > { %385 = vperm.xlu0 %4039, %v4401_v19  }
  0x4d   : > { %473 = vperm.xlu2 %4041, %v4407_v20   ;;  %468 = vperm.xlu1 %4040, %v4410_v21  }
  0x4e   : > { %463 = vperm.xlu0 %4039, %v4413_v22  }
  0x55   : > { %488 = vperm.xlu2 %4041, %v4419_v23   ;;  %483 = vperm.xlu1 %4040, %v4422_v24  }
  0x56   : > { %478 = vperm.xlu0 %4039, %v4425_v25  }
  0x5d   : > { %503 = vperm.xlu2 %4041, %v4431_v26   ;;  %498 = vperm.xlu1 %4040, %v4434_v27  }
  0x5e   : > { %493 = vperm.xlu0 %4039, %v4437_v28  }
  0x65   : > { %518 = vperm.xlu2 %4041, %v4443_v29   ;;  %513 = vperm.xlu1 %4040, %v4446_v30  }
  0x66   : > { %508 = vperm.xlu0 %4039, %v4449_v31  }
  0x6d   : > { %4042 = vset.pattern.permute.xlu2 %v4215_v35  ;;  %528 = vperm.xlu1 %4040, %v4455_v32  }
  0x6e   : > { %523 = vperm.xlu0 %4039, %v4459_v34   ;;  %676 = vperm.xlu2 %4042, %v659_v33  }
  0x75   : > { %4044 = vset.pattern.permute.xlu1 %v4215_v35 }
  0x76   : > { %4043 = vset.pattern.permute.xlu0 %v4215_v35  ;;  %682 = vperm.xlu1 %4044, %v661_v36  }
  0x77   : > { %679 = vperm.xlu0 %4043, %v660_v37   ;;  %685 = vperm.xlu2 %4042, %v662_v38   ;;  %v4466_v39 = vpop.permute.xlu2 %352 }
  0x7e   : > { %688 = vperm.xlu1 %4044, %v663_v40  }
  0x7f   : > { %694 = vperm.xlu0 %4043, %v665_v41   ;;  %691 = vperm.xlu2 %4042, %v664_v42   ;;  %v4471_v43 = vpop.permute.xlu2 %355 }
  0x86   : > { %697 = vperm.xlu1 %4044, %v666_v44  }
  0x87   : > { %703 = vperm.xlu0 %4043, %v668_v45   ;;  %700 = vperm.xlu2 %4042, %v667_v46   ;;  %v4476_v47 = vpop.permute.xlu2 %364  ;;  %v980_v46 = vadd.s32 128, %v4346_v7 }
  0x8e   : > { %706 = vperm.xlu1 %4044, %v669_v48   ;;  %v979_v48 = vadd.s32 128, %v4334_v4 }
  0x8f   : > { %712 = vperm.xlu0 %4043, %v671_v49   ;;  %709 = vperm.xlu2 %4042, %v670_v50   ;;  %v4481_v51 = vpop.permute.xlu2 %373  ;;  %v4483_v52 = vpop.permute.xlu1 %346  ;;  %v4216_v49 = vmov 2  }
  0x90   : > { %v4485_v53 = vpop.permute.xlu0 %340 }
  0x96   : > { %715 = vperm.xlu1 %4044, %v672_v54  }
  0x97   : > { %721 = vperm.xlu0 %4043, %v674_v55   ;;  %718 = vperm.xlu2 %4042, %v673_v56   ;;  %v4490_v57 = vpop.permute.xlu2 %382  ;;  %v4492_v58 = vpop.permute.xlu1 %349  ;;  %v981_v56 = vadd.s32 128, %v4331_v3 }
  0x98   : > { %v4494_v59 = vpop.permute.xlu0 %343 }
  0x9e   : > { %788 = vperm.xlu1 %4044, %v4398_v18  }
  0x9f   : > { %796 = vperm.xlu0 %4043, %v4413_v22   ;;  %792 = vperm.xlu2 %4042, %v4395_v17   ;;  %v4499_v60 = vpop.permute.xlu2 %458  ;;  %v4501_v61 = vpop.permute.xlu1 %361 }
  0xa0   : > { %8869 = vst [vmem:[#allocation6_spill] sm:$0xff] %v4501_v61  ;;  %v4503_v62 = vpop.permute.xlu0 %358 }
  0xa6   : > { %800 = vperm.xlu1 %4044, %v4410_v21  }
  0xa7   : > { %808 = vperm.xlu0 %4043, %v4425_v25   ;;  %804 = vperm.xlu2 %4042, %v4407_v20   ;;  %v4508_v63 = vpop.permute.xlu2 %473  ;;  %v4510_v0 = vpop.permute.xlu1 %370 }
  0xa8   : > { %8870 = vst [vmem:[#allocation7_spill] sm:$0xff] %v4510_v0  ;;  %v4512_v33 = vpop.permute.xlu0 %367  ;;  %v988_v0 = vadd.s32 128, %v4370_v13 }
  0xae   : > { %812 = vperm.xlu1 %4044, %v4422_v24  }
  0xaf   : > { %820 = vperm.xlu0 %4043, %v4437_v28   ;;  %816 = vperm.xlu2 %4042, %v4419_v23   ;;  %v4517_v35 = vpop.permute.xlu2 %488  ;;  %v4519_v36 = vpop.permute.xlu1 %379 }
  0xb0   : > { %8871 = vst [vmem:[#allocation8_spill] sm:$0xff] %v4517_v35  ;;  %v4521_v37 = vpop.permute.xlu0 %376  ;;  %v982_v35 = vadd.s32 128, %v4343_v6 }
  0xb6   : > { %824 = vperm.xlu1 %4044, %v4434_v27  }
  0xb7   : > { %832 = vperm.xlu0 %4043, %v4449_v31   ;;  %828 = vperm.xlu2 %4042, %v4431_v26   ;;  %v4526_v38 = vpop.permute.xlu2 %503  ;;  %v4528_v40 = vpop.permute.xlu1 %453 }
  0xb8   : > { %8872 = vst [vmem:[#allocation9_spill] sm:$0xff] %v4526_v38  ;;  %v4530_v41 = vpop.permute.xlu0 %385 }
  0xbe   : > { %836 = vperm.xlu1 %4044, %v4446_v30  }
  0xbf   : > { %844 = vperm.xlu0 %4043, %v4459_v34   ;;  %840 = vperm.xlu2 %4042, %v4443_v29   ;;  %v4535_v42 = vpop.permute.xlu2 %518  ;;  %v4537_v44 = vpop.permute.xlu1 %468 }
  0xc0   : > { %v4539_v45 = vpop.permute.xlu0 %463 }
  0xc6   : > { %848 = vperm.xlu1 %4044, %v4455_v32  }
  0xc7   : > { %4046 = vset.pattern.permute.xlu0 %v4216_v49  ;;  %4045 = vset.pattern.permute.xlu2 %v4216_v49  ;;  %v4544_v50 = vpop.permute.xlu1 %483 }
  0xc8   : > { %999 = vperm.xlu0 %4046, %v980_v46   ;;  %v4546_v54 = vpop.permute.xlu0 %478  ;;  %996 = vperm.xlu2 %4045, %v979_v48   ;;  %v4548_v55 = vpop.permute.xlu2 %676  ;;  %v983_v48 = vadd.s32 128, %v4328_v2 }
  0xc9   : > { %8873 = vst [vmem:[#allocation10_spill] sm:$0xff] %v4546_v54 }
  0xca   : > { %8874 = vst [vmem:[#allocation11_spill] sm:$0xff] %v4548_v55  ;;  %v984_v55 = vadd.s32 128, %v4340_v5 }
  0xce   : > { %4047 = vset.pattern.permute.xlu1 %v4216_v49 }
  0xcf   : > { %v4553_v61 = vpop.permute.xlu1 %498  ;;  %1002 = vperm.xlu1 %4047, %v981_v56  }
  0xd0   : > { %8875 = vst [vmem:[#allocation12_spill] sm:$0xff] %v4553_v61  ;;  %1014 = vperm.xlu0 %4046, %v985_v1   ;;  %v4555_v38 = vpop.permute.xlu0 %493  ;;  %1005 = vperm.xlu2 %4045, %v982_v35   ;;  %v986_v1 = vadd.s32 128, %v4355_v9  ;;  %v991_v35 = vadd.s32 128, %v4382_v16 }
  0xd1   : > { %8876 = vst [vmem:[#allocation13_spill] sm:$0xff] %v4555_v38  ;;  %v4557_v46 = vpop.permute.xlu2 %685 }
  0xd2   : > { %8877 = vst [vmem:[#allocation14_spill] sm:$0xff] %v4557_v46  ;;  %v987_v46 = vadd.s32 128, %v4352_v8 }
  0xd7   : > { %v4562_v54 = vpop.permute.xlu1 %513  ;;  %1008 = vperm.xlu1 %4047, %v983_v48  }
  0xd8   : > { %8878 = vst [vmem:[#allocation15_spill] sm:$0xff] %v4562_v54  ;;  %1023 = vperm.xlu0 %4046, %v988_v0   ;;  %v4564_v49 = vpop.permute.xlu0 %508  ;;  %1011 = vperm.xlu2 %4045, %v984_v55   ;;  %v989_v0 = vadd.s32 128, %v4367_v12  ;;  %v994_v55 = vadd.s32 128, %v4401_v19 }
  0xd9   : > { %8879 = vst [vmem:[#allocation16_spill] sm:$0xff] %v4564_v49  ;;  %v4566_v56 = vpop.permute.xlu2 %691 }
  0xda   : > { %8880 = vst [vmem:[#allocation17_spill] sm:$0xff] %v4566_v56  ;;  %v990_v56 = vadd.s32 128, %v4364_v11 }
  0xdf   : > { %v4571_v38 = vpop.permute.xlu1 %528  ;;  %1017 = vperm.xlu1 %4047, %v986_v1  }
  0xe0   : > { %8881 = vst [vmem:[#allocation18_spill] sm:$0xff] %v4571_v38  ;;  %1032 = vperm.xlu0 %4046, %v991_v35   ;;  %v4573_v61 = vpop.permute.xlu0 %523  ;;  %1020 = vperm.xlu2 %4045, %v987_v46   ;;  %v992_v35 = vadd.s32 128, %v4379_v15  ;;  %v993_v46 = vadd.s32 128, %v4376_v14 }
  0xe1   : > { %8882 = vst [vmem:[#allocation19_spill] sm:$0xff] %v4573_v61  ;;  %v4575_v48 = vpop.permute.xlu2 %700 }
  0xe2   : > { %8883 = vst [vmem:[#allocation20_spill] sm:$0xff] %v4575_v48 }
  0xe7   : > { %1026 = vperm.xlu1 %4047, %v989_v0  }
  0xe8   : > { %1041 = vperm.xlu0 %4046, %v994_v55   ;;  %1029 = vperm.xlu2 %4045, %v990_v56   ;;  %v4580_v49 = vpop.permute.xlu1 %682 }
  0xe9   : > { %8884 = vst [vmem:[#allocation21_spill] sm:$0xff] %v4580_v49  ;;  %v4582_v54 = vpop.permute.xlu0 %679  ;;  %v4584_v1 = vpop.permute.xlu2 %709 }
  0xea   : > { %8885 = vst [vmem:[#allocation22_spill] sm:$0xff] %v4582_v54 }
  0xeb   : > { %8886 = vst [vmem:[#allocation23_spill] sm:$0xff] %v4584_v1 }
  0xef   : > { %1035 = vperm.xlu1 %4047, %v992_v35  }
  0xf0   : > { %1116 = vperm.xlu0 %4046, %v4413_v22   ;;  %1038 = vperm.xlu2 %4045, %v993_v46   ;;  %v4589_v48 = vpop.permute.xlu1 %688 }
  0xf1   : > { %8887 = vst [vmem:[#allocation24_spill] sm:$0xff] %v4589_v48  ;;  %v4591_v61 = vpop.permute.xlu0 %694  ;;  %v4593_v0 = vpop.permute.xlu2 %718 }
  0xf2   : > { %8888 = vst [vmem:[#allocation25_spill] sm:$0xff] %v4591_v61 }
  0xf3   : > { %8889 = vst [vmem:[#allocation26_spill] sm:$0xff] %v4593_v0 }
  0xf7   : > { %1108 = vperm.xlu1 %4047, %v4398_v18  }
  0xf8   : > { %1128 = vperm.xlu0 %4046, %v4425_v25   ;;  %1112 = vperm.xlu2 %4045, %v4395_v17   ;;  %v4598_v56 = vpop.permute.xlu1 %697 }
  0xf9   : > { %8890 = vst [vmem:[#allocation27_spill] sm:$0xff] %v4598_v56  ;;  %v4600_v55 = vpop.permute.xlu0 %703  ;;  %v4602_v35 = vpop.permute.xlu2 %792 }
  0xfa   : > { %8891 = vst [vmem:[#allocation28_spill] sm:$0xff] %v4600_v55 }
  0xfb   : > { %8892 = vst [vmem:[#allocation29_spill] sm:$0xff] %v4602_v35  ;;  %v1300_v35 = vadd.s32 192, %v4346_v7 }
  0xff   : > { %1120 = vperm.xlu1 %4047, %v4410_v21  }
 0x100   : > { %1140 = vperm.xlu0 %4046, %v4437_v28   ;;  %1124 = vperm.xlu2 %4045, %v4407_v20   ;;  %v4607_v46 = vpop.permute.xlu1 %706 }
 0x101   : > { %8893 = vst [vmem:[#allocation30_spill] sm:$0xff] %v4607_v46  ;;  %v4609_v0 = vpop.permute.xlu0 %712  ;;  %v4611_v1 = vpop.permute.xlu2 %804 }
 0x102   : > { %8894 = vst [vmem:[#allocation31_spill] sm:$0xff] %v4609_v0 }
 0x103   : > { %8895 = vst [vmem:[#allocation32_spill] sm:$0xff] %v4611_v1 }
 0x107   : > { %1132 = vperm.xlu1 %4047, %v4422_v24  }
 0x108   : > { %1152 = vperm.xlu0 %4046, %v4449_v31   ;;  %1136 = vperm.xlu2 %4045, %v4419_v23   ;;  %v4616_v56 = vpop.permute.xlu1 %715 }
 0x109   : > { %8896 = vst [vmem:[#allocation33_spill] sm:$0xff] %v4616_v56  ;;  %v4618_v55 = vpop.permute.xlu0 %721  ;;  %v4620_v61 = vpop.permute.xlu2 %816  ;;  %v4217_v56 = vmov 3  }
 0x10a   : > { %8897 = vst [vmem:[#allocation34_spill] sm:$0xff] %v4618_v55 }
 0x10b   : > { %8898 = vst [vmem:[#allocation35_spill] sm:$0xff] %v4620_v61 }
 0x10f   : > { %1144 = vperm.xlu1 %4047, %v4434_v27  }
 0x110   : > { %1164 = vperm.xlu0 %4046, %v4459_v34   ;;  %1148 = vperm.xlu2 %4045, %v4431_v26   ;;  %v4625_v46 = vpop.permute.xlu1 %788 }
 0x111   : > { %8899 = vst [vmem:[#allocation36_spill] sm:$0xff] %v4625_v46  ;;  %v4627_v0 = vpop.permute.xlu0 %796  ;;  %v4629_v1 = vpop.permute.xlu2 %828  ;;  %v1305_v46 = vadd.s32 192, %v4358_v10 }
 0x112   : > { %8900 = vst [vmem:[#allocation37_spill] sm:$0xff] %v4627_v0  ;;  %v1299_v0 = vadd.s32 192, %v4334_v4 }
 0x113   : > { %8901 = vst [vmem:[#allocation38_spill] sm:$0xff] %v4629_v1 }
 0x117   : > { %1156 = vperm.xlu1 %4047, %v4446_v30  }
 0x118   : > { %4049 = vset.pattern.permute.xlu0 %v4217_v56  ;;  %1160 = vperm.xlu2 %4045, %v4443_v29   ;;  %v4634_v61 = vpop.permute.xlu1 %800 }
 0x119   : > { %8902 = vst [vmem:[#allocation39_spill] sm:$0xff] %v4634_v61  ;;  %1319 = vperm.xlu0 %4049, %v1300_v35   ;;  %v4636_v55 = vpop.permute.xlu0 %808  ;;  %v4638_v48 = vpop.permute.xlu2 %840  ;;  %v1301_v35 = vadd.s32 192, %v4331_v3 }
 0x11a   : > { %8903 = vst [vmem:[#allocation40_spill] sm:$0xff] %v4636_v55  ;;  %v1308_v55 = vadd.s32 192, %v4370_v13 }
 0x11b   : > { %8904 = vst [vmem:[#allocation41_spill] sm:$0xff] %v4638_v48  ;;  %v1302_v48 = vadd.s32 192, %v4343_v6 }
 0x11f   : > { %1168 = vperm.xlu1 %4047, %v4455_v32  }
 0x120   : > { %4048 = vset.pattern.permute.xlu2 %v4217_v56  ;;  %v4643_v1 = vpop.permute.xlu1 %812 }
 0x121   : > { %8905 = vst [vmem:[#allocation42_spill] sm:$0xff] %v4643_v1  ;;  %1334 = vperm.xlu0 %4049, %v1305_v46   ;;  %v4645_v49 = vpop.permute.xlu0 %820  ;;  %1316 = vperm.xlu2 %4048, %v1299_v0   ;;  %v1303_v0 = vadd.s32 192, %v4328_v2 }
 0x122   : > { %8906 = vst [vmem:[#allocation43_spill] sm:$0xff] %v4645_v49  ;;  %v4647_v54 = vpop.permute.xlu2 %996  ;;  %v1304_v49 = vadd.s32 192, %v4340_v5 }
 0x123   : > { %8907 = vst [vmem:[#allocation44_spill] sm:$0xff] %v4647_v54  ;;  %v1311_v54 = vadd.s32 192, %v4382_v16 }
 0x127   : > { %4050 = vset.pattern.permute.xlu1 %v4217_v56 }
 0x128   : > { %1322 = vperm.xlu1 %4050, %v1301_v35   ;;  %v4652_v61 = vpop.permute.xlu1 %824 }
 0x129   : > { %1343 = vperm.xlu0 %4049, %v1308_v55   ;;  %v4654_v38 = vpop.permute.xlu0 %832  ;;  %1325 = vperm.xlu2 %4048, %v1302_v48   ;;  %v1306_v55 = vadd.s32 192, %v4355_v9  ;;  %v1314_v48 = vadd.s32 192, %v4401_v19 }
 0x12a   : > { %8908 = vst [vmem:[#allocation45_spill] sm:$0xff] %v4654_v38  ;;  %v4656_v46 = vpop.permute.xlu2 %1005 }
 0x12b   : > { %8909 = vst [vmem:[#allocation46_spill] sm:$0xff] %v4656_v46  ;;  %v1307_v46 = vadd.s32 192, %v4352_v8 }
 0x130   : > { %1328 = vperm.xlu1 %4050, %v1303_v0   ;;  %v4661_v1 = vpop.permute.xlu1 %836 }
 0x131   : > { %8910 = vst [vmem:[#allocation47_spill] sm:$0xff] %v4661_v1  ;;  %1352 = vperm.xlu0 %4049, %v1311_v54   ;;  %v4663_v56 = vpop.permute.xlu0 %844  ;;  %1331 = vperm.xlu2 %4048, %v1304_v49   ;;  %v1309_v54 = vadd.s32 192, %v4367_v12  ;;  %v1310_v49 = vadd.s32 192, %v4364_v11 }
 0x132   : > { %8911 = vst [vmem:[#allocation48_spill] sm:$0xff] %v4663_v56  ;;  %v4665_v35 = vpop.permute.xlu2 %1011 }
 0x133   : > { %8912 = vst [vmem:[#allocation49_spill] sm:$0xff] %v4665_v35 }
 0x138   : > { %1337 = vperm.xlu1 %4050, %v1306_v55   ;;  %v4670_v38 = vpop.permute.xlu1 %848 }
 0x139   : > { %8913 = vst [vmem:[#allocation50_spill] sm:$0xff] %v4670_v38  ;;  %1361 = vperm.xlu0 %4049, %v1314_v48   ;;  %1340 = vperm.xlu2 %4048, %v1307_v46   ;;  %v1312_v46 = vadd.s32 192, %v4379_v15  ;;  %v1313_v48 = vadd.s32 192, %v4376_v14 }
 0x13a   : > { %v4672_v0 = vpop.permute.xlu0 %999  ;;  %v4674_v1 = vpop.permute.xlu2 %1020 }
 0x13b   : > { %8914 = vst [vmem:[#allocation51_spill] sm:$0xff] %v4672_v0 }
 0x13c   : > { %8915 = vst [vmem:[#allocation52_spill] sm:$0xff] %v4674_v1 }
 0x140   : > { %1346 = vperm.xlu1 %4050, %v1309_v54  }
 0x141   : > { %1436 = vperm.xlu0 %4049, %v4413_v22   ;;  %1349 = vperm.xlu2 %4048, %v1310_v49   ;;  %v4679_v35 = vpop.permute.xlu1 %1002 }
 0x142   : > { %8916 = vst [vmem:[#allocation53_spill] sm:$0xff] %v4679_v35  ;;  %v4681_v56 = vpop.permute.xlu0 %1014  ;;  %v4683_v55 = vpop.permute.xlu2 %1029 }
 0x143   : > { %8917 = vst [vmem:[#allocation54_spill] sm:$0xff] %v4681_v56 }
 0x144   : > { %8918 = vst [vmem:[#allocation55_spill] sm:$0xff] %v4683_v55 }
 0x148   : > { %1355 = vperm.xlu1 %4050, %v1312_v46  }
 0x149   : > { %1448 = vperm.xlu0 %4049, %v4425_v25   ;;  %1358 = vperm.xlu2 %4048, %v1313_v48   ;;  %v4688_v0 = vpop.permute.xlu1 %1008 }
 0x14a   : > { %8919 = vst [vmem:[#allocation56_spill] sm:$0xff] %v4688_v0  ;;  %v4690_v54 = vpop.permute.xlu0 %1023  ;;  %v4692_v1 = vpop.permute.xlu2 %1038 }
 0x14b   : > { %8920 = vst [vmem:[#allocation57_spill] sm:$0xff] %v4690_v54  ;;  %v1620_v54 = vadd.s32 256, %v4346_v7 }
 0x14c   : > { %8921 = vst [vmem:[#allocation58_spill] sm:$0xff] %v4692_v1 }
 0x150   : > { %1428 = vperm.xlu1 %4050, %v4398_v18  }
 0x151   : > { %1460 = vperm.xlu0 %4049, %v4437_v28   ;;  %1432 = vperm.xlu2 %4048, %v4395_v17   ;;  %v4697_v49 = vpop.permute.xlu1 %1017 }
 0x152   : > { %8922 = vst [vmem:[#allocation59_spill] sm:$0xff] %v4697_v49  ;;  %v4699_v55 = vpop.permute.xlu0 %1032  ;;  %v4701_v46 = vpop.permute.xlu2 %1112 }
 0x153   : > { %8923 = vst [vmem:[#allocation60_spill] sm:$0xff] %v4699_v55 }
 0x154   : > { %8924 = vst [vmem:[#allocation61_spill] sm:$0xff] %v4701_v46 }
 0x158   : > { %1440 = vperm.xlu1 %4050, %v4410_v21  }
 0x159   : > { %1472 = vperm.xlu0 %4049, %v4449_v31   ;;  %1444 = vperm.xlu2 %4048, %v4407_v20   ;;  %v4706_v48 = vpop.permute.xlu1 %1026 }
 0x15a   : > { %8925 = vst [vmem:[#allocation62_spill] sm:$0xff] %v4706_v48  ;;  %v4708_v0 = vpop.permute.xlu0 %1041  ;;  %v4710_v1 = vpop.permute.xlu2 %1124  ;;  %v4218_v48 = vmov 4  }
 0x15b   : > { %8926 = vst [vmem:[#allocation63_spill] sm:$0xff] %v4708_v0 }
 0x15c   : > { %8927 = vst [vmem:[#allocation64_spill] sm:$0xff] %v4710_v1 }
 0x160   : > { %1452 = vperm.xlu1 %4050, %v4422_v24  }
 0x161   : > { %1484 = vperm.xlu0 %4049, %v4459_v34   ;;  %1456 = vperm.xlu2 %4048, %v4419_v23   ;;  %v4715_v49 = vpop.permute.xlu1 %1035 }
 0x162   : > { %8928 = vst [vmem:[#allocation65_spill] sm:$0xff] %v4715_v49  ;;  %v4717_v46 = vpop.permute.xlu0 %1116  ;;  %v4719_v55 = vpop.permute.xlu2 %1136  ;;  %v1625_v49 = vadd.s32 256, %v4358_v10 }
 0x163   : > { %8929 = vst [vmem:[#allocation66_spill] sm:$0xff] %v4717_v46 }
 0x164   : > { %8930 = vst [vmem:[#allocation67_spill] sm:$0xff] %v4719_v55 }
 0x168   : > { %1464 = vperm.xlu1 %4050, %v4434_v27  }
 0x169   : > { %4052 = vset.pattern.permute.xlu0 %v4218_v48  ;;  %1468 = vperm.xlu2 %4048, %v4431_v26   ;;  %v4724_v1 = vpop.permute.xlu1 %1108 }
 0x16a   : > { %8931 = vst [vmem:[#allocation68_spill] sm:$0xff] %v4724_v1  ;;  %1639 = vperm.xlu0 %4052, %v1620_v54   ;;  %v4726_v0 = vpop.permute.xlu0 %1128  ;;  %v4728_v56 = vpop.permute.xlu2 %1148  ;;  %v1628_v1 = vadd.s32 256, %v4370_v13  ;;  %v1619_v54 = vadd.s32 256, %v4334_v4 }
 0x16b   : > { %8932 = vst [vmem:[#allocation69_spill] sm:$0xff] %v4726_v0 }
 0x16c   : > { %8933 = vst [vmem:[#allocation70_spill] sm:$0xff] %v4728_v56 }
 0x170   : > { %1476 = vperm.xlu1 %4050, %v4446_v30  }
 0x171   : > { %1480 = vperm.xlu2 %4048, %v4443_v29   ;;  %v4733_v55 = vpop.permute.xlu1 %1120 }
 0x172   : > { %8934 = vst [vmem:[#allocation71_spill] sm:$0xff] %v4733_v55  ;;  %1654 = vperm.xlu0 %4052, %v1625_v49   ;;  %v4735_v46 = vpop.permute.xlu0 %1140  ;;  %v4737_v35 = vpop.permute.xlu2 %1160  ;;  %v1621_v49 = vadd.s32 256, %v4331_v3  ;;  %v1631_v55 = vadd.s32 256, %v4382_v16  ;;  %v1624_v3 = vadd.s32 256, %v4340_v5 }
 0x173   : > { %8935 = vst [vmem:[#allocation72_spill] sm:$0xff] %v4735_v46 }
 0x174   : > { %8936 = vst [vmem:[#allocation73_spill] sm:$0xff] %v4737_v35  ;;  %v1622_v35 = vadd.s32 256, %v4343_v6 }
 0x178   : > { %1488 = vperm.xlu1 %4050, %v4455_v32  }
 0x179   : > { %4051 = vset.pattern.permute.xlu2 %v4218_v48  ;;  %v4742_v56 = vpop.permute.xlu1 %1132 }
 0x17a   : > { %8937 = vst [vmem:[#allocation74_spill] sm:$0xff] %v4742_v56  ;;  %1663 = vperm.xlu0 %4052, %v1628_v1   ;;  %v4744_v0 = vpop.permute.xlu0 %1152  ;;  %1636 = vperm.xlu2 %4051, %v1619_v54   ;;  %v1623_v54 = vadd.s32 256, %v4328_v2 }
 0x17b   : > { %8938 = vst [vmem:[#allocation75_spill] sm:$0xff] %v4744_v0  ;;  %v4746_v38 = vpop.permute.xlu2 %1316  ;;  %v9007_v0 = vld [vmem:[#allocation18_spill] sm:$0xff] }
 0x17c   : > { %8939 = vst [vmem:[#allocation76_spill] sm:$0xff] %v4746_v38  ;;  %v1634_v38 = vadd.s32 256, %v4401_v19  ;;  %v1629_v19 = vadd.s32 256, %v4367_v12 }
 0x180   : > { %4053 = vset.pattern.permute.xlu1 %v4218_v48 }
 0x181   : > { %1642 = vperm.xlu1 %4053, %v1621_v49   ;;  %v4751_v4 = vpop.permute.xlu1 %1144 }
 0x182   : > { %8940 = vst [vmem:[#allocation77_spill] sm:$0xff] %v4751_v4  ;;  %1672 = vperm.xlu0 %4052, %v1631_v55   ;;  %v4753_v46 = vpop.permute.xlu0 %1164  ;;  %1645 = vperm.xlu2 %4051, %v1622_v35   ;;  %v1626_v55 = vadd.s32 256, %v4355_v9  ;;  %v1627_v35 = vadd.s32 256, %v4352_v8  ;;  %v8999_v4 = vld [vmem:[#allocation16_spill] sm:$0xff] }
 0x183   : > { %8941 = vst [vmem:[#allocation78_spill] sm:$0xff] %v4753_v46  ;;  %v4755_v1 = vpop.permute.xlu2 %1325 }
 0x184   : > { %8942 = vst [vmem:[#allocation79_spill] sm:$0xff] %v4755_v1 }
 0x189   : > { %1648 = vperm.xlu1 %4053, %v1623_v54   ;;  %v4760_v16 = vpop.permute.xlu1 %1156 }
 0x18a   : > { %8943 = vst [vmem:[#allocation80_spill] sm:$0xff] %v4760_v16  ;;  %1681 = vperm.xlu0 %4052, %v1634_v38   ;;  %1651 = vperm.xlu2 %4051, %v1624_v3   ;;  %v1630_v38 = vadd.s32 256, %v4364_v11  ;;  %v1633_v3 = vadd.s32 256, %v4376_v14 }
 0x18b   : > { %v4762_v6 = vpop.permute.xlu0 %1319  ;;  %v4764_v48 = vpop.permute.xlu2 %1331 }
 0x18c   : > { %8944 = vst [vmem:[#allocation81_spill] sm:$0xff] %v4762_v6 }
 0x18d   : > { %8945 = vst [vmem:[#allocation82_spill] sm:$0xff] %v4764_v48  ;;  %v1948_v48 = vadd.s32 320, %v4370_v13 }
 0x191   : > { %1657 = vperm.xlu1 %4053, %v1626_v55   ;;  %v4768_v49 = vpop.permute.xlu1 %1168  ;;  %v334_v55 = vlaneseq }
 0x192   : > { %8946 = vst [vmem:[#allocation83_spill] sm:$0xff] %v4768_v49  ;;  %1756 = vperm.xlu0 %4052, %v4413_v22   ;;  %1660 = vperm.xlu2 %4051, %v1627_v35   ;;  %v1632_v22 = vadd.s32 256, %v4379_v15 }
 0x193   : > { %v4771_v2 = vpop.permute.xlu0 %1334  ;;  %v4773_v5 = vpop.permute.xlu2 %1340 }
 0x194   : > { %8947 = vst [vmem:[#allocation84_spill] sm:$0xff] %v4771_v2 }
 0x195   : > { %8948 = vst [vmem:[#allocation85_spill] sm:$0xff] %v4773_v5 }
 0x199   : > { %1666 = vperm.xlu1 %4053, %v1629_v19  }
 0x19a   : > { %1768 = vperm.xlu0 %4052, %v4425_v25   ;;  %1669 = vperm.xlu2 %4051, %v1630_v38   ;;  %v4778_v9 = vpop.permute.xlu1 %1322 }
 0x19b   : > { %8949 = vst [vmem:[#allocation86_spill] sm:$0xff] %v4778_v9  ;;  %v4780_v8 = vpop.permute.xlu0 %1343  ;;  %v4782_v54 = vpop.permute.xlu2 %1349  ;;  %v9004_v9 = vld [vmem:[#allocation11_spill] sm:$0xff] }
 0x19c   : > { %8950 = vst [vmem:[#allocation87_spill] sm:$0xff] %v4780_v8 }
 0x19d   : > { %8951 = vst [vmem:[#allocation88_spill] sm:$0xff] %v4782_v54 }
 0x1a1   : > { %1675 = vperm.xlu1 %4053, %v1632_v22  }
 0x1a2   : > { %1780 = vperm.xlu0 %4052, %v4437_v28   ;;  %1678 = vperm.xlu2 %4051, %v1633_v3   ;;  %v4787_v12 = vpop.permute.xlu1 %1328  ;;  %v4802_v28 = vand.u32 127, %v334_v55 }
 0x1a3   : > { %8952 = vst [vmem:[#allocation89_spill] sm:$0xff] %v4787_v12  ;;  %v4789_v11 = vpop.permute.xlu0 %1352  ;;  %v4791_v25 = vpop.permute.xlu2 %1358 }
 0x1a4   : > { %8953 = vst [vmem:[#allocation90_spill] sm:$0xff] %v4789_v11  ;;  %v4805_v19 = vadd.s32 128, %v4802_v28  ;;  %v4809_v38 = vadd.s32 256, %v4802_v28  ;;  %vm403_vm0 = vcmp.eq.s32.totalorder %v4802_v28, %v4466_v39  ;;  %vm391_vm2 = vcmp.eq.s32.totalorder %v4802_v28, %v4494_v59  ;;  %v8978_v11 = vld [vmem:[#allocation10_spill] sm:$0xff] }
 0x1a5   : > { %8954 = vst [vmem:[#allocation91_spill] sm:$0xff] %v4791_v25  ;;  %vm387_vm8 = vcmp.eq.s32.totalorder %v4802_v28, %v4485_v53  ;;  %vm399_vm12 = vcmp.eq.s32.totalorder %v4802_v28, %v4492_v58 }
 0x1a6   : > { %vm404_vm1 = vcmp.eq.s32.totalorder %v4805_v19, %v4466_v39  ;;  %vm392_vm3 = vcmp.eq.s32.totalorder %v4805_v19, %v4494_v59  ;;  %vm393_vm4 = vcmp.eq.s32.totalorder %v4809_v38, %v4494_v59  ;;  %vm405_vm6 = vcmp.eq.s32.totalorder %v4809_v38, %v4466_v39 }
 0x1a7   : > { %vm388_vm9 = vcmp.eq.s32.totalorder %v4805_v19, %v4485_v53  ;;  %vm389_vm10 = vcmp.eq.s32.totalorder %v4809_v38, %v4485_v53  ;;  %v4894_v3 = vsel %vm404_vm1, %v4508_v63, 0.0  ;;  %vm440_vm15 = vcmp.eq.s32.totalorder %v4805_v19, %v4519_v36 }
 0x1a8   : > { %vm436_vm14 = vcmp.eq.s32.totalorder %v4805_v19, %v4521_v37  ;;  %vm448_vm13 = vcmp.eq.s32.totalorder %v4805_v19, %v4530_v41 }
 0x1a9   : > { %1748 = vperm.xlu1 %4053, %v4398_v18   ;;  %v4812_v18 = vadd.s32 384, %v4802_v28 }
 0x1aa   : > { %1792 = vperm.xlu0 %4052, %v4449_v31   ;;  %1752 = vperm.xlu2 %4051, %v4395_v17   ;;  %v4796_v15 = vpop.permute.xlu1 %1337 }
 0x1ab   : > { %8955 = vst [vmem:[#allocation92_spill] sm:$0xff] %v4796_v15  ;;  %v4798_v14 = vpop.permute.xlu0 %1361  ;;  %v4800_v35 = vpop.permute.xlu2 %1432  ;;  %vm394_vm5 = vcmp.eq.s32.totalorder %v4812_v18, %v4494_v59  ;;  %vm406_vm7 = vcmp.eq.s32.totalorder %v4812_v18, %v4466_v39  ;;  %vm390_vm11 = vcmp.eq.s32.totalorder %v4812_v18, %v4485_v53  ;;  %v4860_v59 = vsel %vm393_vm4, %v4499_v60, 0.0 }
 0x1ac   : > { %8956 = vst [vmem:[#allocation93_spill] sm:$0xff] %v4798_v14  ;;  %v4906_v55 = vsel %vm406_vm7, %v4508_v63, 0.0  ;;  %v8786_v15 = vmov 5   ;;  %vm439_vm7 = vcmp.eq.s32.totalorder %v4802_v28, %v4519_v36  ;;  %vm442_vm4 = vcmp.eq.s32.totalorder %v4812_v18, %v4519_v36 }
 0x1ad   : > { %8957 = vst [vmem:[#allocation94_spill] sm:$0xff] %v4800_v35  ;;  %vm422_vm1 = vcmp.eq.s32.totalorder %v4812_v18, %v4476_v47  ;;  %v5001_v53 = vsel %vm439_vm7, %v4535_v42, 0.0  ;;  %v5021_v1 = vsel %vm442_vm4, %v4535_v42, 0.0  ;;  %vm8967_vm7 = vcmp.eq.s32.totalorder %v4802_v28, %v4483_v52 }
 0x1ae   : > { %vm8973_vm4 = vcmp.eq.s32.totalorder %v4805_v19, %v4503_v62 }
 0x1b1   : > { %1760 = vperm.xlu1 %4053, %v4410_v21   ;;  %v4854_v21 = vsel %vm391_vm2, %v4499_v60, 0.0  ;;  %vm443_vm2 = vcmp.eq.s32.totalorder %v4802_v28, %v4490_v57 }
 0x1b2   : > { %1804 = vperm.xlu0 %4052, %v4459_v34   ;;  %1764 = vperm.xlu2 %4051, %v4407_v20   ;;  %v4816_v17 = vpop.permute.xlu1 %1346  ;;  %v1940_v20 = vadd.s32 320, %v4346_v7  ;;  %v4857_v34 = vsel %vm392_vm3, %v4499_v60, 0.0  ;;  %v4863_v7 = vsel %vm394_vm5, %v4499_v60, 0.0  ;;  %v4888_v60 = vsel %vm403_vm0, %v4508_v63, 0.0 }
 0x1b3   : > { %8958 = vst [vmem:[#allocation95_spill] sm:$0xff] %v4816_v17  ;;  %v4818_v31 = vpop.permute.xlu0 %1436  ;;  %v4820_v22 = vpop.permute.xlu2 %1444  ;;  %vm441_vm5 = vcmp.eq.s32.totalorder %v4809_v38, %v4519_v36  ;;  %vm420_vm0 = vcmp.eq.s32.totalorder %v4805_v19, %v4476_v47  ;;  %vm435_vm3 = vcmp.eq.s32.totalorder %v4802_v28, %v4521_v37 }
 0x1b4   : > { %8959 = vst [vmem:[#allocation96_spill] sm:$0xff] %v4818_v31 }
 0x1b5   : > { %8960 = vst [vmem:[#allocation97_spill] sm:$0xff] %v4820_v22  ;;  %v5027_v22 = vsel %vm399_vm12, %v4537_v44, 0.0  ;;  %vm8966_vm12 = vcmp.eq.s32.totalorder %v4812_v18, %v4492_v58 }
 0x1b6   : > { %v5048_v36 = vsel %vm8966_vm12, %v4537_v44, 0.0  ;;  %vm445_vm12 = vcmp.eq.s32.totalorder %v4809_v38, %v4490_v57 }
 0x1b9   : > { %1772 = vperm.xlu1 %4053, %v4422_v24   ;;  %v4900_v24 = vsel %vm405_vm6, %v4508_v63, 0.0  ;;  %vm421_vm6 = vcmp.eq.s32.totalorder %v4809_v38, %v4476_v47  ;;  %v4960_v63 = vsel %vm387_vm8, %v4528_v40, 0.0  ;;  %vm434_vm8 = vcmp.eq.s32.totalorder %v4812_v18, %v4481_v51 }
 0x1ba   : > { %4055 = vset.pattern.permute.xlu0 %v8786_v15  ;;  %1776 = vperm.xlu2 %4051, %v4419_v23   ;;  %v4910_v17 = vpop.permute.xlu1 %1355  ;;  %v4972_v15 = vsel %vm389_vm10, %v4528_v40, 0.0  ;;  %vm449_vm10 = vcmp.eq.s32.totalorder %v4809_v38, %v4530_v41 }
 0x1bb   : > { %8961 = vst [vmem:[#allocation98_spill] sm:$0xff] %v4910_v17  ;;  %1959 = vperm.xlu0 %4055, %v1940_v20   ;;  %v4926_v23 = vpop.permute.xlu0 %1448  ;;  %v4928_v39 = vpop.permute.xlu2 %1456  ;;  %v4966_v20 = vsel %vm388_vm9, %v4528_v40, 0.0  ;;  %vm447_vm9 = vcmp.eq.s32.totalorder %v4802_v28, %v4530_v41  ;;  %v1945_v17 = vadd.s32 320, %v4358_v10  ;;  %v5007_v10 = vsel %vm440_vm15, %v4535_v42, 0.0 }
 0x1bc   : > { %8962 = vst [vmem:[#allocation99_spill] sm:$0xff] %v4926_v23  ;;  %vm8964_vm15 = vcmp.eq.s32.totalorder %v4805_v19, %v4492_v58  ;;  %v5236_v56 = vsel %vm447_vm9, %v9007_v0, 0.0 }
 0x1bd   : > { %8963 = vst [vmem:[#allocation100_spill] sm:$0xff] %v4928_v39  ;;  %v4978_v39 = vsel %vm390_vm11, %v4528_v40, 0.0  ;;  %vm433_vm11 = vcmp.eq.s32.totalorder %v4809_v38, %v4481_v51  ;;  %v5013_v40 = vsel %vm441_vm5, %v4535_v42, 0.0  ;;  %v5033_v12 = vsel %vm8964_vm15, %v4537_v44, 0.0 }
 0x1be   : > { %vm8965_vm5 = vcmp.eq.s32.totalorder %v4809_v38, %v4492_v58  ;;  %v5054_v42 = vsel %vm8967_vm7, %v4539_v45, 0.0  ;;  %vm8968_vm15 = vcmp.eq.s32.totalorder %v4805_v19, %v4483_v52  ;;  %vm8974_vm7 = vcmp.eq.s32.totalorder %v4809_v38, %v4503_v62  ;;  %9008 = vst [vmem:[#allocation18_spill] sm:$0xff] %v5236_v56  ;;  %v9015_v56 = vld [vmem:[#allocation22_spill] sm:$0xff] }
 0x1bf   : > { %v5039_v35 = vsel %vm8965_vm5, %v4537_v44, 0.0  ;;  %vm8969_vm5 = vcmp.eq.s32.totalorder %v4809_v38, %v4483_v52  ;;  %vm727_vm9 = vcmp.eq.s32.totalorder %v4802_v28, %v9015_v56 }
 0x1c0   : > { %v5066_v6 = vsel %vm8969_vm5, %v4539_v45, 0.0  ;;  %vm8972_vm5 = vcmp.eq.s32.totalorder %v4802_v28, %v4503_v62 }
 0x1c1   : > { %1784 = vperm.xlu1 %4053, %v4434_v27   ;;  %v5060_v27 = vsel %vm8968_vm15, %v4539_v45, 0.0  ;;  %vm8971_vm15 = vcmp.eq.s32.totalorder %v4812_v18, %v4483_v52  ;;  %v5085_v14 = vsel %vm8972_vm5, %v4544_v50, 0.0  ;;  %vm8981_vm5 = vcmp.eq.s32.totalorder %v4809_v38, %v4471_v43 }
 0x1c2   : > { %1788 = vperm.xlu2 %4051, %v4431_v26   ;;  %v5069_v58 = vpop.permute.xlu1 %1428  ;;  %v5079_v44 = vsel %vm8971_vm15, %v4539_v45, 0.0  ;;  %v5091_v26 = vsel %vm8973_vm4, %v4544_v50, 0.0  ;;  %vm8977_vm15 = vcmp.eq.s32.totalorder %v4812_v18, %v4503_v62  ;;  %vm8979_vm4 = vcmp.eq.s32.totalorder %v4802_v28, %v4471_v43 }
 0x1c3   : > { %8970 = vst [vmem:[#allocation101_spill] sm:$0xff] %v5069_v58  ;;  %v5097_v58 = vsel %vm8974_vm7, %v4544_v50, 0.0  ;;  %1974 = vperm.xlu0 %4055, %v1945_v17   ;;  %v5099_v52 = vpop.permute.xlu0 %1460  ;;  %v5101_v45 = vpop.permute.xlu2 %1468  ;;  %v5107_v49 = vsel %vm8977_vm15, %v4544_v50, 0.0  ;;  %v5113_v8 = vsel %vm8979_vm4, %v8978_v11, 0.0  ;;  %vm8980_vm7 = vcmp.eq.s32.totalorder %v4805_v19, %v4471_v43  ;;  %v8983_v50 = vld [vmem:[#allocation12_spill] sm:$0xff] }
 0x1c4   : > { %8975 = vst [vmem:[#allocation102_spill] sm:$0xff] %v5099_v52  ;;  %v5119_v17 = vsel %vm8980_vm7, %v8978_v11, 0.0  ;;  %vm8982_vm15 = vcmp.eq.s32.totalorder %v4812_v18, %v4471_v43  ;;  %vm8984_vm4 = vcmp.eq.s32.totalorder %v4802_v28, %v4512_v33  ;;  %vm8985_vm7 = vcmp.eq.s32.totalorder %v4805_v19, %v4512_v33 }
 0x1c5   : > { %8976 = vst [vmem:[#allocation103_spill] sm:$0xff] %v5101_v45  ;;  %v5125_v45 = vsel %vm8981_vm5, %v8978_v11, 0.0  ;;  %v5131_v62 = vsel %vm8982_vm15, %v8978_v11, 0.0  ;;  %v5137_v16 = vsel %vm8984_vm4, %v8983_v50, 0.0  ;;  %v5143_v25 = vsel %vm8985_vm7, %v8983_v50, 0.0  ;;  %v8990_v11 = vld [vmem:[#allocation13_spill] sm:$0xff] }
 0x1c6   : > { %vm8986_vm5 = vcmp.eq.s32.totalorder %v4809_v38, %v4512_v33  ;;  %vm8988_vm15 = vcmp.eq.s32.totalorder %v4812_v18, %v4512_v33  ;;  %vm8991_vm4 = vcmp.eq.s32.totalorder %v4802_v28, %v4476_v47  ;;  %v5167_v52 = vsel %vm420_vm0, %v8990_v11, 0.0 }
 0x1c7   : > { %v5149_v2 = vsel %vm8986_vm5, %v8983_v50, 0.0  ;;  %v5155_v43 = vsel %vm8988_vm15, %v8983_v50, 0.0  ;;  %v5161_v54 = vsel %vm8991_vm4, %v8990_v11, 0.0  ;;  %v5173_v5 = vsel %vm421_vm6, %v8990_v11, 0.0  ;;  %v8992_v50 = vld [vmem:[#allocation15_spill] sm:$0xff] }
 0x1c8   : > { %8987 = vst [vmem:[#allocation10_spill] sm:$0xff] %v5149_v2  ;;  %v5179_v33 = vsel %vm422_vm1, %v8990_v11, 0.0  ;;  %v5185_v46 = vsel %vm435_vm3, %v8992_v50, 0.0  ;;  %v5191_v23 = vsel %vm436_vm14, %v8992_v50, 0.0  ;;  %vm8995_vm0 = vcmp.eq.s32.totalorder %v4809_v38, %v4521_v37 }
 0x1c9   : > { %8989 = vst [vmem:[#allocation12_spill] sm:$0xff] %v5155_v43  ;;  %v5198_v47 = vsel %vm8995_vm0, %v8992_v50, 0.0  ;;  %vm8997_vm1 = vcmp.eq.s32.totalorder %v4812_v18, %v4521_v37  ;;  %vm9000_vm3 = vcmp.eq.s32.totalorder %v4802_v28, %v4481_v51  ;;  %vm9002_vm14 = vcmp.eq.s32.totalorder %v4805_v19, %v4481_v51  ;;  %1796 = vperm.xlu1 %4053, %v4446_v30  }
 0x1ca   : > { %8993 = vst [vmem:[#allocation13_spill] sm:$0xff] %v5185_v46  ;;  %v5204_v11 = vsel %vm8997_vm1, %v8992_v50, 0.0  ;;  %v5210_v31 = vsel %vm9000_vm3, %v8999_v4, 0.0  ;;  %v5216_v13 = vsel %vm9002_vm14, %v8999_v4, 0.0  ;;  %vm723_vm6 = vcmp.eq.s32.totalorder %v4802_v28, %v9004_v9  ;;  %1800 = vperm.xlu2 %4051, %v4443_v29  }
 0x1cb   : > { %8994 = vst [vmem:[#allocation15_spill] sm:$0xff] %v5191_v23  ;;  %v5224_v37 = vsel %vm433_vm11, %v8999_v4, 0.0  ;;  %v5230_v50 = vsel %vm434_vm8, %v8999_v4, 0.0  ;;  %vm724_vm11 = vcmp.eq.s32.totalorder %v4805_v19, %v9004_v9  ;;  %vm725_vm8 = vcmp.eq.s32.totalorder %v4809_v38, %v9004_v9  ;;  %v9013_v4 = vld [vmem:[#allocation19_spill] sm:$0xff]  ;;  %1983 = vperm.xlu0 %4055, %v1948_v48   ;;  %v5288_v29 = vpop.permute.xlu2 %1480  ;;  %v9025_v48 = vld [vmem:[#allocation24_spill] sm:$0xff] }
 0x1cc   : > { %8996 = vst [vmem:[#allocation104_spill] sm:$0xff] %v5198_v47  ;;  %vm726_vm7 = vcmp.eq.s32.totalorder %v4812_v18, %v9004_v9  ;;  %v5255_v51 = vsel %vm449_vm10, %v9007_v0, 0.0  ;;  %v5272_v47 = vpop.permute.xlu1 %1440  ;;  %vm9017_vm10 = vcmp.eq.s32.totalorder %v4805_v19, %v4490_v57  ;;  %vm728_vm5 = vcmp.eq.s32.totalorder %v4805_v19, %v9015_v56 }
 0x1cd   : > { %8998 = vst [vmem:[#allocation105_spill] sm:$0xff] %v5204_v11  ;;  %v5242_v11 = vsel %vm448_vm13, %v9007_v0, 0.0  ;;  %vm9011_vm13 = vcmp.eq.s32.totalorder %v4812_v18, %v4530_v41  ;;  %v5278_v41 = vsel %vm9017_vm10, %v9013_v4, 0.0  ;;  %vm730_vm15 = vcmp.eq.s32.totalorder %v4812_v18, %v9015_v56 }
 0x1ce   : > { %9001 = vst [vmem:[#allocation16_spill] sm:$0xff] %v5210_v31  ;;  %v5261_v30 = vsel %vm9011_vm13, %v9007_v0, 0.0  ;;  %v5286_v0 = vpop.permute.xlu0 %1472  ;;  %vm9022_vm4 = vcmp.eq.s32.totalorder %v4812_v18, %v4490_v57  ;;  %vm739_vm1 = vcmp.eq.s32.totalorder %v4802_v28, %v9025_v48  ;;  %vm740_vm3 = vcmp.eq.s32.totalorder %v4805_v19, %v9025_v48  ;;  %v9026_v57 = vld [vmem:[#allocation29_spill] sm:$0xff] }
 0x1cf   : > { %9003 = vst [vmem:[#allocation106_spill] sm:$0xff] %v5216_v13  ;;  %vm742_vm14 = vcmp.eq.s32.totalorder %v4812_v18, %v9025_v48 }
 0x1d0   : > { %9005 = vst [vmem:[#allocation11_spill] sm:$0xff] %v5224_v37  ;;  %v4102_v37 = vld [vmem:[%s4325_s18] sm:$0xff] }
 0x1d1   : > { %9006 = vst [vmem:[#allocation107_spill] sm:$0xff] %v5230_v50  ;;  %v1939_v13 = vadd.s32 320, %v4102_v37  ;;  %1808 = vperm.xlu1 %4053, %v4455_v32  }
 0x1d2   : > { %9009 = vst [vmem:[#allocation108_spill] sm:$0xff] %v5242_v11  ;;  %v5267_v11 = vsel %vm443_vm2, %v9013_v4, 0.0  ;;  %vm729_vm2 = vcmp.eq.s32.totalorder %v4809_v38, %v9015_v56  ;;  %v5327_v56 = vld [vmem:[%s4325_s18 + $0x60] sm:$0xff] }
 0x1d3   : > { %9010 = vst [vmem:[#allocation109_spill] sm:$0xff] %v5255_v51  ;;  %v9024_v51 = vld [vmem:[#allocation21_spill] sm:$0xff]  ;;  %v1951_v50 = vadd.s32 320, %v5327_v56 }
 0x1d4   : > { %9012 = vst [vmem:[#allocation110_spill] sm:$0xff] %v5261_v30  ;;  %v5300_v30 = vsel %vm9022_vm4, %v9013_v4, 0.0  ;;  %vm731_vm0 = vcmp.eq.s32.totalorder %v4802_v28, %v9024_v51  ;;  %vm732_vm4 = vcmp.eq.s32.totalorder %v4805_v19, %v9024_v51  ;;  %v5382_v32 = vpop.permute.xlu1 %1452  ;;  %v5415_v9 = vpop.permute.xlu2 %1636 }
 0x1d5   : > { %9014 = vst [vmem:[#allocation19_spill] sm:$0xff] %v5267_v11  ;;  %1992 = vperm.xlu0 %4055, %v1951_v50  }
 0x1d6   : > { %9016 = vst [vmem:[#allocation22_spill] sm:$0xff] %v5272_v47  ;;  %v5294_v47 = vsel %vm445_vm12, %v9013_v4, 0.0  ;;  %vm741_vm12 = vcmp.eq.s32.totalorder %v4809_v38, %v9025_v48  ;;  %v855_v4 = vsel %vm727_vm9, %v9026_v57, 0.0 }
 0x1d7   : > { %9018 = vst [vmem:[#allocation111_spill] sm:$0xff] %v5278_v41  ;;  %v9028_v41 = vld [vmem:[#allocation32_spill] sm:$0xff] }
 0x1d8   : > { %9019 = vst [vmem:[#allocation112_spill] sm:$0xff] %v5286_v0  ;;  %v856_v0 = vsel %vm728_vm5, %v9026_v57, 0.0  ;;  %v867_v11 = vsel %vm739_vm1, %v9028_v41, 0.0  ;;  %v868_v23 = vsel %vm740_vm3, %v9028_v41, 0.0  ;;  %v869_v46 = vsel %vm741_vm12, %v9028_v41, 0.0 }
 0x1d9   : > { %9020 = vst [vmem:[#allocation113_spill] sm:$0xff] %v5288_v29  ;;  %v9027_v29 = vld [vmem:[#allocation14_spill] sm:$0xff]  ;;  %vm733_vm1 = vcmp.eq.s32.totalorder %v4809_v38, %v9024_v51  ;;  %vm734_vm3 = vcmp.eq.s32.totalorder %v4812_v18, %v9024_v51  ;;  %v870_v37 = vsel %vm742_vm14, %v9028_v41, 0.0  ;;  %v5357_v31 = vadd.f32 %v856_v0, %v4857_v34  ;;  %v9035_v41 = vld [vmem:[#allocation25_spill] sm:$0xff]  ;;  %v9039_v0 = vld [vmem:[#allocation36_spill] sm:$0xff] }
 0x1da   : > { %9021 = vst [vmem:[#allocation114_spill] sm:$0xff] %v5294_v47  ;;  %vm735_vm13 = vcmp.eq.s32.totalorder %v4802_v28, %v9027_v29  ;;  %v858_v47 = vsel %vm730_vm15, %v9026_v57, 0.0  ;;  %vm736_vm10 = vcmp.eq.s32.totalorder %v4805_v19, %v9027_v29  ;;  %vm737_vm9 = vcmp.eq.s32.totalorder %v4809_v38, %v9027_v29 }
 0x1db   : > { %9023 = vst [vmem:[#allocation115_spill] sm:$0xff] %v5300_v30  ;;  %v857_v30 = vsel %vm729_vm2, %v9026_v57, 0.0  ;;  %vm738_vm5 = vcmp.eq.s32.totalorder %v4812_v18, %v9027_v29  ;;  %v9030_v57 = vld [vmem:[#allocation17_spill] sm:$0xff]  ;;  %v5363_v2 = vadd.f32 %v858_v47, %v4863_v7  ;;  %v5369_v48 = vadd.f32 %v867_v11, %v4888_v60 }
 0x1dc   : > { %9029 = vst [vmem:[#allocation21_spill] sm:$0xff] %v5327_v56  ;;  %vm743_vm2 = vcmp.eq.s32.totalorder %v4802_v28, %v9030_v57  ;;  %v5354_v56 = vadd.f32 %v855_v4, %v4854_v21  ;;  %v5360_v43 = vadd.f32 %v857_v30, %v4860_v59  ;;  %v5372_v21 = vadd.f32 %v868_v23, %v4894_v3  ;;  %v9045_v11 = vld [vmem:[#allocation37_spill] sm:$0xff]  ;;  %v9046_v4 = vld [vmem:[#allocation28_spill] sm:$0xff] }
 0x1dd   : > { %9032 = vst [vmem:[#allocation29_spill] sm:$0xff] %v5357_v31  ;;  %v5375_v34 = vadd.f32 %v869_v46, %v4900_v24  ;;  %v851_v59 = vsel %vm723_vm6, %v9039_v0, 0.0  ;;  %v9040_v7 = vmov 5   ;;  %v5385_v47 = vadd.f32 %v870_v37, %v4906_v55  ;;  %v5399_v24 = vpop.permute.xlu0 %1484  ;;  %v9042_v55 = vld [vmem:[#allocation33_spill] sm:$0xff]  ;;  %v4112_v31 = vld [vmem:[%s4325_s18 + $0x50] sm:$0xff] }
 0x1de   : > { %9031 = vst [vmem:[#allocation24_spill] sm:$0xff] %v5354_v56  ;;  %4054 = vset.pattern.permute.xlu2 %v9040_v7  ;;  %v852_v60 = vsel %vm724_vm11, %v9039_v0, 0.0  ;;  %v853_v46 = vsel %vm725_vm8, %v9039_v0, 0.0  ;;  %v854_v3 = vsel %vm726_vm7, %v9039_v0, 0.0  ;;  %vm748_vm6 = vcmp.eq.s32.totalorder %v4805_v19, %v9035_v41  ;;  %4056 = vset.pattern.permute.xlu1 %v9040_v7 }
 0x1df   : > { %9033 = vst [vmem:[#allocation14_spill] sm:$0xff] %v5360_v43  ;;  %1956 = vperm.xlu2 %4054, %v1939_v13   ;;  %vm775_vm8 = vcmp.eq.s32.totalorder %v4802_v28, %v9042_v55  ;;  %vm776_vm7 = vcmp.eq.s32.totalorder %v4805_v19, %v9042_v55  ;;  %vm777_vm15 = vcmp.eq.s32.totalorder %v4809_v38, %v9042_v55  ;;  %v859_v13 = vsel %vm731_vm0, %v9045_v11, 0.0 }
 0x1e0   : > { %9034 = vst [vmem:[#allocation32_spill] sm:$0xff] %v5363_v2  ;;  %vm778_vm12 = vcmp.eq.s32.totalorder %v4812_v18, %v9042_v55  ;;  %v5418_v23 = vadd.f32 %v851_v59, %v4960_v63  ;;  %v860_v50 = vsel %vm732_vm4, %v9045_v11, 0.0  ;;  %v861_v30 = vsel %vm733_vm1, %v9045_v11, 0.0  ;;  %v4103_v59 = vld [vmem:[%s4325_s18 + $0x10] sm:$0xff]  ;;  %v9071_v55 = vld [vmem:[#allocation34_spill] sm:$0xff]  ;;  %v9113_v2 = vld [vmem:[#allocation49_spill] sm:$0xff] }
 0x1e1   : > { %9036 = vst [vmem:[#allocation17_spill] sm:$0xff] %v5369_v48  ;;  %v5437_v63 = vadd.f32 %v852_v60, %v4966_v20  ;;  %v5440_v37 = vadd.f32 %v853_v46, %v4972_v15  ;;  %v5443_v0 = vadd.f32 %v854_v3, %v4978_v39  ;;  %v862_v15 = vsel %vm734_vm3, %v9045_v11, 0.0  ;;  %v9051_v20 = vld [vmem:[#allocation39_spill] sm:$0xff]  ;;  %v4104_v60 = vld [vmem:[%s4325_s18 + $0x78] sm:$0xff] }
 0x1e2   : > { %9037 = vst [vmem:[#allocation25_spill] sm:$0xff] %v5372_v21  ;;  %v863_v39 = vsel %vm735_vm13, %v9051_v20, 0.0  ;;  %v1954_v46 = vadd.s32 320, %v4104_v60  ;;  %v4105_v3 = vld [vmem:[%s4325_s18 + $0x18] sm:$0xff]  ;;  %vm762_vm14 = vcmp.eq.s32.totalorder %v4812_v18, %v9046_v4  ;;  %v5469_v51 = vadd.f32 %v859_v13, %v5054_v42  ;;  %v9108_v48 = vld [vmem:[#allocation19_spill] sm:$0xff] }
 0x1e3   : > { %9038 = vst [vmem:[#allocation116_spill] sm:$0xff] %v5375_v34  ;;  %v5472_v11 = vadd.f32 %v860_v50, %v5060_v27  ;;  %v864_v60 = vsel %vm736_vm10, %v9051_v20, 0.0  ;;  %v866_v42 = vsel %vm738_vm5, %v9051_v20, 0.0  ;;  %v9052_v27 = vld [vmem:[#allocation40_spill] sm:$0xff]  ;;  %vm9053_vm13 = vcmp.eq.s32.totalorder %v4805_v19, %v9030_v57  ;;  %v9054_v50 = vld [vmem:[#allocation23_spill] sm:$0xff] }
 0x1e4   : > { %9041 = vst [vmem:[#allocation36_spill] sm:$0xff] %v5385_v47  ;;  %v872_v13 = vsel %vm9053_vm13, %v9052_v27, 0.0  ;;  %vm767_vm10 = vcmp.eq.s32.totalorder %v4802_v28, %v9054_v50  ;;  %v5504_v29 = vadd.f32 %v863_v39, %v5027_v22  ;;  %vm9057_vm5 = vcmp.eq.s32.totalorder %v4812_v18, %v9030_v57  ;;  %v9059_v47 = vld [vmem:[#allocation31_spill] sm:$0xff]  ;;  %v9061_v22 = vld [vmem:[#allocation41_spill] sm:$0xff]  ;;  %2001 = vperm.xlu0 %4055, %v1954_v46  }
 0x1e5   : > { %9043 = vst [vmem:[#allocation33_spill] sm:$0xff] %v5415_v9  ;;  %v1941_v9 = vadd.s32 320, %v4103_v59  ;;  %v1942_v59 = vadd.s32 320, %v4105_v3  ;;  %v865_v3 = vsel %vm737_vm9, %v9051_v20, 0.0  ;;  %vm9056_vm9 = vcmp.eq.s32.totalorder %v4809_v38, %v9030_v57 }
 0x1e6   : > { %9044 = vst [vmem:[#allocation117_spill] sm:$0xff] %v5418_v23  ;;  %v9050_v23 = vld [vmem:[#allocation20_spill] sm:$0xff]  ;;  %v873_v20 = vsel %vm9056_vm9, %v9052_v27, 0.0  ;;  %v904_v57 = vsel %vm776_vm7, %v9061_v22, 0.0  ;;  %vm768_vm3 = vcmp.eq.s32.totalorder %v4805_v19, %v9054_v50  ;;  %vm769_vm13 = vcmp.eq.s32.totalorder %v4809_v38, %v9054_v50 }
 0x1e7   : > { %9047 = vst [vmem:[#allocation37_spill] sm:$0xff] %v5437_v63  ;;  %vm755_vm0 = vcmp.eq.s32.totalorder %v4802_v28, %v9050_v23  ;;  %vm756_vm4 = vcmp.eq.s32.totalorder %v4805_v19, %v9050_v23  ;;  %vm757_vm11 = vcmp.eq.s32.totalorder %v4809_v38, %v9050_v23  ;;  %vm758_vm1 = vcmp.eq.s32.totalorder %v4812_v18, %v9050_v23  ;;  %v5514_v63 = vpop.permute.xlu1 %1464 }
 0x1e8   : > { %9048 = vst [vmem:[#allocation28_spill] sm:$0xff] %v5440_v37  ;;  %v874_v37 = vsel %vm9057_vm5, %v9052_v27, 0.0  ;;  %1962 = vperm.xlu1 %4056, %v1941_v9   ;;  %v905_v9 = vsel %vm777_vm15, %v9061_v22, 0.0  ;;  %1965 = vperm.xlu2 %4054, %v1942_v59   ;;  %v5549_v39 = vadd.f32 %v866_v42, %v5048_v36  ;;  %v5555_v59 = vadd.f32 %v872_v13, %v5119_v17  ;;  %v9065_v36 = vld [vmem:[#allocation42_spill] sm:$0xff] }
 0x1e9   : > { %9049 = vst [vmem:[#allocation118_spill] sm:$0xff] %v5443_v0  ;;  %v5475_v0 = vadd.f32 %v861_v30, %v5066_v6  ;;  %v871_v6 = vsel %vm743_vm2, %v9052_v27, 0.0  ;;  %v5501_v30 = vadd.f32 %v862_v15, %v5079_v44  ;;  %vm771_vm2 = vcmp.eq.s32.totalorder %v4802_v28, %v9059_v47  ;;  %v5559_v27 = vpop.permute.xlu2 %1645  ;;  %v4107_v13 = vld [vmem:[%s4325_s18 + $0x28] sm:$0xff] }
 0x1ea   : > { %9055 = vst [vmem:[#allocation20_spill] sm:$0xff] %v5504_v29  ;;  %v5519_v44 = vadd.f32 %v864_v60, %v5033_v12  ;;  %v903_v15 = vsel %vm775_vm8, %v9061_v22, 0.0  ;;  %vm770_vm8 = vcmp.eq.s32.totalorder %v4812_v18, %v9054_v50  ;;  %v5546_v12 = vadd.f32 %v865_v3, %v5039_v35  ;;  %v5557_v60 = vpop.permute.xlu0 %1639  ;;  %v9105_v29 = vld [vmem:[#allocation50_spill] sm:$0xff] }
 0x1eb   : > { %9058 = vst [vmem:[#allocation39_spill] sm:$0xff] %v5514_v63  ;;  %v5552_v46 = vadd.f32 %v871_v6, %v5113_v8  ;;  %v5565_v35 = vadd.f32 %v874_v37, %v5131_v62  ;;  %v906_v8 = vsel %vm778_vm12, %v9061_v22, 0.0  ;;  %vm9066_vm5 = vcmp.eq.s32.totalorder %v4802_v28, %v9035_v41  ;;  %v4106_v62 = vld [vmem:[%s4325_s18 + $0x20] sm:$0xff]  ;;  %v5912_v63 = vld [vmem:[%s4325_s18 + $0x68] sm:$0xff] }
 0x1ec   : > { %9060 = vst [vmem:[#allocation40_spill] sm:$0xff] %v5519_v44  ;;  %v5562_v44 = vadd.f32 %v873_v20, %v5125_v45  ;;  %v875_v17 = vsel %vm9066_vm5, %v9065_v36, 0.0  ;;  %v5576_v3 = vadd.f32 %v903_v15, %v5001_v53  ;;  %v5579_v42 = vadd.f32 %v904_v57, %v5007_v10  ;;  %v9070_v6 = vld [vmem:[#allocation26_spill] sm:$0xff]  ;;  %v9075_v15 = vld [vmem:[#allocation43_spill] sm:$0xff] }
 0x1ed   : > { %9062 = vst [vmem:[#allocation23_spill] sm:$0xff] %v5546_v12  ;;  %v5582_v45 = vadd.f32 %v905_v9, %v5013_v40  ;;  %v1943_v37 = vadd.s32 320, %v4106_v62  ;;  %v876_v53 = vsel %vm748_vm6, %v9065_v36, 0.0  ;;  %vm9072_vm5 = vcmp.eq.s32.totalorder %v4809_v38, %v9035_v41 }
 0x1ee   : > { %9063 = vst [vmem:[#allocation31_spill] sm:$0xff] %v5549_v39  ;;  %v877_v10 = vsel %vm9072_vm5, %v9065_v36, 0.0  ;;  %vm9073_vm7 = vcmp.eq.s32.totalorder %v4812_v18, %v9035_v41  ;;  %v1944_v20 = vadd.s32 320, %v4107_v13  ;;  %vm780_vm12 = vcmp.eq.s32.totalorder %v4805_v19, %v9070_v6 }
 0x1ef   : > { %9064 = vst [vmem:[#allocation41_spill] sm:$0xff] %v5559_v27  ;;  %v878_v40 = vsel %vm9073_vm7, %v9065_v36, 0.0  ;;  %vm781_vm15 = vcmp.eq.s32.totalorder %v4809_v38, %v9070_v6  ;;  %vm782_vm6 = vcmp.eq.s32.totalorder %v4812_v18, %v9070_v6  ;;  %vm784_vm9 = vcmp.eq.s32.totalorder %v4805_v19, %v9071_v55 }
 0x1f0   : > { %9067 = vst [vmem:[#allocation42_spill] sm:$0xff] %v5576_v3  ;;  %vm785_vm5 = vcmp.eq.s32.totalorder %v4809_v38, %v9071_v55  ;;  %v5615_v41 = vadd.f32 %v906_v8, %v5021_v1  ;;  %v5618_v22 = vadd.f32 %v875_v17, %v5085_v14  ;;  %v883_v57 = vsel %vm755_vm0, %v9075_v15, 0.0  ;;  %1968 = vperm.xlu1 %4056, %v1943_v37   ;;  %v9095_v3 = vld [vmem:[#allocation48_spill] sm:$0xff] }
 0x1f1   : > { %9068 = vst [vmem:[#allocation119_spill] sm:$0xff] %v5579_v42  ;;  %v884_v9 = vsel %vm756_vm4, %v9075_v15, 0.0  ;;  %v885_v1 = vsel %vm757_vm11, %v9075_v15, 0.0  ;;  %v886_v14 = vsel %vm758_vm1, %v9075_v15, 0.0  ;;  %vm9076_vm0 = vcmp.eq.s32.totalorder %v4802_v28, %v9046_v4  ;;  %v5657_v15 = vpop.permute.xlu1 %1476  ;;  %1971 = vperm.xlu2 %4054, %v1944_v20  }
 0x1f2   : > { %9069 = vst [vmem:[#allocation120_spill] sm:$0xff] %v5582_v45  ;;  %v887_v8 = vsel %vm9076_vm0, %v4652_v61, 0.0  ;;  %vm9077_vm7 = vcmp.eq.s32.totalorder %v4805_v19, %v9046_v4  ;;  %v5645_v17 = vadd.f32 %v876_v53, %v5091_v26  ;;  %v5648_v62 = vadd.f32 %v877_v10, %v5097_v58  ;;  %v9080_v58 = vld [vmem:[#allocation45_spill] sm:$0xff]  ;;  %v4108_v10 = vld [vmem:[%s4392_s21 + $0x10] sm:$0xff] }
 0x1f3   : > { %9074 = vst [vmem:[#allocation26_spill] sm:$0xff] %v5615_v41  ;;  %v888_v36 = vsel %vm9077_vm7, %v4652_v61, 0.0  ;;  %v5651_v13 = vadd.f32 %v878_v40, %v5107_v49  ;;  %vm9078_vm11 = vcmp.eq.s32.totalorder %v4809_v38, %v9046_v4  ;;  %v5660_v27 = vadd.f32 %v883_v57, %v5161_v54  ;;  %2076 = vperm.xlu0 %4055, %v4108_v10   ;;  %v5686_v4 = vpop.permute.xlu0 %1654  ;;  %v5688_v40 = vpop.permute.xlu2 %1651  ;;  %v9083_v57 = vld [vmem:[#allocation10_spill] sm:$0xff]  ;;  %v9094_v45 = vld [vmem:[#allocation107_spill] sm:$0xff] }
 0x1f4   : > { %v889_v23 = vsel %vm9078_vm11, %v4652_v61, 0.0  ;;  %9079 = vst [vmem:[#allocation34_spill] sm:$0xff] %v5657_v15  ;;  %v5663_v26 = vadd.f32 %v884_v9, %v5167_v52  ;;  %v890_v49 = vsel %vm762_vm14, %v4652_v61, 0.0  ;;  %v895_v53 = vsel %vm767_vm10, %v9080_v58, 0.0 }
 0x1f5   : > { %v5675_v54 = vadd.f32 %v885_v1, %v5173_v5  ;;  %v5678_v52 = vadd.f32 %v886_v14, %v5179_v33  ;;  %v5681_v37 = vadd.f32 %v887_v8, %v5137_v16  ;;  %v5684_v61 = vadd.f32 %v888_v36, %v5143_v25  ;;  %9082 = vst [vmem:[#allocation45_spill] sm:$0xff] %v5686_v4  ;;  %v9085_v33 = vld [vmem:[#allocation12_spill] sm:$0xff]  ;;  %v9088_v8 = vld [vmem:[#allocation47_spill] sm:$0xff] }
 0x1f6   : > { %v5691_v9 = vadd.f32 %v889_v23, %v9083_v57  ;;  %v896_v5 = vsel %vm768_vm3, %v9080_v58, 0.0  ;;  %v897_v16 = vsel %vm769_vm13, %v9080_v58, 0.0  ;;  %v898_v25 = vsel %vm770_vm8, %v9080_v58, 0.0  ;;  %v9087_v1 = vld [vmem:[#allocation16_spill] sm:$0xff]  ;;  %v5729_v58 = vld [vmem:[%s4325_s18 + $0x40] sm:$0xff] }
 0x1f7   : > { %9081 = vst [vmem:[#allocation43_spill] sm:$0xff] %v5684_v61  ;;  %v5706_v20 = vadd.f32 %v890_v49, %v9085_v33  ;;  %v5709_v14 = vadd.f32 %v895_v53, %v9087_v1  ;;  %v899_v36 = vsel %vm771_vm2, %v9088_v8, 0.0  ;;  %v4109_v23 = vld [vmem:[%s4325_s18 + $0x38] sm:$0xff]  ;;  %vm9089_vm14 = vcmp.eq.s32.totalorder %v4805_v19, %v9059_v47  ;;  %v9092_v33 = vld [vmem:[#allocation106_spill] sm:$0xff] }
 0x1f8   : > { %9084 = vst [vmem:[#allocation10_spill] sm:$0xff] %v5691_v9  ;;  %v1946_v10 = vadd.s32 320, %v4109_v23  ;;  %v900_v57 = vsel %vm9089_vm14, %v9088_v8, 0.0  ;;  %vm9090_vm4 = vcmp.eq.s32.totalorder %v4809_v38, %v9059_v47  ;;  %vm9091_vm1 = vcmp.eq.s32.totalorder %v4812_v18, %v9059_v47  ;;  %v9093_v23 = vld [vmem:[#allocation11_spill] sm:$0xff] }
 0x1f9   : > { %9086 = vst [vmem:[#allocation12_spill] sm:$0xff] %v5706_v20  ;;  %v901_v50 = vsel %vm9090_vm4, %v9088_v8, 0.0  ;;  %v902_v49 = vsel %vm9091_vm1, %v9088_v8, 0.0  ;;  %v1947_v53 = vadd.s32 320, %v5729_v58  ;;  %v5733_v1 = vadd.f32 %v896_v5, %v9092_v33  ;;  %v9097_v8 = vld [vmem:[#allocation13_spill] sm:$0xff]  ;;  %v5773_v21 = vpop.permute.xlu1 %1488 }
 0x1fa   : > { %v5736_v41 = vadd.f32 %v897_v16, %v9093_v23  ;;  %v5739_v42 = vadd.f32 %v898_v25, %v9094_v45  ;;  %vm9096_vm10 = vcmp.eq.s32.totalorder %v4802_v28, %v9070_v6  ;;  %v5746_v39 = vadd.f32 %v899_v36, %v9097_v8  ;;  %v9099_v25 = vld [vmem:[#allocation15_spill] sm:$0xff]  ;;  %v9101_v36 = vld [vmem:[#allocation104_spill] sm:$0xff]  ;;  %v9103_v8 = vld [vmem:[#allocation105_spill] sm:$0xff]  ;;  %1977 = vperm.xlu1 %4056, %v1946_v10  }
 0x1fb   : > { %v907_v47 = vsel %vm9096_vm10, %v9095_v3, 0.0  ;;  %v908_v5 = vsel %vm780_vm12, %v9095_v3, 0.0  ;;  %v909_v45 = vsel %vm781_vm15, %v9095_v3, 0.0  ;;  %v910_v16 = vsel %vm782_vm6, %v9095_v3, 0.0  ;;  %9107 = vst [vmem:[#allocation107_spill] sm:$0xff] %v5773_v21  ;;  %1980 = vperm.xlu2 %4054, %v1947_v53   ;;  %v9115_v53 = vld [vmem:[#allocation18_spill] sm:$0xff] }
 0x1fc   : > { %9098 = vst [vmem:[#allocation16_spill] sm:$0xff] %v5746_v39  ;;  %v5761_v33 = vadd.f32 %v900_v57, %v9099_v25  ;;  %v5764_v23 = vadd.f32 %v901_v50, %v9101_v36  ;;  %v5767_v12 = vadd.f32 %v902_v49, %v9103_v8  ;;  %vm9106_vm2 = vcmp.eq.s32.totalorder %v4802_v28, %v9071_v55  ;;  %v5791_v50 = vld [vmem:[%s4392_s21 + $0x40] sm:$0xff]  ;;  %v9112_v36 = vld [vmem:[#allocation115_spill] sm:$0xff]  ;;  %v9123_v21 = vld [vmem:[#allocation52_spill] sm:$0xff] }
 0x1fd   : > { %v911_v34 = vsel %vm9106_vm2, %v9105_v29, 0.0  ;;  %v5776_v6 = vadd.f32 %v907_v47, %v9108_v48  ;;  %v912_v3 = vsel %vm784_vm9, %v9105_v29, 0.0  ;;  %v913_v57 = vsel %vm785_vm5, %v9105_v29, 0.0  ;;  %2100 = vperm.xlu0 %4055, %v5791_v50   ;;  %v9110_v48 = vld [vmem:[#allocation111_spill] sm:$0xff]  ;;  %v9111_v47 = vld [vmem:[#allocation114_spill] sm:$0xff] }
 0x1fe   : > { %9100 = vst [vmem:[#allocation47_spill] sm:$0xff] %v5761_v33  ;;  %vm9109_vm3 = vcmp.eq.s32.totalorder %v4812_v18, %v9071_v55  ;;  %v5795_v49 = vadd.f32 %v908_v5, %v9110_v48  ;;  %v5798_v25 = vadd.f32 %v909_v45, %v9111_v47  ;;  %v5801_v8 = vadd.f32 %v910_v16, %v9112_v36  ;;  %v5805_v55 = vpop.permute.xlu0 %1663  ;;  %v9117_v45 = vld [vmem:[#allocation108_spill] sm:$0xff]  ;;  %v9119_v48 = vld [vmem:[#allocation109_spill] sm:$0xff]  ;;  %v9121_v36 = vld [vmem:[#allocation110_spill] sm:$0xff] }
 0x1ff   : > { %9102 = vst [vmem:[#allocation106_spill] sm:$0xff] %v5764_v23  ;;  %v914_v10 = vsel %vm9109_vm3, %v9105_v29, 0.0  ;;  %vm1063_vm13 = vcmp.eq.s32.totalorder %v4802_v28, %v9113_v2  ;;  %v5807_v29 = vpop.permute.xlu2 %1660  ;;  %vm1064_vm8 = vcmp.eq.s32.totalorder %v4805_v19, %v9113_v2  ;;  %vm1065_vm9 = vcmp.eq.s32.totalorder %v4809_v38, %v9113_v2  ;;  %v9131_v23 = vld [vmem:[#allocation57_spill] sm:$0xff] }
 0x200   : > { %9104 = vst [vmem:[#allocation11_spill] sm:$0xff] %v5767_v12  ;;  %vm1066_vm15 = vcmp.eq.s32.totalorder %v4812_v18, %v9113_v2  ;;  %v5816_v5 = vadd.f32 %v911_v34, %v9115_v53  ;;  %v5819_v16 = vadd.f32 %v912_v3, %v9117_v45  ;;  %v5822_v47 = vadd.f32 %v913_v57, %v9119_v48  ;;  %v9124_v34 = vld [vmem:[#allocation53_spill] sm:$0xff]  ;;  %v9126_v53 = vld [vmem:[#allocation54_spill] sm:$0xff]  ;;  %v9127_v45 = vld [vmem:[#allocation55_spill] sm:$0xff] }
 0x201   : > { %9114 = vst [vmem:[#allocation48_spill] sm:$0xff] %v5805_v55  ;;  %v5825_v43 = vadd.f32 %v914_v10, %v9121_v36  ;;  %v1949_v56 = vadd.s32 320, %v4112_v31  ;;  %vm1075_vm12 = vcmp.eq.s32.totalorder %v4802_v28, %v9123_v21  ;;  %vm1076_vm6 = vcmp.eq.s32.totalorder %v4805_v19, %v9123_v21  ;;  %v5839_v3 = vld [vmem:[%s4325_s18 + $0x58] sm:$0xff]  ;;  %v5847_v31 = vld [vmem:[%s4325_s18 + $0x48] sm:$0xff]  ;;  %v4116_v2 = vld [vmem:[%s4325_s18 + $0x70] sm:$0xff] }
 0x202   : > { %9116 = vst [vmem:[#allocation13_spill] sm:$0xff] %v5816_v5  ;;  %vm1077_vm5 = vcmp.eq.s32.totalorder %v4809_v38, %v9123_v21  ;;  %vm1051_vm0 = vcmp.eq.s32.totalorder %v4802_v28, %v9124_v34  ;;  %v1950_v57 = vadd.s32 320, %v5839_v3  ;;  %vm1052_vm11 = vcmp.eq.s32.totalorder %v4805_v19, %v9124_v34  ;;  %v9128_v48 = vld [vmem:[#allocation66_spill] sm:$0xff]  ;;  %v5871_v5 = vpop.permute.xlu1 %1642 }
 0x203   : > { %9118 = vst [vmem:[#allocation15_spill] sm:$0xff] %v5819_v16  ;;  %vm1053_vm14 = vcmp.eq.s32.totalorder %v4809_v38, %v9124_v34  ;;  %v2588_v10 = vadd.s32 448, %v5847_v31  ;;  %vm1054_vm4 = vcmp.eq.s32.totalorder %v4812_v18, %v9124_v34  ;;  %vm1069_vm2 = vcmp.eq.s32.totalorder %v4809_v38, %v9126_v53  ;;  %1986 = vperm.xlu1 %4056, %v1949_v56   ;;  %v9129_v56 = vld [vmem:[#allocation69_spill] sm:$0xff] }
 0x204   : > { %9120 = vst [vmem:[#allocation104_spill] sm:$0xff] %v5822_v47  ;;  %vm1070_vm3 = vcmp.eq.s32.totalorder %v4812_v18, %v9126_v53  ;;  %vm1087_vm7 = vcmp.eq.s32.totalorder %v4802_v28, %v9127_v45  ;;  %v1179_v36 = vsel %vm1051_vm0, %v9128_v48, 0.0  ;;  %vm1088_vm1 = vcmp.eq.s32.totalorder %v4805_v19, %v9127_v45  ;;  %1989 = vperm.xlu2 %4054, %v1950_v57  }
 0x205   : > { %9122 = vst [vmem:[#allocation105_spill] sm:$0xff] %v5825_v43  ;;  %v1180_v43 = vsel %vm1052_vm11, %v9128_v48, 0.0  ;;  %vm1089_vm10 = vcmp.eq.s32.totalorder %v4809_v38, %v9127_v45  ;;  %v1181_v34 = vsel %vm1053_vm14, %v9128_v48, 0.0  ;;  %v1182_v47 = vsel %vm1054_vm4, %v9128_v48, 0.0 }
 0x206   : > { %9125 = vst [vmem:[#allocation50_spill] sm:$0xff] %v5847_v31  ;;  %v8823_v16 = vmov 7   ;;  %vm1090_vm0 = vcmp.eq.s32.totalorder %v4812_v18, %v9127_v45  ;;  %v1191_v15 = vsel %vm1063_vm13, %v9129_v56, 0.0  ;;  %v1192_v48 = vsel %vm1064_vm8, %v9129_v56, 0.0 }
 0x207   : > { %4062 = vset.pattern.permute.xlu0 %v8823_v16  ;;  %v1193_v57 = vsel %vm1065_vm9, %v9129_v56, 0.0  ;;  %v5887_v16 = vpop.permute.xlu0 %1672  ;;  %v5889_v12 = vpop.permute.xlu2 %1669  ;;  %vm1079_vm11 = vcmp.eq.s32.totalorder %v4802_v28, %v9131_v23  ;;  %vm1080_vm13 = vcmp.eq.s32.totalorder %v4805_v19, %v9131_v23  ;;  %v5896_v33 = vadd.f32 %v1179_v36, %v5469_v51  ;;  %9132 = vst [vmem:[#allocation111_spill] sm:$0xff] %v5912_v63 }
 0x208   : > { %2623 = vperm.xlu0 %4062, %v2588_v10   ;;  %9130 = vst [vmem:[#allocation19_spill] sm:$0xff] %v5887_v16  ;;  %v5899_v31 = vadd.f32 %v1180_v43, %v5472_v11  ;;  %v1194_v10 = vsel %vm1066_vm15, %v9129_v56, 0.0  ;;  %v5906_v16 = vadd.f32 %v1181_v34, %v5475_v0  ;;  %v5909_v55 = vadd.f32 %v1182_v47, %v5501_v30  ;;  %v9133_v0 = vld [vmem:[#allocation72_spill] sm:$0xff] }
 0x209   : > { %v1952_v39 = vadd.s32 320, %v5912_v63  ;;  %v5916_v51 = vadd.f32 %v1191_v15, %v5552_v46  ;;  %v5919_v43 = vadd.f32 %v1192_v48, %v5555_v59  ;;  %v5922_v11 = vadd.f32 %v1193_v57, %v5562_v44  ;;  %v9135_v59 = vld [vmem:[#allocation74_spill] sm:$0xff]  ;;  %v9138_v48 = vld [vmem:[#allocation75_spill] sm:$0xff] }
 0x20a   : > { %v1953_v36 = vadd.s32 320, %v4116_v2  ;;  %v1203_v30 = vsel %vm1075_vm12, %v9133_v0, 0.0  ;;  %v1204_v47 = vsel %vm1076_vm6, %v9133_v0, 0.0  ;;  %v1205_v46 = vsel %vm1077_vm5, %v9133_v0, 0.0  ;;  %v5984_v4 = vpop.permute.xlu1 %1648 }
 0x20b   : > { %vm9134_vm8 = vcmp.eq.s32.totalorder %v4812_v18, %v9123_v21  ;;  %vm9136_vm9 = vcmp.eq.s32.totalorder %v4802_v28, %v9126_v53  ;;  %vm9137_vm15 = vcmp.eq.s32.totalorder %v4805_v19, %v9126_v53  ;;  %v1197_v56 = vsel %vm1069_vm2, %v9135_v59, 0.0  ;;  %1995 = vperm.xlu1 %4056, %v1952_v39  }
 0x20c   : > { %v1206_v44 = vsel %vm9134_vm8, %v9133_v0, 0.0  ;;  %v1195_v15 = vsel %vm9136_vm9, %v9135_v59, 0.0  ;;  %v1196_v34 = vsel %vm9137_vm15, %v9135_v59, 0.0  ;;  %v1198_v21 = vsel %vm1070_vm3, %v9135_v59, 0.0  ;;  %1998 = vperm.xlu2 %4054, %v1953_v36  }
 0x20d   : > { %v1215_v57 = vsel %vm1087_vm7, %v9138_v48, 0.0  ;;  %v1216_v2 = vsel %vm1088_vm1, %v9138_v48, 0.0  ;;  %v1217_v0 = vsel %vm1089_vm10, %v9138_v48, 0.0  ;;  %v5970_v20 = vadd.f32 %v1194_v10, %v5565_v35  ;;  %v9139_v10 = vld [vmem:[#allocation86_spill] sm:$0xff] }
 0x20e   : > { %v5973_v53 = vadd.f32 %v1203_v30, %v5660_v27  ;;  %v5976_v59 = vadd.f32 %v1204_v47, %v5663_v26  ;;  %v5979_v9 = vadd.f32 %v1205_v46, %v5675_v54  ;;  %v5982_v61 = vadd.f32 %v1206_v44, %v5678_v52  ;;  %v5999_v26 = vld [vmem:[%s4392_s21 + $0x48] sm:$0xff]  ;;  %v9142_v47 = vld [vmem:[#allocation77_spill] sm:$0xff] }
 0x20f   : > { %v5987_v63 = vadd.f32 %v1195_v15, %v5618_v22  ;;  %v5990_v39 = vadd.f32 %v1196_v34, %v5645_v17  ;;  %v5993_v27 = vadd.f32 %v1197_v56, %v5648_v62  ;;  %v5996_v35 = vadd.f32 %v1198_v21, %v5651_v13  ;;  %v6002_v54 = vpop.permute.xlu0 %1681  ;;  %v6004_v52 = vpop.permute.xlu2 %1678  ;;  %v9141_v30 = vld [vmem:[#allocation58_spill] sm:$0xff]  ;;  %v9143_v34 = vld [vmem:[#allocation21_spill] sm:$0xff] }
 0x210   : > { %2744 = vperm.xlu0 %4062, %v5999_v26   ;;  %v1218_v22 = vsel %vm1090_vm0, %v9138_v48, 0.0  ;;  %v6011_v17 = vadd.f32 %v1215_v57, %v5709_v14  ;;  %v6014_v62 = vadd.f32 %v1216_v2, %v5733_v1  ;;  %v6017_v13 = vadd.f32 %v1217_v0, %v5736_v41  ;;  %v9140_v41 = vld [vmem:[#allocation96_spill] sm:$0xff]  ;;  %v9144_v21 = vld [vmem:[#allocation82_spill] sm:$0xff] }
 0x211   : > { %vm1081_vm12 = vcmp.eq.s32.totalorder %v4809_v38, %v9131_v23  ;;  %vm1082_vm6 = vcmp.eq.s32.totalorder %v4812_v18, %v9131_v23  ;;  %vm1371_vm5 = vcmp.eq.s32.totalorder %v4802_v28, %v9139_v10  ;;  %vm1372_vm7 = vcmp.eq.s32.totalorder %v4805_v19, %v9139_v10  ;;  %v4118_v0 = vld [vmem:[%s4392_s21] sm:$0xff] }
 0x212   : > { %vm1373_vm14 = vcmp.eq.s32.totalorder %v4809_v38, %v9139_v10  ;;  %vm1374_vm4 = vcmp.eq.s32.totalorder %v4812_v18, %v9139_v10  ;;  %v1499_v14 = vsel %vm1371_vm5, %v9140_v41, 0.0  ;;  %v1500_v1 = vsel %vm1372_vm7, %v9140_v41, 0.0 }
 0x213   : > { %v1501_v45 = vsel %vm1373_vm14, %v9140_v41, 0.0  ;;  %v1502_v36 = vsel %vm1374_vm4, %v9140_v41, 0.0  ;;  %vm1099_vm1 = vcmp.eq.s32.totalorder %v4802_v28, %v9141_v30  ;;  %v1207_v46 = vsel %vm1079_vm11, %v9142_v47, 0.0  ;;  %2068 = vperm.xlu1 %4056, %v4118_v0  }
 0x214   : > { %v6045_v44 = vsel %vm1080_vm13, %v9142_v47, 0.0  ;;  %v6048_v15 = vadd.f32 %v1218_v22, %v5739_v42  ;;  %v2591_v56 = vadd.s32 448, %v9143_v34  ;;  %vm1100_vm10 = vcmp.eq.s32.totalorder %v4805_v19, %v9141_v30 }
 0x215   : > { %vm1383_vm3 = vcmp.eq.s32.totalorder %v4802_v28, %v9144_v21  ;;  %vm1384_vm0 = vcmp.eq.s32.totalorder %v4805_v19, %v9144_v21  ;;  %vm1385_vm11 = vcmp.eq.s32.totalorder %v4809_v38, %v9144_v21  ;;  %vm1386_vm13 = vcmp.eq.s32.totalorder %v4812_v18, %v9144_v21 }
 0x216   : > { %v1563_v42 = vadd.f32 %v1499_v14, %v5896_v33  ;;  %v1564_v48 = vadd.f32 %v1500_v1, %v5899_v31  ;;  %v1565_v57 = vadd.f32 %v1501_v45, %v5906_v16  ;;  %v1566_v2 = vadd.f32 %v1502_v36, %v5909_v55  ;;  %v4119_v33 = vld [vmem:[%s4392_s21 + $0x8] sm:$0xff]  ;;  %v6077_v31 = vpop.permute.xlu1 %1657 }
 0x217   : > { %vm1687_vm8 = vcmp.eq.s32.totalorder %v4802_v28, %v5557_v60  ;;  %vm1688_vm9 = vcmp.eq.s32.totalorder %v4805_v19, %v5557_v60  ;;  %vm1689_vm15 = vcmp.eq.s32.totalorder %v4809_v38, %v5557_v60  ;;  %vm1690_vm5 = vcmp.eq.s32.totalorder %v4812_v18, %v5557_v60  ;;  %2072 = vperm.xlu2 %4054, %v4119_v33   ;;  %v1757_v55 = vpop.permute.xlu0 %1756  ;;  %v1753_v16 = vpop.permute.xlu2 %1752 }
 0x218   : > { %9145 = vst [vmem:[#allocation114_spill] sm:$0xff] %v6077_v31  ;;  %2632 = vperm.xlu0 %4062, %v2591_v56   ;;  %vm1691_vm7 = vcmp.eq.s32.totalorder %v4802_v28, %v5871_v5  ;;  %vm1692_vm14 = vcmp.eq.s32.totalorder %v4805_v19, %v5871_v5  ;;  %vm1693_vm4 = vcmp.eq.s32.totalorder %v4809_v38, %v5871_v5  ;;  %v6098_v56 = vsel %vm1687_vm8, %v1753_v16, 0.0 }
 0x219   : > { %vm1694_vm2 = vcmp.eq.s32.totalorder %v4812_v18, %v5871_v5  ;;  %v1819_v22 = vsel %vm1691_vm7, %v1757_v55, 0.0  ;;  %v1820_v10 = vsel %vm1692_vm14, %v1757_v55, 0.0  ;;  %v1821_v41 = vsel %vm1693_vm4, %v1757_v55, 0.0 }
 0x21a   : > { %v1822_v14 = vsel %vm1694_vm2, %v1757_v55, 0.0  ;;  %v6087_v1 = vadd.f32 %v1819_v22, %v1563_v42  ;;  %v6089_v45 = vadd.f32 %v1820_v10, %v1564_v48  ;;  %v6091_v36 = vadd.f32 %v1821_v41, %v1565_v57  ;;  %v9149_v57 = vld [vmem:[#allocation99_spill] sm:$0xff]  ;;  %v9150_v10 = vld [vmem:[#allocation78_spill] sm:$0xff] }
 0x21b   : > { %v6093_v34 = vadd.f32 %v1822_v14, %v1566_v2  ;;  %v6103_v5 = vsel %vm1688_vm9, %v1753_v16, 0.0  ;;  %v6108_v42 = vsel %vm1689_vm15, %v1753_v16, 0.0  ;;  %v6113_v48 = vsel %vm1690_vm5, %v1753_v16, 0.0 }
 0x21c   : > { %9146 = vst [vmem:[#allocation115_spill] sm:$0xff] %v6103_v5  ;;  %vm1102_vm2 = vcmp.eq.s32.totalorder %v4812_v18, %v9141_v30  ;;  %v1511_v2 = vsel %vm1383_vm3, %v9149_v57, 0.0  ;;  %v1512_v0 = vsel %vm1384_vm0, %v9149_v57, 0.0  ;;  %v1513_v60 = vsel %vm1385_vm11, %v9149_v57, 0.0 }
 0x21d   : > { %9147 = vst [vmem:[#allocation49_spill] sm:$0xff] %v6108_v42  ;;  %v1514_v33 = vsel %vm1386_vm13, %v9149_v57, 0.0  ;;  %v6137_v55 = vsel %vm1081_vm12, %v9142_v47, 0.0  ;;  %v6143_v16 = vsel %vm1082_vm6, %v9142_v47, 0.0  ;;  %v6146_v22 = vadd.f32 %v1207_v46, %v5681_v37  ;;  %v9152_v47 = vld [vmem:[#allocation85_spill] sm:$0xff] }
 0x21e   : > { %9148 = vst [vmem:[#allocation18_spill] sm:$0xff] %v6113_v48  ;;  %v1227_v21 = vsel %vm1099_vm1, %v9150_v10, 0.0  ;;  %v1228_v41 = vsel %vm1100_vm10, %v9150_v10, 0.0  ;;  %vm9151_vm12 = vcmp.eq.s32.totalorder %v4809_v38, %v9141_v30  ;;  %vm1395_vm6 = vcmp.eq.s32.totalorder %v4802_v28, %v9152_v47  ;;  %v4120_v37 = vld [vmem:[%s4392_s21 + $0x18] sm:$0xff]  ;;  %v6172_v48 = vld [vmem:[%s4392_s21 + $0x20] sm:$0xff]  ;;  %v6175_v42 = vpop.permute.xlu1 %1666 }
 0x21f   : > { %v6160_v23 = vsel %vm9151_vm12, %v9150_v10, 0.0  ;;  %vm1396_vm3 = vcmp.eq.s32.totalorder %v4805_v19, %v9152_v47  ;;  %2080 = vperm.xlu1 %4056, %v4120_v37   ;;  %v1575_v46 = vadd.f32 %v1511_v2, %v5916_v51  ;;  %v1576_v14 = vadd.f32 %v1512_v0, %v5919_v43  ;;  %2084 = vperm.xlu2 %4054, %v6172_v48   ;;  %v1769_v5 = vpop.permute.xlu0 %1768 }
 0x220   : > { %v1577_v57 = vadd.f32 %v1513_v60, %v5922_v11  ;;  %v1578_v31 = vadd.f32 %v1514_v33, %v5970_v20  ;;  %2724 = vperm.xlu0 %4062, %v6172_v48   ;;  %vm1703_vm1 = vcmp.eq.s32.totalorder %v4802_v28, %v5688_v40  ;;  %vm1704_vm10 = vcmp.eq.s32.totalorder %v4805_v19, %v5688_v40  ;;  %v6186_v20 = vpop.permute.xlu2 %1764 }
 0x221   : > { %vm1705_vm0 = vcmp.eq.s32.totalorder %v4809_v38, %v5688_v40  ;;  %vm1706_vm11 = vcmp.eq.s32.totalorder %v4812_v18, %v5688_v40  ;;  %9153 = vst [vmem:[#allocation108_spill] sm:$0xff] %v6186_v20  ;;  %v1831_v51 = vsel %vm1703_vm1, %v1769_v5, 0.0  ;;  %v1832_v43 = vsel %vm1704_vm10, %v1769_v5, 0.0  ;;  %v9158_v40 = vld [vmem:[#allocation102_spill] sm:$0xff] }
 0x222   : > { %v1833_v11 = vsel %vm1705_vm0, %v1769_v5, 0.0  ;;  %v1834_v2 = vsel %vm1706_vm11, %v1769_v5, 0.0  ;;  %v6188_v0 = vadd.f32 %v1831_v51, %v1575_v46  ;;  %v6190_v60 = vadd.f32 %v1832_v43, %v1576_v14 }
 0x223   : > { %v6192_v33 = vadd.f32 %v1833_v11, %v1577_v57  ;;  %v6194_v37 = vadd.f32 %v1834_v2, %v1578_v31  ;;  %vm1397_vm13 = vcmp.eq.s32.totalorder %v4809_v38, %v9152_v47  ;;  %vm1398_vm8 = vcmp.eq.s32.totalorder %v4812_v18, %v9152_v47  ;;  %v9159_v11 = vld [vmem:[#allocation88_spill] sm:$0xff] }
 0x224   : > { %9154 = vst [vmem:[#allocation109_spill] sm:$0xff] %v6188_v0  ;;  %v1523_v20 = vsel %vm1395_vm6, %v9158_v40, 0.0  ;;  %v1524_v5 = vsel %vm1396_vm3, %v9158_v40, 0.0  ;;  %v1525_v46 = vsel %vm1397_vm13, %v9158_v40, 0.0  ;;  %v1526_v31 = vsel %vm1398_vm8, %v9158_v40, 0.0  ;;  %v9161_v40 = vld [vmem:[#allocation60_spill] sm:$0xff] }
 0x225   : > { %9155 = vst [vmem:[#allocation110_spill] sm:$0xff] %v6190_v60  ;;  %v2590_v14 = vadd.s32 448, %v5839_v3  ;;  %v6215_v57 = vsel %vm1102_vm2, %v9150_v10, 0.0  ;;  %v6218_v51 = vadd.f32 %v1227_v21, %v5776_v6  ;;  %v6221_v43 = vadd.f32 %v1228_v41, %v5795_v49 }
 0x226   : > { %9156 = vst [vmem:[#allocation52_spill] sm:$0xff] %v6192_v33  ;;  %v2267_v47 = vadd.s32 384, %v5729_v58  ;;  %vm1407_vm9 = vcmp.eq.s32.totalorder %v4802_v28, %v9159_v11  ;;  %vm1408_vm15 = vcmp.eq.s32.totalorder %v4805_v19, %v9159_v11  ;;  %vm1409_vm5 = vcmp.eq.s32.totalorder %v4809_v38, %v9159_v11  ;;  %v6238_v41 = vpop.permute.xlu1 %1675 }
 0x227   : > { %9157 = vst [vmem:[#allocation53_spill] sm:$0xff] %v6194_v37  ;;  %vm1410_vm7 = vcmp.eq.s32.totalorder %v4812_v18, %v9159_v11  ;;  %2104 = vperm.xlu1 %4056, %v5999_v26   ;;  %v1587_v6 = vadd.f32 %v1523_v20, %v5973_v53  ;;  %v1588_v49 = vadd.f32 %v1524_v5, %v5976_v59  ;;  %v8834_v21 = vmov 6   ;;  %v1781_v2 = vpop.permute.xlu0 %1780 }
 0x228   : > { %v1589_v30 = vadd.f32 %v1525_v46, %v5979_v9  ;;  %v1590_v10 = vadd.f32 %v1526_v31, %v5982_v61  ;;  %4057 = vset.pattern.permute.xlu2 %v8834_v21  ;;  %2629 = vperm.xlu0 %4062, %v2590_v14   ;;  %vm1715_vm14 = vcmp.eq.s32.totalorder %v4802_v28, %v5807_v29  ;;  %v6248_v61 = vpop.permute.xlu2 %1776  ;;  %v9162_v21 = vld [vmem:[#allocation112_spill] sm:$0xff] }
 0x229   : > { %vm1716_vm4 = vcmp.eq.s32.totalorder %v4805_v19, %v5807_v29  ;;  %vm1717_vm2 = vcmp.eq.s32.totalorder %v4809_v38, %v5807_v29  ;;  %vm1718_vm12 = vcmp.eq.s32.totalorder %v4812_v18, %v5807_v29  ;;  %9160 = vst [vmem:[#allocation54_spill] sm:$0xff] %v6248_v61  ;;  %v1843_v9 = vsel %vm1715_vm14, %v1781_v2, 0.0  ;;  %2300 = vperm.xlu2 %4057, %v2267_v47  }
 0x22a   : > { %v1844_v53 = vsel %vm1716_vm4, %v1781_v2, 0.0  ;;  %v1845_v59 = vsel %vm1717_vm2, %v1781_v2, 0.0  ;;  %v1846_v20 = vsel %vm1718_vm12, %v1781_v2, 0.0  ;;  %vm1091_vm6 = vcmp.eq.s32.totalorder %v4802_v28, %v9161_v40 }
 0x22b   : > { %v6252_v5 = vadd.f32 %v1843_v9, %v1587_v6  ;;  %v6254_v46 = vadd.f32 %v1844_v53, %v1588_v49  ;;  %v6256_v31 = vadd.f32 %v1845_v59, %v1589_v30  ;;  %v6258_v14 = vadd.f32 %v1846_v20, %v1590_v10  ;;  %v9163_v30 = vld [vmem:[#allocation84_spill] sm:$0xff]  ;;  %v9164_v10 = vld [vmem:[#allocation91_spill] sm:$0xff]  ;;  %v6297_v53 = vld [vmem:[%s4392_s21 + $0x60] sm:$0xff] }
 0x22c   : > { %v1535_v29 = vsel %vm1407_vm9, %v9162_v21, 0.0  ;;  %v1536_v47 = vsel %vm1408_vm15, %v9162_v21, 0.0  ;;  %v1537_v6 = vsel %vm1409_vm5, %v9162_v21, 0.0  ;;  %v1538_v49 = vsel %vm1410_vm7, %v9162_v21, 0.0 }
 0x22d   : > { %vm1387_vm3 = vcmp.eq.s32.totalorder %v4802_v28, %v9163_v30  ;;  %vm1388_vm1 = vcmp.eq.s32.totalorder %v4805_v19, %v9163_v30  ;;  %vm1389_vm10 = vcmp.eq.s32.totalorder %v4809_v38, %v9163_v30  ;;  %vm1390_vm0 = vcmp.eq.s32.totalorder %v4812_v18, %v9163_v30  ;;  %v9179_v30 = vld [vmem:[#allocation111_spill] sm:$0xff] }
 0x22e   : > { %vm1419_vm11 = vcmp.eq.s32.totalorder %v4802_v28, %v9164_v10  ;;  %vm1420_vm13 = vcmp.eq.s32.totalorder %v4805_v19, %v9164_v10  ;;  %vm1421_vm8 = vcmp.eq.s32.totalorder %v4809_v38, %v9164_v10  ;;  %vm1422_vm9 = vcmp.eq.s32.totalorder %v4812_v18, %v9164_v10  ;;  %v6304_v37 = vpop.permute.xlu1 %1748 }
 0x22f   : > { %v1599_v11 = vadd.f32 %v1535_v29, %v6011_v17  ;;  %v1600_v21 = vadd.f32 %v1536_v47, %v6014_v62  ;;  %v1601_v2 = vadd.f32 %v1537_v6, %v6017_v13  ;;  %v1602_v9 = vadd.f32 %v1538_v49, %v6048_v15  ;;  %2116 = vperm.xlu1 %4056, %v6297_v53   ;;  %v6315_v17 = vld [vmem:[%s4392_s21 + $0x50] sm:$0xff]  ;;  %v6328_v47 = vld [vmem:[%s4392_s21 + $0x68] sm:$0xff] }
 0x230   : > { %v1547_v59 = vsel %vm1419_vm11, %v5399_v24, 0.0  ;;  %v1548_v20 = vsel %vm1420_vm13, %v5399_v24, 0.0  ;;  %v1549_v61 = vsel %vm1421_vm8, %v5399_v24, 0.0  ;;  %v1550_v10 = vsel %vm1422_vm9, %v5399_v24, 0.0  ;;  %9165 = vst [vmem:[#allocation55_spill] sm:$0xff] %v6304_v37  ;;  %2748 = vperm.xlu0 %4062, %v6315_v17   ;;  %v1793_v24 = vpop.permute.xlu0 %1792  ;;  %v1789_v62 = vpop.permute.xlu2 %1788 }
 0x231   : > { %vm1727_vm15 = vcmp.eq.s32.totalorder %v4802_v28, %v5889_v12  ;;  %vm1728_vm5 = vcmp.eq.s32.totalorder %v4805_v19, %v5889_v12  ;;  %vm1729_vm7 = vcmp.eq.s32.totalorder %v4809_v38, %v5889_v12  ;;  %vm1730_vm14 = vcmp.eq.s32.totalorder %v4812_v18, %v5889_v12  ;;  %9166 = vst [vmem:[#allocation66_spill] sm:$0xff] %v6315_v17 }
 0x232   : > { %vm1723_vm4 = vcmp.eq.s32.totalorder %v4802_v28, %v6175_v42  ;;  %vm1724_vm2 = vcmp.eq.s32.totalorder %v4805_v19, %v6175_v42  ;;  %vm1725_vm12 = vcmp.eq.s32.totalorder %v4809_v38, %v6175_v42  ;;  %vm1726_vm11 = vcmp.eq.s32.totalorder %v4812_v18, %v6175_v42  ;;  %4058 = vset.pattern.permute.xlu2 %v9040_v7 }
 0x233   : > { %v1855_v12 = vsel %vm1727_vm15, %v1793_v24, 0.0  ;;  %v1856_v13 = vsel %vm1728_vm5, %v1793_v24, 0.0  ;;  %v1857_v15 = vsel %vm1729_vm7, %v1793_v24, 0.0  ;;  %v1858_v29 = vsel %vm1730_vm14, %v1793_v24, 0.0  ;;  %2120 = vperm.xlu2 %4058, %v6328_v47   ;;  %v9175_v24 = vld [vmem:[#allocation80_spill] sm:$0xff] }
 0x234   : > { %v6331_v6 = vadd.f32 %v1855_v12, %v1599_v11  ;;  %v6333_v49 = vadd.f32 %v1856_v13, %v1600_v21  ;;  %v6335_v33 = vadd.f32 %v1857_v15, %v1601_v2  ;;  %v6337_v60 = vadd.f32 %v1858_v29, %v1602_v9 }
 0x235   : > { %v6339_v0 = vsel %vm1723_vm4, %v1789_v62, 0.0  ;;  %v6341_v42 = vsel %vm1724_vm2, %v1789_v62, 0.0  ;;  %v6343_v37 = vsel %vm1725_vm12, %v1789_v62, 0.0  ;;  %v6345_v17 = vsel %vm1726_vm11, %v1789_v62, 0.0 }
 0x236   : > { %9167 = vst [vmem:[#allocation69_spill] sm:$0xff] %v6331_v6  ;;  %v6351_v11 = vsel %vm1091_vm6, %v9175_v24, 0.0  ;;  %v1515_v21 = vsel %vm1387_vm3, %v5382_v32, 0.0  ;;  %v1293_v2 = vadd.f32 %v6160_v23, %v5798_v25  ;;  %v1294_v9 = vadd.f32 %v6215_v57, %v5801_v8  ;;  %v6381_v29 = vpop.permute.xlu1 %1760 }
 0x237   : > { %9168 = vst [vmem:[#allocation57_spill] sm:$0xff] %v6333_v49  ;;  %v1516_v62 = vsel %vm1388_vm1, %v5382_v32, 0.0  ;;  %v1517_v12 = vsel %vm1389_vm10, %v5382_v32, 0.0  ;;  %v1518_v13 = vsel %vm1390_vm0, %v5382_v32, 0.0  ;;  %v1611_v25 = vadd.f32 %v1547_v59, %v6218_v51  ;;  %v9177_v32 = vld [vmem:[#allocation87_spill] sm:$0xff] }
 0x238   : > { %9169 = vst [vmem:[#allocation72_spill] sm:$0xff] %v6335_v33  ;;  %v9176_v23 = vmov 6   ;;  %vm1092_vm6 = vcmp.eq.s32.totalorder %v4805_v19, %v9161_v40  ;;  %v1612_v8 = vadd.f32 %v1548_v20, %v6221_v43  ;;  %v1613_v57 = vadd.f32 %v1549_v61, %v1293_v2  ;;  %v6396_v51 = vld [vmem:[%s4392_s21 + $0x70] sm:$0xff]  ;;  %v1805_v43 = vpop.permute.xlu0 %1804  ;;  %v1801_v61 = vpop.permute.xlu2 %1800 }
 0x239   : > { %9170 = vst [vmem:[#allocation74_spill] sm:$0xff] %v6337_v60  ;;  %4059 = vset.pattern.permute.xlu1 %v9176_v23  ;;  %v1614_v15 = vadd.f32 %v1550_v10, %v1294_v9  ;;  %vm1739_vm3 = vcmp.eq.s32.totalorder %v4802_v28, %v6004_v52  ;;  %vm1093_vm1 = vcmp.eq.s32.totalorder %v4809_v38, %v9161_v40  ;;  %v2272_v59 = vadd.s32 384, %v9179_v30 }
 0x23a   : > { %9171 = vst [vmem:[#allocation75_spill] sm:$0xff] %v6339_v0  ;;  %2420 = vperm.xlu1 %4059, %v5791_v50   ;;  %vm1094_vm10 = vcmp.eq.s32.totalorder %v4812_v18, %v9161_v40  ;;  %vm1399_vm0 = vcmp.eq.s32.totalorder %v4802_v28, %v9177_v32  ;;  %vm1740_vm13 = vcmp.eq.s32.totalorder %v4805_v19, %v6004_v52  ;;  %v1867_v20 = vsel %vm1739_vm3, %v1805_v43, 0.0 }
 0x23b   : > { %9172 = vst [vmem:[#allocation86_spill] sm:$0xff] %v6341_v42  ;;  %vm1741_vm8 = vcmp.eq.s32.totalorder %v4809_v38, %v6004_v52  ;;  %vm1742_vm9 = vcmp.eq.s32.totalorder %v4812_v18, %v6004_v52  ;;  %2764 = vperm.xlu0 %4062, %v6396_v51   ;;  %vm1735_vm15 = vcmp.eq.s32.totalorder %v4802_v28, %v6238_v41  ;;  %v1868_v10 = vsel %vm1740_vm13, %v1805_v43, 0.0 }
 0x23c   : > { %9173 = vst [vmem:[#allocation96_spill] sm:$0xff] %v6343_v37  ;;  %vm1736_vm5 = vcmp.eq.s32.totalorder %v4805_v19, %v6238_v41  ;;  %vm1737_vm7 = vcmp.eq.s32.totalorder %v4809_v38, %v6238_v41  ;;  %vm1738_vm14 = vcmp.eq.s32.totalorder %v4812_v18, %v6238_v41  ;;  %v1869_v2 = vsel %vm1741_vm8, %v1805_v43, 0.0  ;;  %4060 = vset.pattern.permute.xlu2 %v9176_v23 }
 0x23d   : > { %9174 = vst [vmem:[#allocation58_spill] sm:$0xff] %v6345_v17  ;;  %v1870_v9 = vsel %vm1742_vm9, %v1805_v43, 0.0  ;;  %v6412_v60 = vadd.f32 %v1867_v20, %v1611_v25  ;;  %v6414_v33 = vadd.f32 %v1868_v10, %v1612_v8  ;;  %v6416_v49 = vadd.f32 %v1869_v2, %v1613_v57  ;;  %2424 = vperm.xlu2 %4060, %v5999_v26   ;;  %v9186_v43 = vld [vmem:[#allocation45_spill] sm:$0xff]  ;;  %v9187_v25 = vld [vmem:[#allocation63_spill] sm:$0xff] }
 0x23e   : > { %9178 = vst [vmem:[#allocation77_spill] sm:$0xff] %v6396_v51  ;;  %v6418_v6 = vadd.f32 %v1870_v9, %v1614_v15  ;;  %v6421_v41 = vsel %vm1735_vm15, %v1801_v61, 0.0  ;;  %v6423_v17 = vsel %vm1736_vm5, %v1801_v61, 0.0  ;;  %v6425_v52 = vsel %vm1737_vm7, %v1801_v61, 0.0  ;;  %v1773_v8 = vpop.permute.xlu1 %1772  ;;  %v9193_v2 = vld [vmem:[#allocation43_spill] sm:$0xff] }
 0x23f   : > { %9180 = vst [vmem:[#allocation21_spill] sm:$0xff] %v6412_v60  ;;  %v6427_v37 = vsel %vm1738_vm14, %v1801_v61, 0.0  ;;  %vm1707_vm4 = vcmp.eq.s32.totalorder %v4802_v28, %v9186_v43  ;;  %vm1708_vm2 = vcmp.eq.s32.totalorder %v4805_v19, %v9186_v43  ;;  %vm1709_vm12 = vcmp.eq.s32.totalorder %v4809_v38, %v9186_v43  ;;  %v9212_v60 = vld [vmem:[#allocation83_spill] sm:$0xff] }
 0x240   : > { %9181 = vst [vmem:[#allocation82_spill] sm:$0xff] %v6414_v33  ;;  %vm1710_vm11 = vcmp.eq.s32.totalorder %v4812_v18, %v9186_v43  ;;  %vm1400_vm3 = vcmp.eq.s32.totalorder %v4805_v19, %v9177_v32  ;;  %vm1401_vm13 = vcmp.eq.s32.totalorder %v4809_v38, %v9177_v32  ;;  %vm1402_vm8 = vcmp.eq.s32.totalorder %v4812_v18, %v9177_v32  ;;  %v6479_v10 = vpop.permute.xlu2 %1956  ;;  %v9202_v32 = vld [vmem:[#allocation51_spill] sm:$0xff] }
 0x241   : > { %9182 = vst [vmem:[#allocation99_spill] sm:$0xff] %v6416_v49  ;;  %v1579_v26 = vadd.f32 %v1515_v21, %v5987_v63  ;;  %vm1103_vm9 = vcmp.eq.s32.totalorder %v4802_v28, %v9187_v25  ;;  %v1580_v57 = vadd.f32 %v1516_v62, %v5990_v39  ;;  %v1581_v15 = vadd.f32 %v1517_v12, %v5993_v27  ;;  %v9211_v49 = vld [vmem:[#allocation11_spill] sm:$0xff] }
 0x242   : > { %9183 = vst [vmem:[#allocation78_spill] sm:$0xff] %v6418_v6  ;;  %2315 = vperm.xlu1 %4059, %v2272_v59   ;;  %v1582_v61 = vadd.f32 %v1518_v13, %v5996_v35  ;;  %v2587_v20 = vadd.s32 448, %v5729_v58  ;;  %vm1104_vm15 = vcmp.eq.s32.totalorder %v4805_v19, %v9187_v25  ;;  %vm1105_vm5 = vcmp.eq.s32.totalorder %v4809_v38, %v9187_v25  ;;  %v4126_v35 = vld [vmem:[%s4392_s21 + $0x38] sm:$0xff]  ;;  %v6477_v59 = vpop.permute.xlu0 %1959  ;;  %v9194_v6 = vld [vmem:[#allocation10_spill] sm:$0xff] }
 0x243   : > { %9184 = vst [vmem:[#allocation85_spill] sm:$0xff] %v6425_v52  ;;  %vm1106_vm7 = vcmp.eq.s32.totalorder %v4812_v18, %v9187_v25  ;;  %v1835_v63 = vsel %vm1707_vm4, %v1773_v8, 0.0  ;;  %v1836_v39 = vsel %vm1708_vm2, %v1773_v8, 0.0  ;;  %v1837_v58 = vsel %vm1709_vm12, %v1773_v8, 0.0  ;;  %2736 = vperm.xlu0 %4062, %v4126_v35   ;;  %v9201_v35 = vld [vmem:[#allocation90_spill] sm:$0xff]  ;;  %v9214_v25 = vld [vmem:[#allocation19_spill] sm:$0xff] }
 0x244   : > { %9185 = vst [vmem:[#allocation102_spill] sm:$0xff] %v6427_v37  ;;  %v1838_v27 = vsel %vm1710_vm11, %v1773_v8, 0.0  ;;  %v6469_v21 = vadd.f32 %v1835_v63, %v1579_v26  ;;  %v6471_v62 = vadd.f32 %v1836_v39, %v1580_v57  ;;  %v6473_v12 = vadd.f32 %v1837_v58, %v1581_v15  ;;  %v9195_v8 = vld [vmem:[#allocation12_spill] sm:$0xff]  ;;  %v9200_v58 = vld [vmem:[#allocation50_spill] sm:$0xff]  ;;  %v9262_v37 = vld [vmem:[#allocation119_spill] sm:$0xff] }
 0x245   : > { %v6475_v13 = vadd.f32 %v1838_v27, %v1582_v61  ;;  %9192 = vst [vmem:[#allocation91_spill] sm:$0xff] %v6479_v10  ;;  %v1272_v9 = vadd.f32 %v6045_v44, %v9193_v2  ;;  %v1273_v43 = vadd.f32 %v6137_v55, %v9194_v6  ;;  %v1274_v26 = vadd.f32 %v6143_v16, %v9195_v8  ;;  %v9196_v61 = vld [vmem:[#allocation16_spill] sm:$0xff]  ;;  %v9197_v16 = vld [vmem:[#allocation39_spill] sm:$0xff]  ;;  %v9265_v10 = vld [vmem:[#allocation89_spill] sm:$0xff] }
 0x246   : > { %9188 = vst [vmem:[#allocation88_spill] sm:$0xff] %v6469_v21  ;;  %v1220_v57 = vsel %vm1092_vm6, %v9175_v24, 0.0  ;;  %v1221_v15 = vsel %vm1093_vm1, %v9175_v24, 0.0  ;;  %v1222_v44 = vsel %vm1094_vm10, %v9175_v24, 0.0  ;;  %v6501_v55 = vadd.f32 %v6351_v11, %v9196_v61  ;;  %v9199_v11 = vld [vmem:[#allocation48_spill] sm:$0xff] }
 0x247   : > { %9189 = vst [vmem:[#allocation60_spill] sm:$0xff] %v6471_v62  ;;  %v1527_v6 = vsel %vm1399_vm0, %v9197_v16, 0.0  ;;  %v9198_v63 = vmov 7   ;;  %v1528_v39 = vsel %vm1400_vm3, %v9197_v16, 0.0  ;;  %v1529_v40 = vsel %vm1401_vm13, %v9197_v16, 0.0 }
 0x248   : > { %9190 = vst [vmem:[#allocation112_spill] sm:$0xff] %v6473_v12  ;;  %4061 = vset.pattern.permute.xlu2 %v9198_v63  ;;  %v1530_v24 = vsel %vm1402_vm8, %v9197_v16, 0.0  ;;  %vm1719_vm6 = vcmp.eq.s32.totalorder %v4802_v28, %v9199_v11  ;;  %vm1720_vm1 = vcmp.eq.s32.totalorder %v4805_v19, %v9199_v11  ;;  %vm1721_vm10 = vcmp.eq.s32.totalorder %v4809_v38, %v9199_v11 }
 0x249   : > { %9191 = vst [vmem:[#allocation84_spill] sm:$0xff] %v6475_v13  ;;  %2620 = vperm.xlu2 %4061, %v2587_v20   ;;  %vm1722_vm0 = vcmp.eq.s32.totalorder %v4812_v18, %v9199_v11  ;;  %v2268_v27 = vadd.s32 384, %v9200_v58  ;;  %vm1411_vm14 = vcmp.eq.s32.totalorder %v4802_v28, %v9201_v35  ;;  %vm1412_vm4 = vcmp.eq.s32.totalorder %v4805_v19, %v9201_v35  ;;  %v1785_v20 = vpop.permute.xlu1 %1784 }
 0x24a   : > { %vm1413_vm2 = vcmp.eq.s32.totalorder %v4809_v38, %v9201_v35  ;;  %vm1414_vm12 = vcmp.eq.s32.totalorder %v4812_v18, %v9201_v35  ;;  %vm1047_vm11 = vcmp.eq.s32.totalorder %v4802_v28, %v9202_v32  ;;  %vm1048_vm3 = vcmp.eq.s32.totalorder %v4805_v19, %v9202_v32  ;;  %4063 = vset.pattern.permute.xlu1 %v9040_v7  ;;  %v4128_v35 = vld [vmem:[%s4325_s18 + $0x60] sm:$0xff] }
 0x24b   : > { %vm1049_vm13 = vcmp.eq.s32.totalorder %v4809_v38, %v9202_v32  ;;  %v1591_v2 = vadd.f32 %v1527_v6, %v6146_v22  ;;  %v1592_v8 = vadd.f32 %v1528_v39, %v1272_v9  ;;  %v1593_v61 = vadd.f32 %v1529_v40, %v1273_v43  ;;  %4087 = vset.pattern.permute.xlu0 %v9176_v23  ;;  %v6559_v22 = vld [vmem:[%s4392_s21 + $0x28] sm:$0xff]  ;;  %v6570_v39 = vpop.permute.xlu0 %1974  ;;  %v6572_v40 = vpop.permute.xlu2 %1965 }
 0x24c   : > { %v1594_v16 = vadd.f32 %v1530_v24, %v1274_v26  ;;  %v1847_v58 = vsel %vm1719_vm6, %v1785_v20, 0.0  ;;  %v1848_v13 = vsel %vm1720_vm1, %v1785_v20, 0.0  ;;  %v1849_v12 = vsel %vm1721_vm10, %v1785_v20, 0.0  ;;  %2088 = vperm.xlu1 %4063, %v6559_v22   ;;  %2303 = vperm.xlu0 %4087, %v2268_v27   ;;  %9207 = vst [vmem:[#allocation63_spill] sm:$0xff] %v6570_v39  ;;  %v9209_v24 = vld [vmem:[#allocation47_spill] sm:$0xff] }
 0x24d   : > { %v1850_v62 = vsel %vm1722_vm0, %v1785_v20, 0.0  ;;  %v6562_v9 = vadd.f32 %v1847_v58, %v1591_v2  ;;  %v6564_v43 = vadd.f32 %v1848_v13, %v1592_v8  ;;  %v6566_v26 = vadd.f32 %v1849_v12, %v1593_v61  ;;  %9208 = vst [vmem:[#allocation43_spill] sm:$0xff] %v6572_v40  ;;  %v9210_v20 = vld [vmem:[#allocation106_spill] sm:$0xff]  ;;  %v9215_v2 = vld [vmem:[#allocation56_spill] sm:$0xff]  ;;  %v9216_v61 = vld [vmem:[#allocation93_spill] sm:$0xff] }
 0x24e   : > { %v6568_v6 = vadd.f32 %v1850_v62, %v1594_v16  ;;  %v1284_v11 = vadd.f32 %v1220_v57, %v9209_v24  ;;  %v1285_v21 = vadd.f32 %v1221_v15, %v9210_v20  ;;  %v1286_v33 = vadd.f32 %v1222_v44, %v9211_v49  ;;  %v9213_v57 = vld [vmem:[#allocation34_spill] sm:$0xff] }
 0x24f   : > { %9203 = vst [vmem:[#allocation80_spill] sm:$0xff] %v6562_v9  ;;  %v1231_v13 = vsel %vm1103_vm9, %v9212_v60, 0.0  ;;  %vm1050_vm8 = vcmp.eq.s32.totalorder %v4812_v18, %v9202_v32  ;;  %v1232_v62 = vsel %vm1104_vm15, %v9212_v60, 0.0  ;;  %v1233_v12 = vsel %vm1105_vm5, %v9212_v60, 0.0  ;;  %v9260_v40 = vld [vmem:[#allocation94_spill] sm:$0xff] }
 0x250   : > { %9204 = vst [vmem:[#allocation87_spill] sm:$0xff] %v6564_v43  ;;  %v1234_v49 = vsel %vm1106_vm7, %v9212_v60, 0.0  ;;  %v1539_v15 = vsel %vm1411_vm14, %v9213_v57, 0.0  ;;  %v1540_v44 = vsel %vm1412_vm4, %v9213_v57, 0.0  ;;  %v1541_v27 = vsel %vm1413_vm2, %v9213_v57, 0.0 }
 0x251   : > { %9205 = vst [vmem:[#allocation111_spill] sm:$0xff] %v6566_v26  ;;  %v1542_v60 = vsel %vm1414_vm12, %v9213_v57, 0.0  ;;  %vm1731_vm9 = vcmp.eq.s32.totalorder %v4802_v28, %v9214_v25  ;;  %4064 = vset.pattern.permute.xlu2 %v9176_v23  ;;  %vm1059_vm15 = vcmp.eq.s32.totalorder %v4802_v28, %v9215_v2  ;;  %vm1060_vm5 = vcmp.eq.s32.totalorder %v4805_v19, %v9215_v2  ;;  %v1797_v16 = vpop.permute.xlu1 %1796 }
 0x252   : > { %9206 = vst [vmem:[#allocation45_spill] sm:$0xff] %v6568_v6  ;;  %vm1732_vm7 = vcmp.eq.s32.totalorder %v4805_v19, %v9214_v25  ;;  %vm1733_vm6 = vcmp.eq.s32.totalorder %v4809_v38, %v9214_v25  ;;  %vm1734_vm1 = vcmp.eq.s32.totalorder %v4812_v18, %v9214_v25  ;;  %2436 = vperm.xlu2 %4064, %v6297_v53   ;;  %v2271_v8 = vadd.s32 384, %v4128_v35  ;;  %v9225_v25 = vld [vmem:[#allocation13_spill] sm:$0xff] }
 0x253   : > { %vm1423_vm10 = vcmp.eq.s32.totalorder %v4802_v28, %v9216_v61  ;;  %vm1424_vm0 = vcmp.eq.s32.totalorder %v4805_v19, %v9216_v61  ;;  %vm1425_vm14 = vcmp.eq.s32.totalorder %v4809_v38, %v9216_v61  ;;  %vm1426_vm4 = vcmp.eq.s32.totalorder %v4812_v18, %v9216_v61 }
 0x254   : > { %v1603_v58 = vadd.f32 %v1539_v15, %v6501_v55  ;;  %v1604_v24 = vadd.f32 %v1540_v44, %v1284_v11  ;;  %v1605_v20 = vadd.f32 %v1541_v27, %v1285_v21  ;;  %v1606_v57 = vadd.f32 %v1542_v60, %v1286_v33  ;;  %4065 = vset.pattern.permute.xlu1 %v9176_v23  ;;  %v6658_v15 = vpop.permute.xlu0 %1983  ;;  %v6660_v44 = vpop.permute.xlu2 %1971  ;;  %v9223_v27 = vld [vmem:[#allocation61_spill] sm:$0xff] }
 0x255   : > { %v1859_v35 = vsel %vm1731_vm9, %v1797_v16, 0.0  ;;  %v1860_v39 = vsel %vm1732_vm7, %v1797_v16, 0.0  ;;  %v1861_v42 = vsel %vm1733_vm6, %v1797_v16, 0.0  ;;  %v1862_v0 = vsel %vm1734_vm1, %v1797_v16, 0.0  ;;  %2312 = vperm.xlu0 %4087, %v2271_v8   ;;  %9221 = vst [vmem:[#allocation48_spill] sm:$0xff] %v6658_v15  ;;  %2440 = vperm.xlu1 %4065, %v6328_v47   ;;  %v9226_v16 = vld [vmem:[#allocation15_spill] sm:$0xff] }
 0x256   : > { %vm1061_vm2 = vcmp.eq.s32.totalorder %v4809_v38, %v9215_v2  ;;  %v6650_v33 = vadd.f32 %v1859_v35, %v1603_v58  ;;  %v6652_v21 = vadd.f32 %v1860_v39, %v1604_v24  ;;  %v6654_v55 = vadd.f32 %v1861_v42, %v1605_v20  ;;  %9222 = vst [vmem:[#allocation50_spill] sm:$0xff] %v6660_v44  ;;  %v9224_v39 = vld [vmem:[#allocation44_spill] sm:$0xff]  ;;  %v9229_v44 = vld [vmem:[#allocation107_spill] sm:$0xff] }
 0x257   : > { %v6656_v11 = vadd.f32 %v1862_v0, %v1606_v57  ;;  %vm1062_vm12 = vcmp.eq.s32.totalorder %v4812_v18, %v9215_v2  ;;  %v1175_v60 = vsel %vm1047_vm11, %v9223_v27, 0.0  ;;  %v1176_v42 = vsel %vm1048_vm3, %v9223_v27, 0.0  ;;  %v9227_v24 = vld [vmem:[#allocation104_spill] sm:$0xff]  ;;  %v9228_v57 = vld [vmem:[#allocation105_spill] sm:$0xff] }
 0x258   : > { %9217 = vst [vmem:[#allocation10_spill] sm:$0xff] %v6650_v33  ;;  %v1177_v0 = vsel %vm1049_vm13, %v9223_v27, 0.0  ;;  %vm1043_vm9 = vcmp.eq.s32.totalorder %v4802_v28, %v9224_v39  ;;  %vm1044_vm7 = vcmp.eq.s32.totalorder %v4805_v19, %v9224_v39  ;;  %v1295_v8 = vadd.f32 %v1231_v13, %v9225_v25  ;;  %v9243_v2 = vld [vmem:[#allocation68_spill] sm:$0xff] }
 0x259   : > { %9218 = vst [vmem:[#allocation12_spill] sm:$0xff] %v6652_v21  ;;  %v1296_v58 = vadd.f32 %v1232_v62, %v9226_v16  ;;  %v1297_v20 = vadd.f32 %v1233_v12, %v9227_v24  ;;  %v1298_v35 = vadd.f32 %v1234_v49, %v9228_v57  ;;  %vm1045_vm11 = vcmp.eq.s32.totalorder %v4809_v38, %v9224_v39  ;;  %v9230_v49 = vld [vmem:[#allocation46_spill] sm:$0xff]  ;;  %v1809_v32 = vpop.permute.xlu1 %1808 }
 0x25a   : > { %9219 = vst [vmem:[#allocation16_spill] sm:$0xff] %v6654_v55  ;;  %vm1046_vm3 = vcmp.eq.s32.totalorder %v4812_v18, %v9224_v39  ;;  %v1552_v13 = vsel %vm1424_vm0, %v9229_v44, 0.0  ;;  %v1553_v62 = vsel %vm1425_vm14, %v9229_v44, 0.0  ;;  %v1554_v12 = vsel %vm1426_vm4, %v9229_v44, 0.0  ;;  %4066 = vset.pattern.permute.xlu2 %v9198_v63  ;;  %v6730_v24 = vld [vmem:[%s4325_s18 + $0x20] sm:$0xff] }
 0x25b   : > { %9220 = vst [vmem:[#allocation39_spill] sm:$0xff] %v6656_v11  ;;  %v1551_v11 = vsel %vm1423_vm10, %v9229_v44, 0.0  ;;  %vm1055_vm13 = vcmp.eq.s32.totalorder %v4802_v28, %v9230_v49  ;;  %vm1743_vm6 = vcmp.eq.s32.totalorder %v4802_v28, %v6002_v54  ;;  %vm1744_vm1 = vcmp.eq.s32.totalorder %v4805_v19, %v6002_v54  ;;  %v9231_v44 = vld [vmem:[#allocation64_spill] sm:$0xff]  ;;  %2740 = vperm.xlu2 %4066, %v5791_v50   ;;  %v9248_v39 = vld [vmem:[#allocation117_spill] sm:$0xff] }
 0x25c   : > { %vm1745_vm10 = vcmp.eq.s32.totalorder %v4809_v38, %v6002_v54  ;;  %vm1746_vm0 = vcmp.eq.s32.totalorder %v4812_v18, %v6002_v54  ;;  %v1178_v61 = vsel %vm1050_vm8, %v9223_v27, 0.0  ;;  %v1187_v25 = vsel %vm1059_vm15, %v9231_v44, 0.0  ;;  %v9237_v54 = vld [vmem:[#allocation24_spill] sm:$0xff] }
 0x25d   : > { %v1188_v16 = vsel %vm1060_vm5, %v9231_v44, 0.0  ;;  %v2263_v57 = vadd.s32 384, %v6730_v24  ;;  %vm1056_vm14 = vcmp.eq.s32.totalorder %v4805_v19, %v9230_v49  ;;  %vm1057_vm8 = vcmp.eq.s32.totalorder %v4809_v38, %v9230_v49  ;;  %2408 = vperm.xlu0 %4087, %v6559_v22  }
 0x25e   : > { %v1615_v27 = vadd.f32 %v1551_v11, %v1295_v8  ;;  %v1616_v55 = vadd.f32 %v1552_v13, %v1296_v58  ;;  %v1617_v21 = vadd.f32 %v1553_v62, %v1297_v20  ;;  %v1618_v33 = vadd.f32 %v1554_v12, %v1298_v35  ;;  %v6758_v35 = vpop.permute.xlu0 %1992  ;;  %v6760_v13 = vpop.permute.xlu2 %1980  ;;  %v9240_v12 = vld [vmem:[#allocation32_spill] sm:$0xff] }
 0x25f   : > { %v1871_v6 = vsel %vm1743_vm6, %v1809_v32, 0.0  ;;  %v1872_v50 = vsel %vm1744_vm1, %v1809_v32, 0.0  ;;  %v1873_v26 = vsel %vm1745_vm10, %v1809_v32, 0.0  ;;  %v1874_v43 = vsel %vm1746_vm0, %v1809_v32, 0.0  ;;  %9236 = vst [vmem:[#allocation11_spill] sm:$0xff] %v6758_v35  ;;  %2288 = vperm.xlu1 %4065, %v2263_v57   ;;  %v9245_v57 = vld [vmem:[#allocation36_spill] sm:$0xff] }
 0x260   : > { %v6749_v11 = vadd.f32 %v1871_v6, %v1615_v27  ;;  %v6751_v8 = vadd.f32 %v1872_v50, %v1616_v55  ;;  %v6753_v58 = vadd.f32 %v1873_v26, %v1617_v21  ;;  %v6755_v20 = vadd.f32 %v1874_v43, %v1618_v33  ;;  %v9238_v6 = vld [vmem:[#allocation29_spill] sm:$0xff]  ;;  %v9239_v21 = vld [vmem:[#allocation14_spill] sm:$0xff] }
 0x261   : > { %vm1058_vm15 = vcmp.eq.s32.totalorder %v4812_v18, %v9230_v49  ;;  %v6765_v62 = vadd.f32 %v1175_v60, %v9237_v54  ;;  %v1189_v26 = vsel %vm1061_vm2, %v9231_v44, 0.0  ;;  %v1190_v43 = vsel %vm1062_vm12, %v9231_v44, 0.0  ;;  %v6783_v60 = vld [vmem:[%s4325_s18 + $0x28] sm:$0xff]  ;;  %v9241_v50 = vld [vmem:[#allocation17_spill] sm:$0xff] }
 0x262   : > { %9232 = vst [vmem:[#allocation90_spill] sm:$0xff] %v6749_v11  ;;  %v1240_v33 = vadd.f32 %v1176_v42, %v9238_v6  ;;  %v6777_v55 = vadd.f32 %v1177_v0, %v9239_v21  ;;  %v6780_v32 = vadd.f32 %v1178_v61, %v9240_v12  ;;  %v2264_v27 = vadd.s32 384, %v6783_v60  ;;  %v9244_v61 = vld [vmem:[#allocation116_spill] sm:$0xff]  ;;  %v9249_v12 = vld [vmem:[#allocation37_spill] sm:$0xff] }
 0x263   : > { %9233 = vst [vmem:[#allocation51_spill] sm:$0xff] %v6751_v8  ;;  %v6787_v54 = vadd.f32 %v1187_v25, %v9241_v50  ;;  %v1171_v42 = vsel %vm1043_vm9, %v9243_v2, 0.0  ;;  %v1172_v0 = vsel %vm1044_vm7, %v9243_v2, 0.0  ;;  %v6801_v44 = vadd.f32 %v1189_v26, %v9244_v61  ;;  %v9247_v26 = vld [vmem:[#allocation71_spill] sm:$0xff]  ;;  %4067 = vset.pattern.permute.xlu2 %v9176_v23  ;;  %v9250_v61 = vld [vmem:[#allocation28_spill] sm:$0xff]  ;;  %v9251_v8 = vld [vmem:[#allocation118_spill] sm:$0xff] }
 0x264   : > { %9234 = vst [vmem:[#allocation47_spill] sm:$0xff] %v6753_v58  ;;  %v6804_v6 = vadd.f32 %v1190_v43, %v9245_v57  ;;  %v1173_v25 = vsel %vm1045_vm11, %v9243_v2, 0.0  ;;  %v1183_v43 = vsel %vm1055_vm13, %v9247_v26, 0.0  ;;  %v6828_v21 = vadd.f32 %v1171_v42, %v9248_v39  ;;  %2291 = vperm.xlu2 %4067, %v2264_v27   ;;  %v9252_v27 = vld [vmem:[#allocation20_spill] sm:$0xff] }
 0x265   : > { %9235 = vst [vmem:[#allocation106_spill] sm:$0xff] %v6755_v20  ;;  %v9242_v20 = vld [vmem:[#allocation25_spill] sm:$0xff]  ;;  %v6831_v50 = vadd.f32 %v1172_v0, %v9249_v12  ;;  %v6835_v57 = vadd.f32 %v1173_v25, %v9250_v61  ;;  %v1184_v35 = vsel %vm1056_vm14, %v9247_v26, 0.0  ;;  %v1185_v42 = vsel %vm1057_vm8, %v9247_v26, 0.0  ;;  %v1963_v0 = vpop.permute.xlu1 %1962 }
 0x266   : > { %v6790_v58 = vadd.f32 %v1188_v16, %v9242_v20  ;;  %v1174_v16 = vsel %vm1046_vm3, %v9243_v2, 0.0  ;;  %v9246_v20 = vld [vmem:[#allocation65_spill] sm:$0xff]  ;;  %v2592_v2 = vadd.s32 448, %v9179_v30  ;;  %v1186_v30 = vsel %vm1058_vm15, %v9247_v26, 0.0  ;;  %v6861_v39 = vpop.permute.xlu2 %1989  ;;  %v9257_v26 = vld [vmem:[#allocation40_spill] sm:$0xff] }
 0x267   : > { %vm1095_vm5 = vcmp.eq.s32.totalorder %v4802_v28, %v9246_v20  ;;  %vm1096_vm4 = vcmp.eq.s32.totalorder %v4805_v19, %v9246_v20  ;;  %vm1097_vm2 = vcmp.eq.s32.totalorder %v4809_v38, %v9246_v20  ;;  %vm1098_vm12 = vcmp.eq.s32.totalorder %v4812_v18, %v9246_v20  ;;  %9255 = vst [vmem:[#allocation34_spill] sm:$0xff] %v6861_v39  ;;  %v9256_v12 = vld [vmem:[#allocation73_spill] sm:$0xff] }
 0x268   : > { %v6838_v11 = vadd.f32 %v1174_v16, %v9251_v8  ;;  %v6853_v25 = vadd.f32 %v1183_v43, %v9252_v27  ;;  %v9253_v8 = vld [vmem:[#allocation81_spill] sm:$0xff]  ;;  %v6859_v16 = vpop.permute.xlu0 %2001  ;;  %v1223_v61 = vsel %vm1095_vm5, %v9256_v12, 0.0  ;;  %v1224_v49 = vsel %vm1096_vm4, %v9256_v12, 0.0  ;;  %4068 = vset.pattern.permute.xlu1 %v9198_v63  ;;  %v9258_v27 = vld [vmem:[#allocation23_spill] sm:$0xff] }
 0x269   : > { %vm1367_vm9 = vcmp.eq.s32.totalorder %v4802_v28, %v9253_v8  ;;  %vm1368_vm7 = vcmp.eq.s32.totalorder %v4805_v19, %v9253_v8  ;;  %9254 = vst [vmem:[#allocation83_spill] sm:$0xff] %v6859_v16  ;;  %vm1369_vm11 = vcmp.eq.s32.totalorder %v4809_v38, %v9253_v8  ;;  %vm1370_vm3 = vcmp.eq.s32.totalorder %v4812_v18, %v9253_v8  ;;  %v9259_v8 = vld [vmem:[#allocation31_spill] sm:$0xff] }
 0x26a   : > { %v6877_v43 = vadd.f32 %v1184_v35, %v9257_v26  ;;  %v6880_v39 = vadd.f32 %v1185_v42, %v9258_v27  ;;  %v1225_v16 = vsel %vm1097_vm2, %v9256_v12, 0.0  ;;  %v1226_v9 = vsel %vm1098_vm12, %v9256_v12, 0.0  ;;  %2635 = vperm.xlu1 %4068, %v2592_v2   ;;  %v9261_v27 = vld [vmem:[#allocation42_spill] sm:$0xff]  ;;  %v9263_v2 = vld [vmem:[#allocation120_spill] sm:$0xff] }
 0x26b   : > { %v6891_v15 = vadd.f32 %v1186_v30, %v9259_v8  ;;  %v1495_v35 = vsel %vm1367_vm9, %v9260_v40, 0.0  ;;  %v1496_v26 = vsel %vm1368_vm7, %v9260_v40, 0.0  ;;  %v2270_v42 = vadd.s32 384, %v5839_v3  ;;  %v9264_v30 = vld [vmem:[#allocation26_spill] sm:$0xff] }
 0x26c   : > { %v6897_v51 = vadd.f32 %v1223_v61, %v9261_v27  ;;  %v6900_v52 = vadd.f32 %v1224_v49, %v9262_v37  ;;  %v1497_v23 = vsel %vm1369_vm11, %v9260_v40, 0.0  ;;  %v1498_v20 = vsel %vm1370_vm3, %v9260_v40, 0.0  ;;  %2404 = vperm.xlu2 %4067, %v6172_v48  }
 0x26d   : > { %v6905_v12 = vadd.f32 %v1225_v16, %v9263_v2  ;;  %v6908_v8 = vadd.f32 %v1226_v9, %v9264_v30  ;;  %vm1379_vm13 = vcmp.eq.s32.totalorder %v4802_v28, %v9265_v10  ;;  %vm1380_vm6 = vcmp.eq.s32.totalorder %v4805_v19, %v9265_v10  ;;  %2309 = vperm.xlu0 %4087, %v2270_v42   ;;  %v9266_v9 = vld [vmem:[#allocation97_spill] sm:$0xff]  ;;  %v6928_v42 = vpop.permute.xlu1 %1968 }
 0x26e   : > { %vm1381_vm1 = vcmp.eq.s32.totalorder %v4809_v38, %v9265_v10  ;;  %vm1382_vm10 = vcmp.eq.s32.totalorder %v4812_v18, %v9265_v10  ;;  %v1559_v3 = vadd.f32 %v1495_v35, %v6765_v62  ;;  %v1560_v37 = vadd.f32 %v1496_v26, %v1240_v33  ;;  %v6934_v62 = vpop.permute.xlu2 %1998  ;;  %v9274_v10 = vld [vmem:[#allocation49_spill] sm:$0xff] }
 0x26f   : > { %v6921_v40 = vsel %vm1379_vm13, %v9266_v9, 0.0  ;;  %v6924_v16 = vsel %vm1380_vm6, %v9266_v9, 0.0  ;;  %v1561_v61 = vadd.f32 %v1497_v23, %v6777_v55  ;;  %v1562_v49 = vadd.f32 %v1498_v20, %v6780_v32  ;;  %9267 = vst [vmem:[#allocation19_spill] sm:$0xff] %v6934_v62 }
 0x270   : > { %vm2011_vm0 = vcmp.eq.s32.totalorder %v4802_v28, %v1963_v0  ;;  %vm2012_vm14 = vcmp.eq.s32.totalorder %v4805_v19, %v1963_v0  ;;  %vm2013_vm8 = vcmp.eq.s32.totalorder %v4809_v38, %v1963_v0  ;;  %vm2014_vm15 = vcmp.eq.s32.totalorder %v4812_v18, %v1963_v0  ;;  %v2077_v48 = vpop.permute.xlu0 %2076 }
 0x271   : > { %v2139_v33 = vsel %vm2011_vm0, %v2077_v48, 0.0  ;;  %v2140_v35 = vsel %vm2012_vm14, %v2077_v48, 0.0  ;;  %v2141_v26 = vsel %vm2013_vm8, %v2077_v48, 0.0  ;;  %v2142_v27 = vsel %vm2014_vm15, %v2077_v48, 0.0 }
 0x272   : > { %v6937_v23 = vadd.f32 %v2139_v33, %v6087_v1  ;;  %v6940_v55 = vadd.f32 %v2140_v35, %v6089_v45  ;;  %v6943_v32 = vadd.f32 %v2141_v26, %v6091_v36  ;;  %v6946_v20 = vadd.f32 %v2142_v27, %v6093_v34  ;;  %2756 = vperm.xlu1 %4068, %v6297_v53   ;;  %v9272_v36 = vld [vmem:[#allocation115_spill] sm:$0xff]  ;;  %v9273_v53 = vld [vmem:[#allocation76_spill] sm:$0xff] }
 0x273   : > { %v1509_v0 = vsel %vm1381_vm1, %v9266_v9, 0.0  ;;  %v1510_v1 = vsel %vm1382_vm10, %v9266_v9, 0.0  ;;  %vm1699_vm5 = vcmp.eq.s32.totalorder %v4802_v28, %v5984_v4  ;;  %vm1700_vm4 = vcmp.eq.s32.totalorder %v4805_v19, %v5984_v4 }
 0x274   : > { %9268 = vst [vmem:[#allocation56_spill] sm:$0xff] %v6937_v23  ;;  %v1879_v45 = vadd.f32 %v6098_v56, %v1559_v3  ;;  %v1880_v34 = vadd.f32 %v9272_v36, %v1560_v37  ;;  %vm1701_vm2 = vcmp.eq.s32.totalorder %v4809_v38, %v5984_v4  ;;  %vm1702_vm12 = vcmp.eq.s32.totalorder %v4812_v18, %v5984_v4  ;;  %v9275_v56 = vld [vmem:[#allocation18_spill] sm:$0xff]  ;;  %v9276_v3 = vld [vmem:[#allocation108_spill] sm:$0xff] }
 0x275   : > { %9269 = vst [vmem:[#allocation93_spill] sm:$0xff] %v6940_v55  ;;  %vm1363_vm9 = vcmp.eq.s32.totalorder %v4802_v28, %v9273_v53  ;;  %vm1364_vm7 = vcmp.eq.s32.totalorder %v4805_v19, %v9273_v53  ;;  %vm1365_vm11 = vcmp.eq.s32.totalorder %v4809_v38, %v9273_v53  ;;  %v1881_v2 = vadd.f32 %v9274_v10, %v1561_v61  ;;  %v6990_v61 = vpop.permute.xlu1 %1977  ;;  %v9321_v55 = vld [vmem:[#allocation39_spill] sm:$0xff] }
 0x276   : > { %9270 = vst [vmem:[#allocation61_spill] sm:$0xff] %v6943_v32  ;;  %v1882_v30 = vadd.f32 %v9275_v56, %v1562_v49  ;;  %v1827_v37 = vsel %vm1699_vm5, %v9276_v3, 0.0  ;;  %v1828_v9 = vsel %vm1700_vm4, %v9276_v3, 0.0  ;;  %v1829_v48 = vsel %vm1701_vm2, %v9276_v3, 0.0  ;;  %4069 = vset.pattern.permute.xlu2 %v9198_v63  ;;  %v2073_v35 = vpop.permute.xlu2 %2072 }
 0x277   : > { %9271 = vst [vmem:[#allocation44_spill] sm:$0xff] %v6946_v20  ;;  %v1830_v4 = vsel %vm1702_vm12, %v9276_v3, 0.0  ;;  %vm2007_vm3 = vcmp.eq.s32.totalorder %v4802_v28, %v6477_v59  ;;  %v2583_v33 = vadd.s32 448, %v6730_v24  ;;  %vm2008_vm13 = vcmp.eq.s32.totalorder %v4805_v19, %v6477_v59  ;;  %2760 = vperm.xlu2 %4069, %v6328_v47   ;;  %v9278_v3 = vld [vmem:[#allocation79_spill] sm:$0xff] }
 0x278   : > { %vm2009_vm6 = vcmp.eq.s32.totalorder %v4809_v38, %v6477_v59  ;;  %vm2010_vm1 = vcmp.eq.s32.totalorder %v4812_v18, %v6477_v59  ;;  %9277 = vst [vmem:[#allocation13_spill] sm:$0xff] %v6990_v61  ;;  %v2584_v49 = vadd.s32 448, %v6783_v60  ;;  %vm2035_vm10 = vcmp.eq.s32.totalorder %v4802_v28, %v6760_v13  ;;  %v2101_v24 = vpop.permute.xlu0 %2100  ;;  %v9283_v59 = vld [vmem:[#allocation101_spill] sm:$0xff]  ;;  %v9331_v61 = vld [vmem:[#allocation50_spill] sm:$0xff] }
 0x279   : > { %vm2036_vm0 = vcmp.eq.s32.totalorder %v4805_v19, %v6760_v13  ;;  %vm2037_vm14 = vcmp.eq.s32.totalorder %v4809_v38, %v6760_v13  ;;  %vm2038_vm8 = vcmp.eq.s32.totalorder %v4812_v18, %v6760_v13  ;;  %v2163_v26 = vsel %vm2035_vm10, %v2101_v24, 0.0 }
 0x27a   : > { %v2164_v47 = vsel %vm2036_vm0, %v2101_v24, 0.0  ;;  %v2165_v27 = vsel %vm2037_vm14, %v2101_v24, 0.0  ;;  %v2166_v36 = vsel %vm2038_vm8, %v2101_v24, 0.0  ;;  %vm1366_vm15 = vcmp.eq.s32.totalorder %v4812_v18, %v9273_v53  ;;  %2608 = vperm.xlu1 %4068, %v2583_v33  }
 0x27b   : > { %v7004_v60 = vadd.f32 %v2163_v26, %v6252_v5  ;;  %v7007_v10 = vadd.f32 %v2164_v47, %v6254_v46  ;;  %v7010_v56 = vadd.f32 %v2165_v27, %v6256_v31  ;;  %v7013_v13 = vadd.f32 %v2166_v36, %v6258_v14 }
 0x27c   : > { %vm1375_vm5 = vcmp.eq.s32.totalorder %v4802_v28, %v9278_v3  ;;  %vm1376_vm4 = vcmp.eq.s32.totalorder %v4805_v19, %v9278_v3  ;;  %vm1377_vm2 = vcmp.eq.s32.totalorder %v4809_v38, %v9278_v3  ;;  %v2135_v5 = vsel %vm2007_vm3, %v2073_v35, 0.0 }
 0x27d   : > { %v2136_v46 = vsel %vm2008_vm13, %v2073_v35, 0.0  ;;  %v2137_v31 = vsel %vm2009_vm6, %v2073_v35, 0.0  ;;  %v2138_v14 = vsel %vm2010_vm1, %v2073_v35, 0.0  ;;  %v7033_v33 = vadd.f32 %v2135_v5, %v1879_v45  ;;  %v9286_v35 = vld [vmem:[#allocation22_spill] sm:$0xff] }
 0x27e   : > { %v7035_v24 = vadd.f32 %v2136_v46, %v1880_v34  ;;  %v7037_v26 = vadd.f32 %v2137_v31, %v1881_v2  ;;  %v7039_v47 = vadd.f32 %v2138_v14, %v1882_v30  ;;  %v1571_v27 = vadd.f32 %v6921_v40, %v6787_v54 }
 0x27f   : > { %9279 = vst [vmem:[#allocation15_spill] sm:$0xff] %v7033_v33  ;;  %v1572_v36 = vadd.f32 %v6924_v16, %v6790_v58  ;;  %v1573_v20 = vadd.f32 %v1509_v0, %v6801_v44  ;;  %v1574_v32 = vadd.f32 %v1510_v1, %v6804_v6  ;;  %vm1378_vm12 = vcmp.eq.s32.totalorder %v4812_v18, %v9278_v3  ;;  %v7061_v0 = vpop.permute.xlu1 %1986  ;;  %v2085_v1 = vpop.permute.xlu2 %2084 }
 0x280   : > { %9280 = vst [vmem:[#allocation104_spill] sm:$0xff] %v7035_v24  ;;  %v1491_v45 = vsel %vm1363_vm9, %v9283_v59, 0.0  ;;  %v1492_v54 = vsel %vm1364_vm7, %v9283_v59, 0.0  ;;  %v1493_v58 = vsel %vm1365_vm11, %v9283_v59, 0.0  ;;  %v1891_v44 = vadd.f32 %v1827_v37, %v1571_v27  ;;  %2611 = vperm.xlu2 %4069, %v2584_v49   ;;  %v7071_v30 = vpop.permute.xlu0 %2623  ;;  %v9285_v49 = vld [vmem:[#allocation98_spill] sm:$0xff]  ;;  %v7385_v24 = vld [vmem:[%s4392_s21 + $0x38] sm:$0xff] }
 0x281   : > { %9281 = vst [vmem:[#allocation105_spill] sm:$0xff] %v7037_v26  ;;  %v1892_v6 = vadd.f32 %v1828_v9, %v1572_v36  ;;  %v1893_v40 = vadd.f32 %v1829_v48, %v1573_v20  ;;  %v1894_v16 = vadd.f32 %v1830_v4, %v1574_v32  ;;  %vm2019_vm9 = vcmp.eq.s32.totalorder %v4802_v28, %v6928_v42  ;;  %v9287_v36 = vld [vmem:[#allocation113_spill] sm:$0xff] }
 0x282   : > { %9282 = vst [vmem:[#allocation107_spill] sm:$0xff] %v7039_v47  ;;  %vm2020_vm3 = vcmp.eq.s32.totalorder %v4805_v19, %v6928_v42  ;;  %vm2021_vm7 = vcmp.eq.s32.totalorder %v4809_v38, %v6928_v42  ;;  %vm2022_vm13 = vcmp.eq.s32.totalorder %v4812_v18, %v6928_v42  ;;  %v2147_v34 = vsel %vm2019_vm9, %v2085_v1, 0.0  ;;  %2728 = vperm.xlu1 %4068, %v6559_v22  }
 0x283   : > { %v2148_v2 = vsel %vm2020_vm3, %v2085_v1, 0.0  ;;  %v2149_v20 = vsel %vm2021_vm7, %v2085_v1, 0.0  ;;  %v2150_v32 = vsel %vm2022_vm13, %v2085_v1, 0.0  ;;  %v7073_v37 = vadd.f32 %v2147_v34, %v1891_v44 }
 0x284   : > { %v7075_v9 = vadd.f32 %v2148_v2, %v1892_v6  ;;  %v7077_v48 = vadd.f32 %v2149_v20, %v1893_v40  ;;  %v7079_v4 = vadd.f32 %v2150_v32, %v1894_v16  ;;  %vm1415_vm11 = vcmp.eq.s32.totalorder %v4802_v28, %v9285_v49 }
 0x285   : > { %9284 = vst [vmem:[#allocation46_spill] sm:$0xff] %v7073_v37  ;;  %vm1416_vm6 = vcmp.eq.s32.totalorder %v4805_v19, %v9285_v49  ;;  %vm1417_vm1 = vcmp.eq.s32.totalorder %v4809_v38, %v9285_v49  ;;  %v1494_v42 = vsel %vm1366_vm15, %v9283_v59, 0.0  ;;  %vm1418_vm10 = vcmp.eq.s32.totalorder %v4812_v18, %v9285_v49 }
 0x286   : > { %v1503_v22 = vsel %vm1375_vm5, %v9286_v35, 0.0  ;;  %v1504_v5 = vsel %vm1376_vm4, %v9286_v35, 0.0  ;;  %v1505_v46 = vsel %vm1377_vm2, %v9286_v35, 0.0  ;;  %v1506_v53 = vsel %vm1378_vm12, %v9286_v35, 0.0 }
 0x287   : > { %v1555_v31 = vadd.f32 %v1491_v45, %v6828_v21  ;;  %v1556_v14 = vadd.f32 %v1492_v54, %v6831_v50  ;;  %v1557_v27 = vadd.f32 %v1493_v58, %v6835_v57  ;;  %v1543_v59 = vsel %vm1415_vm11, %v9287_v36, 0.0  ;;  %v7126_v50 = vpop.permute.xlu1 %1995  ;;  %v9288_v57 = vld [vmem:[#allocation33_spill] sm:$0xff]  ;;  %v7151_v32 = vpop.permute.xlu2 %2300 }
 0x288   : > { %v1544_v44 = vsel %vm1416_vm6, %v9287_v36, 0.0  ;;  %v1545_v6 = vsel %vm1417_vm1, %v9287_v36, 0.0  ;;  %v1558_v40 = vadd.f32 %v1494_v42, %v6838_v11  ;;  %v1546_v16 = vsel %vm1418_vm10, %v9287_v36, 0.0  ;;  %4070 = vset.pattern.permute.xlu2 %v9040_v7  ;;  %v9291_v54 = vld [vmem:[#allocation41_spill] sm:$0xff]  ;;  %v7144_v58 = vpop.permute.xlu0 %2744 }
 0x289   : > { %v1567_v1 = vadd.f32 %v1503_v22, %v6853_v25  ;;  %v7120_v3 = vadd.f32 %v1504_v5, %v6877_v43  ;;  %v7123_v21 = vadd.f32 %v1505_v46, %v6880_v39  ;;  %vm1683_vm0 = vcmp.eq.s32.totalorder %v4802_v28, %v9288_v57  ;;  %v9289_v25 = vld [vmem:[#allocation66_spill] sm:$0xff]  ;;  %v9290_v39 = vld [vmem:[#allocation55_spill] sm:$0xff]  ;;  %v7159_v22 = vld [vmem:[%s4392_s21 + $0x58] sm:$0xff] }
 0x28a   : > { %vm1684_vm14 = vcmp.eq.s32.totalorder %v4805_v19, %v9288_v57  ;;  %vm1685_vm8 = vcmp.eq.s32.totalorder %v4809_v38, %v9288_v57  ;;  %v7135_v11 = vadd.f32 %v1506_v53, %v6891_v15  ;;  %2108 = vperm.xlu2 %4070, %v9289_v25   ;;  %vm1686_vm15 = vcmp.eq.s32.totalorder %v4812_v18, %v9288_v57 }
 0x28b   : > { %v1811_v43 = vsel %vm1683_vm0, %v9290_v39, 0.0  ;;  %v1812_v45 = vsel %vm1684_vm14, %v9290_v39, 0.0  ;;  %vm1695_vm5 = vcmp.eq.s32.totalorder %v4802_v28, %v9291_v54  ;;  %v1813_v34 = vsel %vm1685_vm8, %v9290_v39, 0.0  ;;  %4071 = vset.pattern.permute.xlu1 %v9040_v7 }
 0x28c   : > { %v1814_v15 = vsel %vm1686_vm15, %v9290_v39, 0.0  ;;  %v1823_v2 = vsel %vm1695_vm5, %v6381_v29, 0.0  ;;  %v1607_v20 = vadd.f32 %v1543_v59, %v6897_v51  ;;  %vm1696_vm4 = vcmp.eq.s32.totalorder %v4805_v19, %v9291_v54  ;;  %2112 = vperm.xlu1 %4071, %v7159_v22   ;;  %v9292_v59 = vld [vmem:[#allocation91_spill] sm:$0xff] }
 0x28d   : > { %v1608_v49 = vadd.f32 %v1544_v44, %v6900_v52  ;;  %v1609_v42 = vadd.f32 %v1545_v6, %v6905_v12  ;;  %v1610_v35 = vadd.f32 %v1546_v16, %v6908_v8  ;;  %v1875_v5 = vadd.f32 %v1811_v43, %v1555_v31  ;;  %v3935_v52 = vld [vmem:[%s8707_s2 + $0x38] sm:$0xff]  ;;  %v7172_v8 = vld [vmem:[%s4325_s18 + $0x50] sm:$0xff] }
 0x28e   : > { %v1876_v51 = vadd.f32 %v1812_v45, %v1556_v14  ;;  %vm1697_vm2 = vcmp.eq.s32.totalorder %v4809_v38, %v9291_v54  ;;  %vm1698_vm12 = vcmp.eq.s32.totalorder %v4812_v18, %v9291_v54  ;;  %v1877_v46 = vadd.f32 %v1813_v34, %v1557_v27  ;;  %3969 = vmatpush.bf16.msra.mxu2 %v3935_v52  ;;  %v3934_v44 = vld [vmem:[%s8707_s2 + $0x30] sm:$0xff] }
 0x28f   : > { %v1878_v12 = vadd.f32 %v1814_v15, %v1558_v40  ;;  %v7169_v53 = vadd.f32 %v1823_v2, %v1567_v1  ;;  %v2269_v36 = vadd.s32 384, %v7172_v8  ;;  %v1927_v31 = vadd.f32 %v6421_v41, %v1607_v20  ;;  %3970 = vmatpush.bf16.msra.mxu3 %v3935_v52  ;;  %3968 = vmatpush.bf16.msra.mxu1 %v3935_v52  ;;  %v9299_v15 = vld [vmem:[#allocation85_spill] sm:$0xff]  ;;  %v9300_v20 = vld [vmem:[#allocation102_spill] sm:$0xff] }
 0x290   : > { %v1928_v14 = vadd.f32 %v6423_v17, %v1608_v49  ;;  %vm2003_vm9 = vcmp.eq.s32.totalorder %v4802_v28, %v9292_v59  ;;  %v1824_v27 = vsel %vm1696_vm4, %v6381_v29, 0.0  ;;  %vm2004_vm3 = vcmp.eq.s32.totalorder %v4805_v19, %v9292_v59  ;;  %v2069_v17 = vpop.permute.xlu1 %2068  ;;  %3187 = vmatpush.bf16.msra.mxu0 %v3935_v52  ;;  %v7201_v45 = vpop.permute.xlu0 %2632 }
 0x291   : > { %vm2005_vm7 = vcmp.eq.s32.totalorder %v4809_v38, %v9292_v59  ;;  %vm2006_vm13 = vcmp.eq.s32.totalorder %v4812_v18, %v9292_v59  ;;  %v9293_v41 = vmov 6   ;;  %v2131_v6 = vsel %vm2003_vm9, %v2069_v17, 0.0  ;;  %9298 = vst [vmem:[#allocation32_spill] sm:$0xff] %v7201_v45 }
 0x292   : > { %4072 = vset.pattern.permute.xlu2 %v9293_v41  ;;  %v2132_v40 = vsel %vm2004_vm3, %v2069_v17, 0.0  ;;  %v2133_v16 = vsel %vm2005_vm7, %v2069_v17, 0.0  ;;  %v2134_v1 = vsel %vm2006_vm13, %v2069_v17, 0.0  ;;  %v7193_v57 = vadd.f32 %v2131_v6, %v1875_v5  ;;  %3972 = vmatpush.bf16.msra.mxu2 %v3934_v44 }
 0x293   : > { %v7195_v25 = vadd.f32 %v2132_v40, %v1876_v51  ;;  %v7197_v39 = vadd.f32 %v2133_v16, %v1877_v46  ;;  %v7199_v43 = vadd.f32 %v2134_v1, %v1878_v12  ;;  %2306 = vperm.xlu2 %4072, %v2269_v36   ;;  %v1825_v34 = vsel %vm1697_vm2, %v6381_v29, 0.0  ;;  %3973 = vmatpush.bf16.msra.mxu3 %v3934_v44  ;;  %v7237_v16 = vld [vmem:[%s4325_s18 + $0x70] sm:$0xff] }
 0x294   : > { %9294 = vst [vmem:[#allocation64_spill] sm:$0xff] %v7193_v57  ;;  %v1929_v2 = vadd.f32 %v9299_v15, %v1609_v42  ;;  %v1930_v49 = vadd.f32 %v9300_v20, %v1610_v35  ;;  %vm2055_vm11 = vcmp.eq.s32.totalorder %v4802_v28, %v7126_v50  ;;  %v1826_v5 = vsel %vm1698_vm12, %v6381_v29, 0.0  ;;  %v2121_v42 = vpop.permute.xlu2 %2120  ;;  %v9301_v35 = vld [vmem:[#allocation77_spill] sm:$0xff]  ;;  %3971 = vmatpush.bf16.msra.mxu1 %v3934_v44  ;;  %v3933_v29 = vld [vmem:[%s8707_s2 + $0x28] sm:$0xff] }
 0x295   : > { %9295 = vst [vmem:[#allocation24_spill] sm:$0xff] %v7195_v25  ;;  %vm2056_vm6 = vcmp.eq.s32.totalorder %v4805_v19, %v7126_v50  ;;  %vm2057_vm1 = vcmp.eq.s32.totalorder %v4809_v38, %v7126_v50  ;;  %vm2058_vm10 = vcmp.eq.s32.totalorder %v4812_v18, %v7126_v50  ;;  %2124 = vperm.xlu1 %4071, %v9301_v35   ;;  %v2183_v51 = vsel %vm2055_vm11, %v2121_v42, 0.0 }
 0x296   : > { %9296 = vst [vmem:[#allocation29_spill] sm:$0xff] %v7197_v39  ;;  %v2184_v52 = vsel %vm2056_vm6, %v2121_v42, 0.0  ;;  %v2185_v46 = vsel %vm2057_vm1, %v2121_v42, 0.0  ;;  %v2186_v12 = vsel %vm2058_vm10, %v2121_v42, 0.0  ;;  %3188 = vmatpush.bf16.msra.mxu0 %v3934_v44  ;;  %v7225_v54 = vadd.f32 %v2183_v51, %v1927_v31  ;;  %3975 = vmatpush.bf16.msra.mxu2 %v3933_v29  ;;  %v9303_v31 = vld [vmem:[#allocation43_spill] sm:$0xff]  ;;  %v9309_v51 = vld [vmem:[#allocation48_spill] sm:$0xff] }
 0x297   : > { %9297 = vst [vmem:[#allocation14_spill] sm:$0xff] %v7199_v43  ;;  %v7227_v36 = vadd.f32 %v2184_v52, %v1928_v14  ;;  %v7229_v59 = vadd.f32 %v2185_v46, %v1929_v2  ;;  %v7231_v50 = vadd.f32 %v2186_v12, %v1930_v49  ;;  %v1888_v17 = vadd.f32 %v1824_v27, %v7120_v3  ;;  %v4135_v42 = vld [vmem:[%s4392_s21 + $0x50] sm:$0xff]  ;;  %v7283_v52 = vld [vmem:[%s4325_s18 + $0x38] sm:$0xff] }
 0x298   : > { %9302 = vst [vmem:[#allocation17_spill] sm:$0xff] %v7225_v54  ;;  %v1889_v6 = vadd.f32 %v1825_v34, %v7123_v21  ;;  %v1890_v40 = vadd.f32 %v1826_v5, %v7135_v11  ;;  %v2273_v1 = vadd.s32 384, %v7237_v16  ;;  %3976 = vmatpush.bf16.msra.mxu3 %v3933_v29  ;;  %vm2015_vm0 = vcmp.eq.s32.totalorder %v4802_v28, %v9303_v31  ;;  %v2081_v3 = vpop.permute.xlu1 %2080  ;;  %v3932_v21 = vld [vmem:[%s8707_s2 + $0x20] sm:$0xff]  ;;  %v7261_v49 = vpop.permute.xlu0 %2724  ;;  %v7264_v5 = vld [vmem:[%s4392_s21 + $0x78] sm:$0xff] }
 0x299   : > { %vm2016_vm14 = vcmp.eq.s32.totalorder %v4805_v19, %v9303_v31  ;;  %vm2017_vm8 = vcmp.eq.s32.totalorder %v4809_v38, %v9303_v31  ;;  %vm2018_vm15 = vcmp.eq.s32.totalorder %v4812_v18, %v9303_v31  ;;  %3974 = vmatpush.bf16.msra.mxu1 %v3933_v29  ;;  %v2143_v11 = vsel %vm2015_vm0, %v2081_v3, 0.0  ;;  %9308 = vst [vmem:[#allocation65_spill] sm:$0xff] %v7261_v49  ;;  %v9333_v54 = vld [vmem:[#allocation110_spill] sm:$0xff] }
 0x29a   : > { %v2144_v14 = vsel %vm2016_vm14, %v2081_v3, 0.0  ;;  %v2145_v44 = vsel %vm2017_vm8, %v2081_v3, 0.0  ;;  %v2146_v27 = vsel %vm2018_vm15, %v2081_v3, 0.0  ;;  %2318 = vperm.xlu0 %4087, %v2273_v1   ;;  %3189 = vmatpush.bf16.msra.mxu0 %v3933_v29  ;;  %v7252_v34 = vadd.f32 %v2143_v11, %v7169_v53  ;;  %v3931_v53 = vld [vmem:[%s8707_s2 + $0x18] sm:$0xff] }
 0x29b   : > { %v7254_v15 = vadd.f32 %v2144_v14, %v1888_v17  ;;  %v7256_v2 = vadd.f32 %v2145_v44, %v1889_v6  ;;  %v7258_v20 = vadd.f32 %v2146_v27, %v1890_v40  ;;  %4073 = vset.pattern.permute.xlu2 %v9040_v7  ;;  %3978 = vmatpush.bf16.msra.mxu2 %v3932_v21  ;;  %v2266_v46 = vadd.s32 384, %v7283_v52  ;;  %v7287_v29 = vld [vmem:[%s4325_s18 + $0x78] sm:$0xff]  ;;  %v3930_v6 = vld [vmem:[%s8707_s2 + $0x10] sm:$0xff] }
 0x29c   : > { %9304 = vst [vmem:[#allocation25_spill] sm:$0xff] %v7252_v34  ;;  %2128 = vperm.xlu2 %4073, %v7264_v5   ;;  %3979 = vmatpush.bf16.msra.mxu3 %v3932_v21  ;;  %v7272_v35 = vpop.permute.xlu2 %2424  ;;  %vm2039_vm5 = vcmp.eq.s32.totalorder %v4802_v28, %v9309_v51  ;;  %vm2040_vm4 = vcmp.eq.s32.totalorder %v4805_v19, %v9309_v51  ;;  %v2274_v17 = vadd.s32 384, %v7287_v29  ;;  %v9311_v14 = vld [vmem:[#allocation87_spill] sm:$0xff] }
 0x29d   : > { %9305 = vst [vmem:[#allocation68_spill] sm:$0xff] %v7254_v15  ;;  %4074 = vset.pattern.permute.xlu1 %v9293_v41  ;;  %3977 = vmatpush.bf16.msra.mxu1 %v3932_v21  ;;  %vm2041_vm2 = vcmp.eq.s32.totalorder %v4809_v38, %v9309_v51  ;;  %vm2042_vm12 = vcmp.eq.s32.totalorder %v4812_v18, %v9309_v51  ;;  %v9312_v27 = vld [vmem:[#allocation111_spill] sm:$0xff]  ;;  %v9313_v51 = vld [vmem:[#allocation45_spill] sm:$0xff] }
 0x29e   : > { %9306 = vst [vmem:[#allocation116_spill] sm:$0xff] %v7256_v2  ;;  %2428 = vperm.xlu1 %4074, %v4135_v42   ;;  %3190 = vmatpush.bf16.msra.mxu0 %v3932_v21  ;;  %v9310_v21 = vld [vmem:[#allocation80_spill] sm:$0xff]  ;;  %vm2680_vm11 = vcmp.eq.s32.totalorder %v4805_v19, %v7071_v30  ;;  %vm2681_vm6 = vcmp.eq.s32.totalorder %v4809_v38, %v7071_v30 }
 0x29f   : > { %9307 = vst [vmem:[#allocation36_spill] sm:$0xff] %v7258_v20  ;;  %3981 = vmatpush.bf16.msra.mxu2 %v3931_v53  ;;  %vm2682_vm1 = vcmp.eq.s32.totalorder %v4812_v18, %v7071_v30  ;;  %vm2356_vm10 = vcmp.eq.s32.totalorder %v4805_v19, %v7151_v32  ;;  %vm2357_vm0 = vcmp.eq.s32.totalorder %v4809_v38, %v7151_v32 }
 0x2a0   : > { %v2105_v12 = vpop.permute.xlu1 %2104  ;;  %3982 = vmatpush.bf16.msra.mxu3 %v3931_v53  ;;  %v7305_v2 = vpop.permute.xlu0 %2629  ;;  %vm2358_vm14 = vcmp.eq.s32.totalorder %v4812_v18, %v7151_v32 }
 0x2a1   : > { %v2167_v40 = vsel %vm2039_vm5, %v2105_v12, 0.0  ;;  %v2168_v1 = vsel %vm2040_vm4, %v2105_v12, 0.0  ;;  %v2169_v31 = vsel %vm2041_vm2, %v2105_v12, 0.0  ;;  %v2170_v3 = vsel %vm2042_vm12, %v2105_v12, 0.0  ;;  %3980 = vmatpush.bf16.msra.mxu1 %v3931_v53  ;;  %9314 = vst [vmem:[#allocation71_spill] sm:$0xff] %v7305_v2  ;;  %v9315_v12 = vld [vmem:[#allocation11_spill] sm:$0xff] }
 0x2a2   : > { %2297 = vperm.xlu0 %4087, %v2266_v46   ;;  %v7294_v11 = vadd.f32 %v2167_v40, %v9310_v21  ;;  %v7297_v44 = vadd.f32 %v2168_v1, %v9311_v14  ;;  %v7300_v42 = vadd.f32 %v2169_v31, %v9312_v27  ;;  %v7303_v20 = vadd.f32 %v2170_v3, %v9313_v51  ;;  %v3929_v46 = vld [vmem:[%s8707_s2 + $0x8] sm:$0xff]  ;;  %v3928_v1 = vld [vmem:[%s8707_s2] sm:$0xff] }
 0x2a3   : > { %3191 = vmatpush.bf16.msra.mxu0 %v3931_v53  ;;  %3984 = vmatpush.bf16.msra.mxu2 %v3930_v6  ;;  %vm2051_vm9 = vcmp.eq.s32.totalorder %v4802_v28, %v9315_v12  ;;  %vm2052_vm3 = vcmp.eq.s32.totalorder %v4805_v19, %v9315_v12  ;;  %vm2053_vm7 = vcmp.eq.s32.totalorder %v4809_v38, %v9315_v12  ;;  %v2589_v40 = vadd.s32 448, %v7172_v8  ;;  %v7327_v27 = vld [vmem:[%s4392_s21] sm:$0xff]  ;;  %v9320_v8 = vld [vmem:[#allocation16_spill] sm:$0xff] }
 0x2a4   : > { %4075 = vset.pattern.permute.xlu2 %v9293_v41  ;;  %3985 = vmatpush.bf16.msra.mxu3 %v3930_v6  ;;  %vm2054_vm13 = vcmp.eq.s32.totalorder %v4812_v18, %v9315_v12  ;;  %v7320_v53 = vpop.permute.xlu2 %2620  ;;  %9316 = vst [vmem:[#allocation117_spill] sm:$0xff] %v7327_v27  ;;  %v9317_v51 = vld [vmem:[#allocation10_spill] sm:$0xff]  ;;  %v9319_v12 = vld [vmem:[#allocation12_spill] sm:$0xff] }
 0x2a5   : > { %2432 = vperm.xlu2 %4075, %v7159_v22   ;;  %3983 = vmatpush.bf16.msra.mxu1 %v3930_v6  ;;  %vm2676_vm8 = vcmp.eq.s32.totalorder %v4805_v19, %v7320_v53  ;;  %vm2677_vm15 = vcmp.eq.s32.totalorder %v4809_v38, %v7320_v53  ;;  %vm2678_vm5 = vcmp.eq.s32.totalorder %v4812_v18, %v7320_v53 }
 0x2a6   : > { %2321 = vperm.xlu1 %4074, %v2274_v17  }
 0x2a7   : > { %3192 = vmatpush.bf16.msra.mxu0 %v3930_v6  ;;  %3987 = vmatpush.bf16.msra.mxu2 %v3929_v46 }
 0x2a8   : > { %v2117_v17 = vpop.permute.xlu1 %2116  ;;  %3988 = vmatpush.bf16.msra.mxu3 %v3929_v46  ;;  %v7342_v33 = vpop.permute.xlu0 %2748 }
 0x2a9   : > { %v2179_v31 = vsel %vm2051_vm9, %v2117_v17, 0.0  ;;  %v2180_v3 = vsel %vm2052_vm3, %v2117_v17, 0.0  ;;  %v2181_v21 = vsel %vm2053_vm7, %v2117_v17, 0.0  ;;  %v2182_v14 = vsel %vm2054_vm13, %v2117_v17, 0.0  ;;  %3986 = vmatpush.bf16.msra.mxu1 %v3929_v46  ;;  %9322 = vst [vmem:[#allocation28_spill] sm:$0xff] %v7342_v33 }
 0x2aa   : > { %2388 = vperm.xlu0 %4087, %v7327_v27   ;;  %v7331_v6 = vadd.f32 %v2179_v31, %v9317_v51  ;;  %v7334_v15 = vadd.f32 %v2180_v3, %v9319_v12  ;;  %v7337_v34 = vadd.f32 %v2181_v21, %v9320_v8  ;;  %v7340_v23 = vadd.f32 %v2182_v14, %v9321_v55  ;;  %v7362_v31 = vld [vmem:[%s4392_s21 + $0x30] sm:$0xff] }
 0x2ab   : > { %3193 = vmatpush.bf16.msra.mxu0 %v3929_v46  ;;  %3990 = vmatpush.bf16.msra.mxu2 %v3928_v1  ;;  %v7352_v17 = vsel %vm2680_vm11, %v7144_v58, 0.0  ;;  %v7355_v55 = vsel %vm2681_vm6, %v7144_v58, 0.0  ;;  %v7358_v46 = vsel %vm2682_vm1, %v7144_v58, 0.0  ;;  %vm2355_vm11 = vcmp.eq.s32.totalorder %v4802_v28, %v7151_v32 }
 0x2ac   : > { %9318 = vst [vmem:[#allocation37_spill] sm:$0xff] %v7331_v6  ;;  %3991 = vmatpush.bf16.msra.mxu3 %v3928_v1  ;;  %v7365_v3 = vpop.permute.xlu2 %2436  ;;  %vm2679_vm1 = vcmp.eq.s32.totalorder %v4802_v28, %v7071_v30  ;;  %v9335_v6 = vld [vmem:[#allocation53_spill] sm:$0xff] }
 0x2ad   : > { %4076 = vset.pattern.permute.xlu2 %v9198_v63  ;;  %3989 = vmatpush.bf16.msra.mxu1 %v3928_v1 }
 0x2ae   : > { %2626 = vperm.xlu2 %4076, %v2589_v40   ;;  %4077 = vset.pattern.permute.xlu1 %v9040_v7 }
 0x2af   : > { %2092 = vperm.xlu1 %4077, %v7362_v31   ;;  %3194 = vmatpush.bf16.msra.mxu0 %v3928_v1  ;;  %v7377_v1 = vld [vmem:[%s4392_s21 + $0x8] sm:$0xff] }
 0x2b0   : > { %v2421_v40 = vpop.permute.xlu1 %2420  ;;  %v7374_v12 = vpop.permute.xlu0 %2764  ;;  %9324 = vst [vmem:[#allocation20_spill] sm:$0xff] %v7377_v1 }
 0x2b1   : > { %v2484_v21 = vsel %vm2356_vm10, %v2421_v40, 0.0  ;;  %v2485_v14 = vsel %vm2357_vm0, %v2421_v40, 0.0  ;;  %v2486_v51 = vsel %vm2358_vm14, %v2421_v40, 0.0  ;;  %9323 = vst [vmem:[#allocation118_spill] sm:$0xff] %v7374_v12  ;;  %v2483_v2 = vsel %vm2355_vm11, %v2421_v40, 0.0 }
 0x2b2   : > { %4092 = vset.pattern.permute.xlu0 %v9198_v63  ;;  %v2548_v8 = vadd.f32 %v2484_v21, %v7007_v10  ;;  %v2549_v47 = vadd.f32 %v2485_v14, %v7010_v56  ;;  %v2550_v26 = vadd.f32 %v2486_v51, %v7013_v13  ;;  %v4142_v10 = vld [vmem:[%s4392_s21 + $0x70] sm:$0xff]  ;;  %vm2023_vm10 = vcmp.eq.s32.totalorder %v4802_v28, %v9331_v61 }
 0x2b3   : > { %2712 = vperm.xlu0 %4092, %v7377_v1   ;;  %v9325_v51 = vld [vmem:[#allocation7_spill] sm:$0xff]  ;;  %vm2024_vm0 = vcmp.eq.s32.totalorder %v4805_v19, %v9331_v61  ;;  %vm2025_vm14 = vcmp.eq.s32.totalorder %v4809_v38, %v9331_v61  ;;  %v9332_v1 = vld [vmem:[#allocation109_spill] sm:$0xff] }
 0x2b4   : > { %vm427_vm4 = vcmp.eq.s32.totalorder %v4802_v28, %v9325_v51  ;;  %vm428_vm2 = vcmp.eq.s32.totalorder %v4805_v19, %v9325_v51  ;;  %vm429_vm12 = vcmp.eq.s32.totalorder %v4809_v38, %v9325_v51  ;;  %vm430_vm9 = vcmp.eq.s32.totalorder %v4812_v18, %v9325_v51 }
 0x2b5   : > { %v2741_v56 = vpop.permute.xlu2 %2740 }
 0x2b6   : > { %4078 = vset.pattern.permute.xlu2 %v9040_v7  ;;  %v2804_v7 = vsel %vm2676_vm8, %v2741_v56, 0.0  ;;  %v2805_v21 = vsel %vm2677_vm15, %v2741_v56, 0.0  ;;  %v2806_v14 = vsel %vm2678_vm5, %v2741_v56, 0.0  ;;  %vm2026_vm8 = vcmp.eq.s32.totalorder %v4812_v18, %v9331_v61 }
 0x2b7   : > { %2096 = vperm.xlu2 %4078, %v7385_v24   ;;  %4079 = vset.pattern.permute.xlu1 %v9293_v41  ;;  %v7404_v43 = vadd.f32 %v2804_v7, %v2548_v8  ;;  %v7406_v39 = vadd.f32 %v2805_v21, %v2549_v47  ;;  %v7408_v25 = vadd.f32 %v2806_v14, %v2550_v26  ;;  %v9330_v47 = vld [vmem:[#allocation38_spill] sm:$0xff] }
 0x2b8   : > { %2444 = vperm.xlu1 %4079, %v4142_v10   ;;  %v7396_v13 = vpop.permute.xlu1 %2315  ;;  %v7400_v57 = vpop.permute.xlu0 %2736  ;;  %v9328_v10 = vld [vmem:[#allocation30_spill] sm:$0xff]  ;;  %vm2675_vm15 = vcmp.eq.s32.totalorder %v4802_v28, %v7320_v53 }
 0x2b9   : > { %9326 = vst [vmem:[#allocation81_spill] sm:$0xff] %v7400_v57  ;;  %vm763_vm3 = vcmp.eq.s32.totalorder %v4802_v28, %v9328_v10  ;;  %vm764_vm7 = vcmp.eq.s32.totalorder %v4805_v19, %v9328_v10  ;;  %v9329_v57 = vld [vmem:[#allocation9_spill] sm:$0xff]  ;;  %vm765_vm13 = vcmp.eq.s32.totalorder %v4809_v38, %v9328_v10  ;;  %vm766_vm6 = vcmp.eq.s32.totalorder %v4812_v18, %v9328_v10 }
 0x2ba   : > { %9327 = vst [vmem:[#allocation73_spill] sm:$0xff] %v7408_v25  ;;  %v571_v12 = vsel %vm427_vm4, %v9329_v57, 0.0  ;;  %v572_v8 = vsel %vm428_vm2, %v9329_v57, 0.0  ;;  %v891_v7 = vsel %vm763_vm3, %v9330_v47, 0.0  ;;  %v892_v26 = vsel %vm764_vm7, %v9330_v47, 0.0  ;;  %v9383_v25 = vld [vmem:[#allocation13_spill] sm:$0xff] }
 0x2bb   : > { %v573_v21 = vsel %vm429_vm12, %v9329_v57, 0.0  ;;  %v7424_v14 = vsel %vm430_vm9, %v9329_v57, 0.0  ;;  %v893_v51 = vsel %vm765_vm13, %v9330_v47, 0.0  ;;  %v7439_v57 = vsel %vm766_vm6, %v9330_v47, 0.0 }
 0x2bc   : > { %v7441_v32 = vadd.f32 %v891_v7, %v571_v12  ;;  %v7443_v33 = vadd.f32 %v892_v26, %v572_v8  ;;  %v7457_v12 = vld [vmem:[%s4325_s18 + $0x30] sm:$0xff]  ;;  %v2593_v47 = vadd.s32 448, %v7237_v16  ;;  %v2807_v7 = vsel %vm2679_vm1, %v7144_v58, 0.0 }
 0x2bd   : > { %v2265_v10 = vadd.s32 384, %v7457_v12  ;;  %v2803_v58 = vsel %vm2675_vm15, %v2741_v56, 0.0  ;;  %vm2376_vm11 = vcmp.eq.s32.totalorder %v4805_v19, %v7396_v13  ;;  %vm2377_vm6 = vcmp.eq.s32.totalorder %v4809_v38, %v7396_v13 }
 0x2be   : > { %v7454_v40 = vpop.permute.xlu2 %2291  ;;  %vm2378_vm1 = vcmp.eq.s32.totalorder %v4812_v18, %v7396_v13 }
 0x2bf   : > { %4080 = vset.pattern.permute.xlu2 %v9293_v41  ;;  %vm2345_vm15 = vcmp.eq.s32.totalorder %v4809_v38, %v7454_v40 }
 0x2c0   : > { %2448 = vperm.xlu2 %4080, %v7264_v5   ;;  %4081 = vset.pattern.permute.xlu1 %v9198_v63  ;;  %v2089_v8 = vpop.permute.xlu1 %2088  ;;  %v2304_v37 = vpop.permute.xlu0 %2303 }
 0x2c1   : > { %2752 = vperm.xlu1 %4081, %v7159_v22   ;;  %v2547_v22 = vadd.f32 %v2483_v2, %v7004_v60  ;;  %v2151_v61 = vsel %vm2023_vm10, %v2089_v8, 0.0  ;;  %v2152_v26 = vsel %vm2024_vm0, %v2089_v8, 0.0  ;;  %v2153_v62 = vsel %vm2025_vm14, %v2089_v8, 0.0  ;;  %v9334_v60 = vld [vmem:[#allocation52_spill] sm:$0xff] }
 0x2c2   : > { %v2154_v27 = vsel %vm2026_vm8, %v2089_v8, 0.0  ;;  %v7469_v49 = vadd.f32 %v2151_v61, %v9332_v1  ;;  %v7472_v16 = vadd.f32 %v2152_v26, %v9333_v54  ;;  %v7475_v2 = vadd.f32 %v2153_v62, %v9334_v60  ;;  %v9336_v61 = vld [vmem:[#allocation62_spill] sm:$0xff] }
 0x2c3   : > { %v7478_v45 = vadd.f32 %v2154_v27, %v9335_v6  ;;  %vm2359_vm5 = vcmp.eq.s32.totalorder %v4802_v28, %v2304_v37  ;;  %vm2360_vm4 = vcmp.eq.s32.totalorder %v4805_v19, %v2304_v37  ;;  %vm2361_vm2 = vcmp.eq.s32.totalorder %v4809_v38, %v2304_v37 }
 0x2c4   : > { %vm2362_vm12 = vcmp.eq.s32.totalorder %v4812_v18, %v2304_v37  ;;  %v2487_v30 = vsel %vm2359_vm5, %v7272_v35, 0.0  ;;  %v2488_v62 = vsel %vm2360_vm4, %v7272_v35, 0.0  ;;  %v2489_v54 = vsel %vm2361_vm2, %v7272_v35, 0.0 }
 0x2c5   : > { %v2551_v27 = vadd.f32 %v2487_v30, %v7294_v11  ;;  %v2552_v6 = vadd.f32 %v2488_v62, %v7297_v44  ;;  %v2553_v1 = vadd.f32 %v2489_v54, %v7300_v42  ;;  %v2490_v8 = vsel %vm2362_vm12, %v7272_v35, 0.0 }
 0x2c6   : > { %v957_v37 = vadd.f32 %v893_v51, %v573_v21  ;;  %vm1083_vm9 = vcmp.eq.s32.totalorder %v4802_v28, %v9336_v61  ;;  %vm1084_vm3 = vcmp.eq.s32.totalorder %v4805_v19, %v9336_v61  ;;  %v2554_v53 = vadd.f32 %v2490_v8, %v7303_v20  ;;  %v7499_v56 = vpop.permute.xlu2 %2404 }
 0x2c7   : > { %v2871_v11 = vadd.f32 %v2807_v7, %v2551_v27  ;;  %v7502_v44 = vadd.f32 %v7352_v17, %v2552_v6  ;;  %v7505_v42 = vadd.f32 %v7355_v55, %v2553_v1  ;;  %vm1085_vm7 = vcmp.eq.s32.totalorder %v4809_v38, %v9336_v61  ;;  %v9337_v7 = vld [vmem:[#allocation70_spill] sm:$0xff] }
 0x2c8   : > { %2294 = vperm.xlu2 %4080, %v2265_v10   ;;  %v2867_v10 = vadd.f32 %v2803_v58, %v2547_v22  ;;  %vm1086_vm13 = vcmp.eq.s32.totalorder %v4812_v18, %v9336_v61  ;;  %v2594_v35 = vadd.s32 448, %v7287_v29  ;;  %v7513_v20 = vadd.f32 %v7358_v46, %v2554_v53  ;;  %v7517_v21 = vpop.permute.xlu0 %2312  ;;  %v7531_v29 = vpop.permute.xlu1 %2440 }
 0x2c9   : > { %2638 = vperm.xlu1 %4081, %v2593_v47   ;;  %vm2372_vm10 = vcmp.eq.s32.totalorder %v4805_v19, %v7517_v21  ;;  %vm2373_vm0 = vcmp.eq.s32.totalorder %v4809_v38, %v7517_v21  ;;  %vm2374_vm14 = vcmp.eq.s32.totalorder %v4812_v18, %v7517_v21  ;;  %v2504_v46 = vsel %vm2376_vm11, %v7531_v29, 0.0 }
 0x2ca   : > { %v2915_v17 = vpack.c.bf16 %v2871_v11, %v2867_v10  ;;  %v2505_v47 = vsel %vm2377_vm6, %v7531_v29, 0.0  ;;  %v2506_v22 = vsel %vm2378_vm1, %v7531_v29, 0.0  ;;  %v1211_v26 = vsel %vm1083_vm9, %v9337_v7, 0.0 }
 0x2cb   : > { %v1212_v60 = vsel %vm1084_vm3, %v9337_v7, 0.0  ;;  %v2500_v58 = vsel %vm2372_vm10, %v7365_v3, 0.0  ;;  %v1213_v62 = vsel %vm1085_vm7, %v9337_v7, 0.0  ;;  %v7558_v27 = vadd.f32 %v2504_v46, %v7227_v36 }
 0x2cc   : > { %3215 = vmatmul.bf16.vlgmr.msra.gmra.mxu2 %v2915_v17  ;;  %v7555_v54 = vadd.f32 %v2500_v58, %v7334_v15  ;;  %v2501_v6 = vsel %vm2373_vm0, %v7365_v3, 0.0  ;;  %v7566_v8 = vadd.f32 %v2505_v47, %v7229_v59  ;;  %v2502_v15 = vsel %vm2374_vm14, %v7365_v3, 0.0  ;;  %v9338_v17 = vld [vmem:[#allocation95_spill] sm:$0xff] }
 0x2cd   : > { %v7563_v1 = vadd.f32 %v2501_v6, %v7337_v34  ;;  %v7573_v53 = vadd.f32 %v2506_v22, %v7231_v50  ;;  %vm2344_vm8 = vcmp.eq.s32.totalorder %v4805_v19, %v7454_v40  ;;  %vm2346_vm5 = vcmp.eq.s32.totalorder %v4812_v18, %v7454_v40 }
 0x2ce   : > { %v7583_v36 = vadd.f32 %v2502_v15, %v7340_v23  ;;  %v958_v59 = vadd.f32 %v7439_v57, %v7424_v14  ;;  %v1214_v50 = vsel %vm1086_vm13, %v9337_v7, 0.0  ;;  %v1275_v34 = vadd.f32 %v1211_v26, %v7441_v32 }
 0x2cf   : > { %v1276_v10 = vadd.f32 %v1212_v60, %v7443_v33  ;;  %vm1403_vm4 = vcmp.eq.s32.totalorder %v4802_v28, %v9338_v17  ;;  %vm1404_vm2 = vcmp.eq.s32.totalorder %v4805_v19, %v9338_v17  ;;  %vm1405_vm12 = vcmp.eq.s32.totalorder %v4809_v38, %v9338_v17 }
 0x2d0   : > { %4082 = vset.pattern.permute.xlu2 %v9198_v63  ;;  %v7601_v23 = vpop.permute.xlu0 %2408  ;;  %vm1406_vm9 = vcmp.eq.s32.totalorder %v4812_v18, %v9338_v17  ;;  %v1278_v6 = vadd.f32 %v1214_v50, %v958_v59  ;;  %vm2371_vm11 = vcmp.eq.s32.totalorder %v4802_v28, %v7517_v21  ;;  %vm2043_vm1 = vcmp.eq.s32.totalorder %v4802_v28, %v7061_v0 }
 0x2d1   : > { %2641 = vperm.xlu2 %4082, %v2594_v35   ;;  %4083 = vset.pattern.permute.xlu1 %v9293_v41  ;;  %v7593_v11 = vpop.permute.xlu2 %2760  ;;  %v1277_v35 = vadd.f32 %v1213_v62, %v957_v37  ;;  %v2472_v33 = vsel %vm2344_vm8, %v7601_v23, 0.0  ;;  %v2473_v14 = vsel %vm2345_vm15, %v7601_v23, 0.0  ;;  %v2474_v57 = vsel %vm2346_vm5, %v7601_v23, 0.0  ;;  %v7617_v32 = vpop.permute.xlu1 %2288  ;;  %v9339_v37 = vld [vmem:[#allocation103_spill] sm:$0xff] }
 0x2d2   : > { %2412 = vperm.xlu1 %4083, %v7362_v31   ;;  %v1531_v61 = vsel %vm1403_vm4, %v9339_v37, 0.0  ;;  %vm2340_vm3 = vcmp.eq.s32.totalorder %v4805_v19, %v7617_v32  ;;  %vm2341_vm7 = vcmp.eq.s32.totalorder %v4809_v38, %v7617_v32  ;;  %vm2342_vm13 = vcmp.eq.s32.totalorder %v4812_v18, %v7617_v32 }
 0x2d3   : > { %v1532_v46 = vsel %vm1404_vm2, %v9339_v37, 0.0  ;;  %v1533_v47 = vsel %vm1405_vm12, %v9339_v37, 0.0  ;;  %v2468_v22 = vsel %vm2340_vm3, %v7499_v56, 0.0  ;;  %v7630_v7 = vadd.f32 %v2472_v33, %v7472_v16 }
 0x2d4   : > { %v1534_v26 = vsel %vm1406_vm9, %v9339_v37, 0.0  ;;  %v7634_v60 = vadd.f32 %v2468_v22, %v7075_v9  ;;  %v2469_v58 = vsel %vm2341_vm7, %v7499_v56, 0.0  ;;  %v7638_v62 = vadd.f32 %v2473_v14, %v7475_v2  ;;  %v9340_v14 = vld [vmem:[#allocation75_spill] sm:$0xff]  ;;  %v9341_v22 = vld [vmem:[#allocation86_spill] sm:$0xff] }
 0x2d5   : > { %v7642_v15 = vadd.f32 %v2469_v58, %v7077_v48  ;;  %v2470_v17 = vsel %vm2342_vm13, %v7499_v56, 0.0  ;;  %v7646_v16 = vadd.f32 %v2474_v57, %v7478_v45  ;;  %v1595_v33 = vadd.f32 %v1531_v61, %v1275_v34  ;;  %v9342_v57 = vld [vmem:[#allocation96_spill] sm:$0xff]  ;;  %v9343_v61 = vld [vmem:[#allocation58_spill] sm:$0xff] }
 0x2d6   : > { %v7651_v9 = vadd.f32 %v2470_v17, %v7079_v4  ;;  %v1596_v2 = vadd.f32 %v1532_v46, %v1276_v10  ;;  %v1597_v59 = vadd.f32 %v1533_v47, %v1277_v35  ;;  %v1598_v50 = vadd.f32 %v1534_v26, %v1278_v6  ;;  %v9344_v4 = vld [vmem:[#allocation6_spill] sm:$0xff]  ;;  %v9349_v6 = vld [vmem:[#allocation37_spill] sm:$0xff] }
 0x2d7   : > { %v1915_v37 = vadd.f32 %v9340_v14, %v1595_v33  ;;  %vm415_vm6 = vcmp.eq.s32.totalorder %v4802_v28, %v9344_v4  ;;  %vm2375_vm10 = vcmp.eq.s32.totalorder %v4802_v28, %v7396_v13  ;;  %v2585_v10 = vadd.s32 448, %v7457_v12  ;;  %v7680_v12 = vld [vmem:[%s4325_s18 + $0x10] sm:$0xff]  ;;  %v9350_v33 = vld [vmem:[#allocation17_spill] sm:$0xff] }
 0x2d8   : > { %v1916_v45 = vadd.f32 %v9341_v22, %v1596_v2  ;;  %v1917_v34 = vadd.f32 %v9342_v57, %v1597_v59  ;;  %v2586_v35 = vadd.s32 448, %v7283_v52  ;;  %v2503_v46 = vsel %vm2375_vm10, %v7531_v29, 0.0 }
 0x2d9   : > { %4084 = vset.pattern.permute.xlu2 %v9293_v41  ;;  %v2499_v21 = vsel %vm2371_vm11, %v7365_v3, 0.0  ;;  %v2581_v52 = vadd.s32 448, %v7680_v12  ;;  %vm2044_vm5 = vcmp.eq.s32.totalorder %v4805_v19, %v7061_v0  ;;  %vm2045_vm4 = vcmp.eq.s32.totalorder %v4809_v38, %v7061_v0  ;;  %v9347_v3 = vld [vmem:[#allocation32_spill] sm:$0xff] }
 0x2da   : > { %2416 = vperm.xlu2 %4084, %v7385_v24   ;;  %4085 = vset.pattern.permute.xlu1 %v9198_v63  ;;  %v7654_v48 = vpop.permute.xlu2 %2611  ;;  %v1918_v24 = vadd.f32 %v9343_v61, %v1598_v50  ;;  %vm2046_vm2 = vcmp.eq.s32.totalorder %v4812_v18, %v7061_v0  ;;  %vm2691_vm12 = vcmp.eq.s32.totalorder %v4802_v28, %v9347_v3 }
 0x2db   : > { %2768 = vperm.xlu1 %4085, %v7264_v5   ;;  %vm416_vm9 = vcmp.eq.s32.totalorder %v4805_v19, %v9344_v4  ;;  %vm2692_vm3 = vcmp.eq.s32.totalorder %v4805_v19, %v9347_v3  ;;  %vm2693_vm7 = vcmp.eq.s32.totalorder %v4809_v38, %v9347_v3  ;;  %v2563_v17 = vadd.f32 %v2499_v21, %v9349_v6 }
 0x2dc   : > { %v2636_v5 = vpop.permute.xlu1 %2635  ;;  %v2567_v2 = vadd.f32 %v2503_v46, %v9350_v33  ;;  %2602 = vperm.xlu0 %4092, %v2581_v52   ;;  %vm2694_vm13 = vcmp.eq.s32.totalorder %v4812_v18, %v9347_v3  ;;  %vm417_vm11 = vcmp.eq.s32.totalorder %v4809_v38, %v9344_v4  ;;  %v9367_v3 = vld [vmem:[#allocation106_spill] sm:$0xff] }
 0x2dd   : > { %vm2696_vm0 = vcmp.eq.s32.totalorder %v4805_v19, %v2636_v5  ;;  %vm2697_vm14 = vcmp.eq.s32.totalorder %v4809_v38, %v2636_v5  ;;  %vm2698_vm8 = vcmp.eq.s32.totalorder %v4812_v18, %v2636_v5  ;;  %vm2695_vm15 = vcmp.eq.s32.totalorder %v4802_v28, %v2636_v5 }
 0x2de   : > { %v2824_v47 = vsel %vm2696_vm0, %v7593_v11, 0.0  ;;  %v2825_v26 = vsel %vm2697_vm14, %v7593_v11, 0.0  ;;  %v2826_v13 = vsel %vm2698_vm8, %v7593_v11, 0.0  ;;  %v2823_v59 = vsel %vm2695_vm15, %v7593_v11, 0.0 }
 0x2df   : > { %v7684_v29 = vadd.f32 %v2824_v47, %v7558_v27  ;;  %v7687_v58 = vadd.f32 %v2825_v26, %v7566_v8  ;;  %v7705_v27 = vadd.f32 %v2826_v13, %v7573_v53  ;;  %v2887_v46 = vadd.f32 %v2823_v59, %v2567_v2  ;;  %v9352_v47 = vld [vmem:[#allocation27_spill] sm:$0xff] }
 0x2e0   : > { %vm751_vm10 = vcmp.eq.s32.totalorder %v4802_v28, %v9352_v47  ;;  %vm753_vm0 = vcmp.eq.s32.totalorder %v4809_v38, %v9352_v47  ;;  %vm754_vm14 = vcmp.eq.s32.totalorder %v4812_v18, %v9352_v47  ;;  %vm2343_vm8 = vcmp.eq.s32.totalorder %v4802_v28, %v7454_v40  ;;  %v9361_v40 = vld [vmem:[#allocation20_spill] sm:$0xff] }
 0x2e1   : > { %9345 = vst [vmem:[#allocation40_spill] sm:$0xff] %v7684_v29  ;;  %vm2339_vm15 = vcmp.eq.s32.totalorder %v4802_v28, %v7617_v32 }
 0x2e2   : > { %9346 = vst [vmem:[#allocation23_spill] sm:$0xff] %v7687_v58  ;;  %4086 = vset.pattern.permute.xlu2 %v9198_v63 }
 0x2e3   : > { %2614 = vperm.xlu2 %4086, %v2585_v10   ;;  %2617 = vperm.xlu1 %4085, %v2586_v35   ;;  %9348 = vst [vmem:[#allocation31_spill] sm:$0xff] %v7705_v27  ;;  %v9351_v35 = vld [vmem:[#allocation8_spill] sm:$0xff] }
 0x2e4   : > { %v2109_v8 = vpop.permute.xlu2 %2108  ;;  %v2757_v10 = vpop.permute.xlu1 %2756  ;;  %v559_v0 = vsel %vm415_vm6, %v9351_v35, 0.0  ;;  %vm752_vm6 = vcmp.eq.s32.totalorder %v4805_v19, %v9352_v47  ;;  %v7793_v59 = vsel %vm417_vm11, %v9351_v35, 0.0 }
 0x2e5   : > { %v2171_v50 = vsel %vm2043_vm1, %v2109_v8, 0.0  ;;  %v2172_v53 = vsel %vm2044_vm5, %v2109_v8, 0.0  ;;  %v2173_v14 = vsel %vm2045_vm4, %v2109_v8, 0.0  ;;  %v2174_v11 = vsel %vm2046_vm2, %v2109_v8, 0.0 }
 0x2e6   : > { %v7726_v22 = vadd.f32 %v2171_v50, %v1915_v37  ;;  %v7728_v57 = vadd.f32 %v2172_v53, %v1916_v45  ;;  %v7730_v61 = vadd.f32 %v2173_v14, %v1917_v34  ;;  %v7732_v5 = vadd.f32 %v2174_v11, %v1918_v24  ;;  %v7746_v45 = vld [vmem:[%s4325_s18] sm:$0xff] }
 0x2e7   : > { %vm418_vm1 = vcmp.eq.s32.totalorder %v4812_v18, %v9344_v4  ;;  %v2819_v37 = vsel %vm2691_vm12, %v2757_v10, 0.0  ;;  %v2259_v34 = vadd.s32 384, %v7746_v45  ;;  %v2820_v21 = vsel %vm2692_vm3, %v2757_v10, 0.0 }
 0x2e8   : > { %v2883_v24 = vadd.f32 %v2819_v37, %v2563_v17  ;;  %v7755_v26 = vadd.f32 %v2820_v21, %v7555_v54  ;;  %v2821_v13 = vsel %vm2693_vm7, %v2757_v10, 0.0  ;;  %v2822_v52 = vsel %vm2694_vm13, %v2757_v10, 0.0  ;;  %v9356_v54 = vld [vmem:[#allocation35_spill] sm:$0xff]  ;;  %v7810_v10 = vld [vmem:[%s4392_s21 + $0x18] sm:$0xff] }
 0x2e9   : > { %v7766_v6 = vadd.f32 %v2821_v13, %v7563_v1  ;;  %v7769_v17 = vadd.f32 %v2822_v52, %v7583_v36  ;;  %v879_v33 = vsel %vm751_vm10, %v9356_v54, 0.0  ;;  %v880_v2 = vsel %vm752_vm6, %v9356_v54, 0.0  ;;  %2720 = vperm.xlu0 %4092, %v7810_v10  }
 0x2ea   : > { %9353 = vst [vmem:[#allocation94_spill] sm:$0xff] %v7755_v26  ;;  %v2923_v8 = vpack.c.bf16 %v2887_v46, %v2883_v24  ;;  %v560_v1 = vsel %vm416_vm9, %v9351_v35, 0.0  ;;  %v7799_v50 = vsel %vm418_vm1, %v9351_v35, 0.0  ;;  %v7802_v53 = vsel %vm753_vm0, %v9356_v54, 0.0  ;;  %v4147_v35 = vld [vmem:[%s4325_s18 + $0x8] sm:$0xff] }
 0x2eb   : > { %9354 = vst [vmem:[#allocation42_spill] sm:$0xff] %v7766_v6  ;;  %2732 = vperm.xlu2 %4086, %v7362_v31   ;;  %4088 = vset.pattern.permute.xlu1 %v9293_v41  ;;  %v7805_v14 = vsel %vm754_vm14, %v9356_v54, 0.0  ;;  %v7813_v37 = vadd.f32 %v879_v33, %v559_v0  ;;  %v2260_v24 = vadd.s32 384, %v4147_v35  ;;  %v9357_v0 = vld [vmem:[#allocation65_spill] sm:$0xff]  ;;  %v2467_v13 = vsel %vm2339_vm15, %v7499_v56, 0.0  ;;  %v9358_v54 = vld [vmem:[#allocation59_spill] sm:$0xff] }
 0x2ec   : > { %9355 = vst [vmem:[#allocation119_spill] sm:$0xff] %v7769_v17  ;;  %2276 = vperm.xlu1 %4088, %v2259_v34   ;;  %3225 = vmatmul.bf16.vlgmr.msra.gmra.mxu3 %v2923_v8  ;;  %v7815_v34 = vadd.f32 %v880_v2, %v560_v1  ;;  %v2609_v4 = vpop.permute.xlu1 %2608  ;;  %vm1071_vm9 = vcmp.eq.s32.totalorder %v4802_v28, %v9358_v54  ;;  %v2471_v56 = vsel %vm2343_vm8, %v7601_v23, 0.0  ;;  %v9360_v33 = vld [vmem:[#allocation83_spill] sm:$0xff]  ;;  %v9362_v23 = vld [vmem:[#allocation46_spill] sm:$0xff] }
 0x2ed   : > { %v7807_v11 = vpop.permute.xlu2 %2306  ;;  %vm2660_vm5 = vcmp.eq.s32.totalorder %v4805_v19, %v2609_v4  ;;  %vm2661_vm4 = vcmp.eq.s32.totalorder %v4809_v38, %v2609_v4  ;;  %vm2662_vm2 = vcmp.eq.s32.totalorder %v4812_v18, %v2609_v4  ;;  %vm2659_vm12 = vcmp.eq.s32.totalorder %v4802_v28, %v2609_v4 }
 0x2ee   : > { %v2788_v46 = vsel %vm2660_vm5, %v9357_v0, 0.0  ;;  %v2789_v21 = vsel %vm2661_vm4, %v9357_v0, 0.0  ;;  %v2790_v47 = vsel %vm2662_vm2, %v9357_v0, 0.0  ;;  %vm1072_vm3 = vcmp.eq.s32.totalorder %v4805_v19, %v9358_v54 }
 0x2ef   : > { %v7831_v32 = vadd.f32 %v2788_v46, %v7634_v60  ;;  %v7834_v52 = vadd.f32 %v2789_v21, %v7642_v15  ;;  %v7837_v8 = vadd.f32 %v2790_v47, %v7651_v9  ;;  %vm1073_vm7 = vcmp.eq.s32.totalorder %v4809_v38, %v9358_v54  ;;  %v9359_v60 = vld [vmem:[#allocation67_spill] sm:$0xff] }
 0x2f0   : > { %v1199_v15 = vsel %vm1071_vm9, %v9359_v60, 0.0  ;;  %vm2063_vm13 = vcmp.eq.s32.totalorder %v4802_v28, %v9360_v33  ;;  %vm2064_vm11 = vcmp.eq.s32.totalorder %v4805_v19, %v9360_v33  ;;  %v2787_v9 = vsel %vm2659_vm12, %v9357_v0, 0.0 }
 0x2f1   : > { %v1200_v2 = vsel %vm1072_vm3, %v9359_v60, 0.0  ;;  %vm2065_vm1 = vcmp.eq.s32.totalorder %v4809_v38, %v9360_v33  ;;  %vm2066_vm10 = vcmp.eq.s32.totalorder %v4812_v18, %v9360_v33  ;;  %v2531_v1 = vadd.f32 %v2467_v13, %v9362_v23 }
 0x2f2   : > { %v2579_v46 = vadd.s32 448, %v7746_v45  ;;  %v2535_v21 = vadd.f32 %v2471_v56, %v7469_v49  ;;  %vm2663_vm6 = vcmp.eq.s32.totalorder %v4802_v28, %v7654_v48  ;;  %vm2664_vm0 = vcmp.eq.s32.totalorder %v4805_v19, %v7654_v48  ;;  %v9364_v56 = vld [vmem:[#allocation90_spill] sm:$0xff] }
 0x2f3   : > { %4089 = vset.pattern.permute.xlu2 %v9293_v41  ;;  %v9363_v4 = vmov 0   ;;  %v2851_v31 = vadd.f32 %v2787_v9, %v2531_v1  ;;  %vm2665_vm14 = vcmp.eq.s32.totalorder %v4809_v38, %v7654_v48  ;;  %vm2666_vm8 = vcmp.eq.s32.totalorder %v4812_v18, %v7654_v48  ;;  %v9366_v1 = vld [vmem:[#allocation47_spill] sm:$0xff] }
 0x2f4   : > { %2279 = vperm.xlu2 %4089, %v2260_v24   ;;  %2392 = vperm.xlu1 %4088, %v9361_v40   ;;  %v2729_v47 = vpop.permute.xlu1 %2728  ;;  %v2580_v24 = vadd.s32 448, %v4147_v35  ;;  %v9365_v40 = vld [vmem:[#allocation51_spill] sm:$0xff]  ;;  %vm1074_vm15 = vcmp.eq.s32.totalorder %v4812_v18, %v9358_v54  ;;  %v9368_v54 = vld [vmem:[#allocation34_spill] sm:$0xff] }
 0x2f5   : > { %4098 = vset.pattern.permute.xlu0 %v9363_v4  ;;  %v2791_v51 = vsel %vm2663_vm6, %v2729_v47, 0.0  ;;  %v2792_v33 = vsel %vm2664_vm0, %v2729_v47, 0.0  ;;  %vm2047_vm5 = vcmp.eq.s32.totalorder %v4802_v28, %v9368_v54  ;;  %vm2048_vm4 = vcmp.eq.s32.totalorder %v4805_v19, %v9368_v54 }
 0x2f6   : > { %v2129_v0 = vpop.permute.xlu2 %2128  ;;  %vm2049_vm2 = vcmp.eq.s32.totalorder %v4809_v38, %v9368_v54  ;;  %vm2050_vm12 = vcmp.eq.s32.totalorder %v4812_v18, %v9368_v54 }
 0x2f7   : > { %v2191_v49 = vsel %vm2063_vm13, %v2129_v0, 0.0  ;;  %v2192_v45 = vsel %vm2064_vm11, %v2129_v0, 0.0  ;;  %v2193_v13 = vsel %vm2065_vm1, %v2129_v0, 0.0  ;;  %v2194_v35 = vsel %vm2066_vm10, %v2129_v0, 0.0 }
 0x2f8   : > { %v7889_v9 = vadd.f32 %v2191_v49, %v9364_v56  ;;  %v7892_v23 = vadd.f32 %v2192_v45, %v9365_v40  ;;  %v7895_v36 = vadd.f32 %v2193_v13, %v9366_v1  ;;  %v7898_v30 = vadd.f32 %v2194_v35, %v9367_v3 }
 0x2f9   : > { %v2793_v0 = vsel %vm2665_vm14, %v2729_v47, 0.0  ;;  %v2794_v49 = vsel %vm2666_vm8, %v2729_v47, 0.0  ;;  %v2855_v56 = vadd.f32 %v2791_v51, %v2535_v21  ;;  %v7907_v45 = vadd.f32 %v2792_v33, %v7630_v7  ;;  %v9369_v21 = vld [vmem:[#allocation69_spill] sm:$0xff]  ;;  %v9371_v33 = vld [vmem:[#allocation72_spill] sm:$0xff] }
 0x2fa   : > { %v7910_v13 = vadd.f32 %v2793_v0, %v7638_v62  ;;  %v7913_v3 = vadd.f32 %v2794_v49, %v7646_v16  ;;  %v945_v35 = vadd.f32 %v7802_v53, %v7793_v59  ;;  %v946_v40 = vadd.f32 %v7805_v14, %v7799_v50  ;;  %v7927_v62 = vpop.permute.xlu0 %2309  ;;  %v9372_v49 = vld [vmem:[#allocation74_spill] sm:$0xff] }
 0x2fb   : > { %v1201_v51 = vsel %vm1073_vm7, %v9359_v60, 0.0  ;;  %v2907_v7 = vpack.c.bf16 %v2855_v56, %v2851_v31  ;;  %v1202_v59 = vsel %vm1074_vm15, %v9359_v60, 0.0  ;;  %v7935_v50 = vadd.f32 %v1199_v15, %v7813_v37  ;;  %v9381_v16 = vld [vmem:[#allocation78_spill] sm:$0xff] }
 0x2fc   : > { %4090 = vset.pattern.permute.xlu2 %v9198_v63  ;;  %4091 = vset.pattern.permute.xlu1 %v9198_v63  ;;  %v7938_v53 = vadd.f32 %v1200_v2, %v7815_v34  ;;  %v7942_v14 = vadd.f32 %v1201_v51, %v945_v35  ;;  %vm2368_vm9 = vcmp.eq.s32.totalorder %v4805_v19, %v7927_v62  ;;  %v2261_v35 = vadd.s32 384, %v7680_v12  ;;  %v9374_v12 = vld [vmem:[#allocation100_spill] sm:$0xff] }
 0x2fd   : > { %2596 = vperm.xlu2 %4090, %v2579_v46   ;;  %2599 = vperm.xlu1 %4091, %v2580_v24   ;;  %vm2369_vm3 = vcmp.eq.s32.totalorder %v4809_v38, %v7927_v62  ;;  %vm2370_vm7 = vcmp.eq.s32.totalorder %v4812_v18, %v7927_v62  ;;  %v9370_v24 = vld [vmem:[#allocation57_spill] sm:$0xff]  ;;  %v1266_v55 = vadd.f32 %v1202_v59, %v946_v40 }
 0x2fe   : > { %3205 = vmatmul.bf16.vlgmr.msra.gmra.mxu1 %v2907_v7  ;;  %v2113_v37 = vpop.permute.xlu1 %2112 }
 0x2ff   : > { %v7952_v34 = vpop.permute.xlu2 %2432  ;;  %v2175_v60 = vsel %vm2047_vm5, %v2113_v37, 0.0  ;;  %v2176_v15 = vsel %vm2048_vm4, %v2113_v37, 0.0  ;;  %v2177_v2 = vsel %vm2049_vm2, %v2113_v37, 0.0  ;;  %v2178_v46 = vsel %vm2050_vm12, %v2113_v37, 0.0 }
 0x300   : > { %v7961_v47 = vadd.f32 %v2175_v60, %v9369_v21  ;;  %v2240_v1 = vadd.f32 %v2176_v15, %v9370_v24  ;;  %v2241_v0 = vadd.f32 %v2177_v2, %v9371_v33  ;;  %v2242_v56 = vadd.f32 %v2178_v46, %v9372_v49  ;;  %v9373_v15 = vld [vmem:[#allocation92_spill] sm:$0xff]  ;;  %v9375_v21 = vld [vmem:[#allocation117_spill] sm:$0xff]  ;;  %v9376_v24 = vld [vmem:[#allocation114_spill] sm:$0xff] }
 0x301   : > { %v2496_v51 = vsel %vm2368_vm9, %v7952_v34, 0.0  ;;  %v2497_v7 = vsel %vm2369_vm3, %v7952_v34, 0.0  ;;  %v2498_v54 = vsel %vm2370_vm7, %v7952_v34, 0.0  ;;  %vm1391_vm13 = vcmp.eq.s32.totalorder %v4802_v28, %v9373_v15 }
 0x302   : > { %v7970_v31 = vadd.f32 %v2496_v51, %v2240_v1  ;;  %v7972_v37 = vadd.f32 %v2497_v7, %v2241_v0  ;;  %v7974_v60 = vadd.f32 %v2498_v54, %v2242_v56  ;;  %vm1392_vm11 = vcmp.eq.s32.totalorder %v4805_v19, %v9373_v15  ;;  %v9377_v1 = vld [vmem:[#allocation19_spill] sm:$0xff] }
 0x303   : > { %vm1393_vm1 = vcmp.eq.s32.totalorder %v4809_v38, %v9373_v15  ;;  %vm1394_vm10 = vcmp.eq.s32.totalorder %v4812_v18, %v9373_v15  ;;  %v1519_v40 = vsel %vm1391_vm13, %v9374_v12, 0.0  ;;  %v1520_v59 = vsel %vm1392_vm11, %v9374_v12, 0.0  ;;  %v9379_v15 = vld [vmem:[#allocation82_spill] sm:$0xff] }
 0x304   : > { %v1521_v2 = vsel %vm1393_vm1, %v9374_v12, 0.0  ;;  %v1522_v46 = vsel %vm1394_vm10, %v9374_v12, 0.0  ;;  %vm1711_vm6 = vcmp.eq.s32.totalorder %v4802_v28, %v9376_v24  ;;  %vm1712_vm0 = vcmp.eq.s32.totalorder %v4805_v19, %v9376_v24 }
 0x305   : > { %2708 = vperm.xlu2 %4090, %v9375_v21   ;;  %4093 = vset.pattern.permute.xlu1 %v9293_v41  ;;  %vm1713_vm14 = vcmp.eq.s32.totalorder %v4809_v38, %v9376_v24  ;;  %vm1714_vm8 = vcmp.eq.s32.totalorder %v4812_v18, %v9376_v24  ;;  %vm2059_vm15 = vcmp.eq.s32.totalorder %v4802_v28, %v9377_v1  ;;  %v9380_v21 = vld [vmem:[#allocation99_spill] sm:$0xff] }
 0x306   : > { %2282 = vperm.xlu1 %4093, %v2261_v35   ;;  %vm2060_vm5 = vcmp.eq.s32.totalorder %v4805_v19, %v9377_v1  ;;  %vm2061_vm4 = vcmp.eq.s32.totalorder %v4809_v38, %v9377_v1  ;;  %vm2062_vm2 = vcmp.eq.s32.totalorder %v4812_v18, %v9377_v1  ;;  %v9378_v35 = vld [vmem:[#allocation21_spill] sm:$0xff]  ;;  %v9382_v1 = vld [vmem:[#allocation54_spill] sm:$0xff]  ;;  %vm2031_vm12 = vcmp.eq.s32.totalorder %v4802_v28, %v9383_v25 }
 0x307   : > { %v2125_v33 = vpop.permute.xlu1 %2124  ;;  %v1839_v27 = vsel %vm1711_vm6, %v9382_v1, 0.0  ;;  %vm2032_vm9 = vcmp.eq.s32.totalorder %v4805_v19, %v9383_v25  ;;  %vm2033_vm3 = vcmp.eq.s32.totalorder %v4809_v38, %v9383_v25  ;;  %vm2034_vm7 = vcmp.eq.s32.totalorder %v4812_v18, %v9383_v25 }
 0x308   : > { %v2187_v0 = vsel %vm2059_vm15, %v2125_v33, 0.0  ;;  %v2188_v49 = vsel %vm2060_vm5, %v2125_v33, 0.0  ;;  %v2189_v56 = vsel %vm2061_vm4, %v2125_v33, 0.0  ;;  %v2190_v51 = vsel %vm2062_vm2, %v2125_v33, 0.0  ;;  %v8006_v7 = vpop.permute.xlu2 %2626 }
 0x309   : > { %v8009_v54 = vadd.f32 %v2187_v0, %v9378_v35  ;;  %v8012_v12 = vadd.f32 %v2188_v49, %v9379_v15  ;;  %v8015_v48 = vadd.f32 %v2189_v56, %v9380_v21  ;;  %v8018_v17 = vadd.f32 %v2190_v51, %v9381_v16  ;;  %v4148_v49 = vld [vmem:[%s4325_s18 + $0x18] sm:$0xff]  ;;  %s4164_s18 = sshra.s32 %s3692_s6, 4  ;;  %s4165_s18 = int_to_ptr.hbm [resolvable:$true] %s4164_s18 }
 0x30a   : > { %v1840_v33 = vsel %vm1712_vm0, %v9382_v1, 0.0  ;;  %v1841_v0 = vsel %vm1713_vm14, %v9382_v1, 0.0  ;;  %v2262_v56 = vadd.s32 384, %v4148_v49  ;;  %v1583_v16 = vadd.f32 %v1519_v40, %v7935_v50  ;;  %v4149_v50 = vld [vmem:[%s4392_s21 + $0x10] sm:$0xff]  ;;  %s4166_s21 = scalar_lea.hbm %s4165_s18, 1  ;;  %p4171_p0 = scmp.lt.s32.totalorder %s4165_s18, %s8712_s7 }
 0x30b   : > { %v1584_v51 = vadd.f32 %v1520_v59, %v7938_v53  ;;  %v1585_v35 = vadd.f32 %v1521_v2, %v7942_v14  ;;  %v1842_v15 = vsel %vm1714_vm8, %v9382_v1, 0.0  ;;  %v1586_v21 = vadd.f32 %v1522_v46, %v1266_v55  ;;  %p4167_p11 = scmp.ne.s32.totalorder %s4165_s18, %s4166_s21  ;;  %p4172_p1 = scmp.lt.s32.totalorder %s4170_s9, %s4166_s21 }
 0x30c   : > { %v1903_v6 = vadd.f32 %v1839_v27, %v1583_v16  ;;  %vm2364_vm13 = vcmp.eq.s32.totalorder %v4805_v19, %v7807_v11  ;;  %vm2365_vm11 = vcmp.eq.s32.totalorder %v4809_v38, %v7807_v11  ;;  %vm2366_vm1 = vcmp.eq.s32.totalorder %v4812_v18, %v7807_v11 }
 0x30d   : > { %v1904_v58 = vadd.f32 %v1840_v33, %v1584_v51  ;;  %v1905_v26 = vadd.f32 %v1841_v0, %v1585_v35  ;;  %4094 = vset.pattern.permute.xlu2 %v9293_v41  ;;  %v1906_v29 = vadd.f32 %v1842_v15, %v1586_v21  ;;  %v2582_v55 = vadd.s32 448, %v4148_v49  ;;  %v9384_v35 = vld [vmem:[#allocation28_spill] sm:$0xff]  ;;  %p4168_p12 = pnand %p4167_p11, %p4303_p5  ;;  %p4173_p2 = por %p4172_p1, %p4171_p0 }
 0x30e   : > { %2285 = vperm.xlu2 %4094, %v2262_v56   ;;  %2396 = vperm.xlu1 %4093, %v4149_v50   ;;  %vm2684_vm10 = vcmp.eq.s32.totalorder %v4805_v19, %v8006_v7  ;;  %vm2685_vm6 = vcmp.eq.s32.totalorder %v4809_v38, %v8006_v7  ;;  %vm2686_vm0 = vcmp.eq.s32.totalorder %v4812_v18, %v8006_v7 }
 0x30f   : > { %v2812_v25 = vsel %vm2684_vm10, %v9384_v35, 0.0  ;;  %p4169_p13 = pneg %p4168_p12 }
 0x310   : > { %v8056_v41 = vpop.permute.xlu1 %2428 }
 0x311   : > { %v2492_v27 = vsel %vm2364_vm13, %v8056_v41, 0.0  ;;  %v2493_v53 = vsel %vm2365_vm11, %v8056_v41, 0.0  ;;  %v2494_v14 = vsel %vm2366_vm1, %v8056_v41, 0.0  ;;  %v2097_v40 = vpop.permute.xlu2 %2096  ;;  %vm2367_vm13 = vcmp.eq.s32.totalorder %v4802_v28, %v7927_v62  ;;  %p4174_p3 = pnand %p4173_p2, %p4169_p13 }
 0x312   : > { %v2159_v59 = vsel %vm2031_vm12, %v2097_v40, 0.0  ;;  %v2160_v2 = vsel %vm2032_vm9, %v2097_v40, 0.0  ;;  %v2161_v46 = vsel %vm2033_vm3, %v2097_v40, 0.0  ;;  %v2162_v24 = vsel %vm2034_vm7, %v2097_v40, 0.0 }
 0x313   : > { %v8079_v1 = vadd.f32 %v2159_v59, %v1903_v6  ;;  %v8081_v33 = vadd.f32 %v2160_v2, %v1904_v58  ;;  %v8083_v0 = vadd.f32 %v2161_v46, %v1905_v26  ;;  %v8085_v49 = vadd.f32 %v2162_v24, %v1906_v29  ;;  %v9387_v46 = vld [vmem:[#allocation60_spill] sm:$0xff] }
 0x314   : > { %v2556_v56 = vadd.f32 %v2492_v27, %v7728_v57  ;;  %v2557_v16 = vadd.f32 %v2493_v53, %v7730_v61  ;;  %v2558_v51 = vadd.f32 %v2494_v14, %v7732_v5  ;;  %v2813_v58 = vsel %vm2685_vm6, %v9384_v35, 0.0  ;;  %v9385_v14 = vld [vmem:[#allocation63_spill] sm:$0xff] }
 0x315   : > { %v2814_v61 = vsel %vm2686_vm0, %v9384_v35, 0.0  ;;  %vm2027_vm5 = vcmp.eq.s32.totalorder %v4802_v28, %v9385_v14  ;;  %vm2028_vm4 = vcmp.eq.s32.totalorder %v4805_v19, %v9385_v14  ;;  %vm2029_vm2 = vcmp.eq.s32.totalorder %v4809_v38, %v9385_v14 }
 0x316   : > { %2400 = vperm.xlu2 %4094, %v7810_v10   ;;  %4095 = vset.pattern.permute.xlu1 %v9198_v63  ;;  %v8100_v29 = vadd.f32 %v2812_v25, %v2556_v56  ;;  %v8102_v57 = vadd.f32 %v2813_v58, %v2557_v16  ;;  %v8108_v5 = vadd.f32 %v2814_v61, %v2558_v51  ;;  %v9388_v56 = vld [vmem:[#allocation112_spill] sm:$0xff]  ;;  %v8155_v58 = vpop.permute.xlu0 %2318 }
 0x317   : > { %2605 = vperm.xlu1 %4095, %v2582_v55   ;;  %vm2030_vm12 = vcmp.eq.s32.totalorder %v4812_v18, %v9385_v14  ;;  %v9389_v51 = vld [vmem:[#allocation84_spill] sm:$0xff]  ;;  %vm2380_vm9 = vcmp.eq.s32.totalorder %v4805_v19, %v8155_v58  ;;  %vm2381_vm3 = vcmp.eq.s32.totalorder %v4809_v38, %v8155_v58  ;;  %vm2382_vm7 = vcmp.eq.s32.totalorder %v4812_v18, %v8155_v58 }
 0x318   : > { %v8110_v26 = vpop.permute.xlu1 %2321  ;;  %vm2363_vm11 = vcmp.eq.s32.totalorder %v4802_v28, %v7807_v11  ;;  %vm2683_vm1 = vcmp.eq.s32.totalorder %v4802_v28, %v8006_v7 }
 0x319   : > { %vm2384_vm14 = vcmp.eq.s32.totalorder %v4805_v19, %v8110_v26  ;;  %vm2385_vm8 = vcmp.eq.s32.totalorder %v4809_v38, %v8110_v26  ;;  %vm2386_vm15 = vcmp.eq.s32.totalorder %v4812_v18, %v8110_v26 }
 0x31a   : > { %v8118_v6 = vpop.permute.xlu2 %2448 }
 0x31b   : > { %v2512_v10 = vsel %vm2384_vm14, %v8118_v6, 0.0  ;;  %v2513_v15 = vsel %vm2385_vm8, %v8118_v6, 0.0  ;;  %v2514_v21 = vsel %vm2386_vm15, %v8118_v6, 0.0 }
 0x31c   : > { %v8124_v55 = vadd.f32 %v2512_v10, %v7892_v23  ;;  %v8127_v27 = vadd.f32 %v2513_v15, %v7895_v36  ;;  %v8130_v53 = vadd.f32 %v2514_v21, %v7898_v30 }
 0x31e   : > { %4096 = vset.pattern.permute.xlu2 %v9198_v63  ;;  %v9386_v63 = vld [vmem:[#allocation88_spill] sm:$0xff] }
 0x31f   : > { %2716 = vperm.xlu2 %4096, %v4149_v50  }
 0x321   : > { %v2093_v36 = vpop.permute.xlu1 %2092 }
 0x322   : > { %v2155_v23 = vsel %vm2027_vm5, %v2093_v36, 0.0  ;;  %v2156_v40 = vsel %vm2028_vm4, %v2093_v36, 0.0  ;;  %v2157_v30 = vsel %vm2029_vm2, %v2093_v36, 0.0  ;;  %v2158_v59 = vsel %vm2030_vm12, %v2093_v36, 0.0  ;;  %v8141_v2 = vpop.permute.xlu2 %2294 }
 0x323   : > { %v8144_v50 = vadd.f32 %v2155_v23, %v9386_v63  ;;  %v8147_v24 = vadd.f32 %v2156_v40, %v9387_v46  ;;  %v8150_v16 = vadd.f32 %v2157_v30, %v9388_v56  ;;  %v8153_v25 = vadd.f32 %v2158_v59, %v9389_v51  ;;  %v8179_v30 = vpop.permute.xlu0 %2297 }
 0x324   : > { %v2491_v40 = vsel %vm2363_vm11, %v8056_v41, 0.0  ;;  %v2495_v59 = vsel %vm2367_vm13, %v7952_v34, 0.0  ;;  %vm2352_vm6 = vcmp.eq.s32.totalorder %v4805_v19, %v8179_v30  ;;  %vm2353_vm0 = vcmp.eq.s32.totalorder %v4809_v38, %v8179_v30 }
 0x325   : > { %vm2354_vm14 = vcmp.eq.s32.totalorder %v4812_v18, %v8179_v30  ;;  %v2559_v62 = vadd.f32 %v2495_v59, %v7961_v47  ;;  %v2811_v51 = vsel %vm2683_vm1, %v9384_v35, 0.0  ;;  %v3959_v59 = vld [vmem:[%s8707_s2 + $0xf8] sm:$0xff]  ;;  %vm2350_vm13 = vcmp.eq.s32.totalorder %v4812_v18, %v8141_v2 }
 0x326   : > { %3334 = vmatpush.bf16.msrb.mxu3 %v3959_v59  ;;  %v3957_v59 = vld [vmem:[%s8707_s2 + $0xe8] sm:$0xff] }
 0x327   : > { %4097 = vset.pattern.permute.xlu2 %v9363_v4 }
 0x32a   : > { %v8164_v61 = vpop.permute.xlu1 %2444 }
 0x32b   : > { %v2508_v10 = vsel %vm2380_vm9, %v8164_v61, 0.0  ;;  %v2509_v15 = vsel %vm2381_vm3, %v8164_v61, 0.0  ;;  %v2510_v21 = vsel %vm2382_vm7, %v8164_v61, 0.0  ;;  %v8169_v14 = vpop.permute.xlu2 %2641  ;;  %vm2348_vm9 = vcmp.eq.s32.totalorder %v4805_v19, %v8141_v2 }
 0x32c   : > { %v2572_v4 = vadd.f32 %v2508_v10, %v8012_v12  ;;  %v2573_v36 = vadd.f32 %v2509_v15, %v8015_v48  ;;  %v2574_v23 = vadd.f32 %v2510_v21, %v8018_v17  ;;  %v9390_v12 = vld [vmem:[#allocation71_spill] sm:$0xff]  ;;  %v2555_v17 = vadd.f32 %v2491_v40, %v7726_v22  ;;  %v3943_v10 = vld [vmem:[%s8707_s2 + $0x78] sm:$0xff] }
 0x32d   : > { %vm2687_vm10 = vcmp.eq.s32.totalorder %v4802_v28, %v9390_v12  ;;  %vm2688_vm8 = vcmp.eq.s32.totalorder %v4805_v19, %v9390_v12  ;;  %vm2689_vm15 = vcmp.eq.s32.totalorder %v4809_v38, %v9390_v12  ;;  %vm2690_vm5 = vcmp.eq.s32.totalorder %v4812_v18, %v9390_v12  ;;  %v3951_v15 = vld [vmem:[%s8707_s2 + $0xb8] sm:$0xff]  ;;  %3236 = vmatpush.bf16.msrb.mxu1 %v3943_v10 }
 0x32e   : > { %v2875_v21 = vadd.f32 %v2811_v51, %v2555_v17  ;;  %3285 = vmatpush.bf16.msrb.mxu2 %v3951_v15  ;;  %vm2349_vm7 = vcmp.eq.s32.totalorder %v4809_v38, %v8141_v2 }
 0x333   : > { %v2753_v11 = vpop.permute.xlu1 %2752 }
 0x334   : > { %v8200_v48 = vpop.permute.xlu2 %2416  ;;  %v2815_v34 = vsel %vm2687_vm10, %v2753_v11, 0.0  ;;  %v2816_v41 = vsel %vm2688_vm8, %v2753_v11, 0.0  ;;  %v2817_v63 = vsel %vm2689_vm15, %v2753_v11, 0.0  ;;  %v2818_v46 = vsel %vm2690_vm5, %v2753_v11, 0.0 }
 0x335   : > { %v2480_v22 = vsel %vm2352_vm6, %v8200_v48, 0.0  ;;  %v2481_v56 = vsel %vm2353_vm0, %v8200_v48, 0.0  ;;  %v2482_v47 = vsel %vm2354_vm14, %v8200_v48, 0.0  ;;  %v2879_v40 = vadd.f32 %v2815_v34, %v2559_v62 }
 0x336   : > { %v8219_v12 = vadd.f32 %v2480_v22, %v8081_v33  ;;  %v8222_v7 = vadd.f32 %v2481_v56, %v8083_v0  ;;  %v8225_v35 = vadd.f32 %v2482_v47, %v8085_v49  ;;  %v8228_v11 = vadd.f32 %v2816_v41, %v7970_v31  ;;  %v3942_v33 = vld [vmem:[%s8707_s2 + $0x70] sm:$0xff] }
 0x337   : > { %v8231_v17 = vadd.f32 %v2817_v63, %v7972_v37  ;;  %v2919_v62 = vpack.c.bf16 %v2879_v40, %v2875_v21  ;;  %v8234_v34 = vadd.f32 %v2818_v46, %v7974_v60  ;;  %v3950_v0 = vld [vmem:[%s8707_s2 + $0xb0] sm:$0xff]  ;;  %3237 = vmatpush.bf16.msrb.mxu1 %v3942_v33  ;;  %v9391_v46 = vld [vmem:[#allocation118_spill] sm:$0xff]  ;;  %vm2383_vm10 = vcmp.eq.s32.totalorder %v4802_v28, %v8110_v26 }
 0x338   : > { %v3958_v31 = vld [vmem:[%s8707_s2 + $0xf0] sm:$0xff]  ;;  %3286 = vmatpush.bf16.msrb.mxu2 %v3950_v0  ;;  %v3941_v21 = vld [vmem:[%s8707_s2 + $0x68] sm:$0xff]  ;;  %vm2379_vm6 = vcmp.eq.s32.totalorder %v4802_v28, %v8155_v58  ;;  %v2511_v60 = vsel %vm2383_vm10, %v8118_v6, 0.0  ;;  %v3939_v58 = vld [vmem:[%s8707_s2 + $0x58] sm:$0xff]  ;;  %vm2351_vm14 = vcmp.eq.s32.totalorder %v4802_v28, %v8179_v30  ;;  %vm2703_vm8 = vcmp.eq.s32.totalorder %v4802_v28, %v8169_v14 }
 0x339   : > { %3220 = vmatmul.bf16.gmra.mxu2 %v2919_v62  ;;  %3335 = vmatpush.bf16.msrb.mxu3 %v3958_v31  ;;  %v3949_v40 = vld [vmem:[%s8707_s2 + $0xa8] sm:$0xff]  ;;  %v3956_v62 = vld [vmem:[%s8707_s2 + $0xe0] sm:$0xff]  ;;  %vm2704_vm15 = vcmp.eq.s32.totalorder %v4805_v19, %v8169_v14  ;;  %vm2705_vm5 = vcmp.eq.s32.totalorder %v4809_v38, %v8169_v14 }
 0x33a   : > { %v3936_v30 = vld [vmem:[%s8707_s2 + $0x40] sm:$0xff] }
 0x33b   : > { %v2639_v41 = vpop.permute.xlu1 %2638  ;;  %3238 = vmatpush.bf16.msrb.mxu1 %v3941_v21 }
 0x33c   : > { %vm2700_vm4 = vcmp.eq.s32.totalorder %v4805_v19, %v2639_v41  ;;  %vm2701_vm2 = vcmp.eq.s32.totalorder %v4809_v38, %v2639_v41  ;;  %vm2702_vm12 = vcmp.eq.s32.totalorder %v4812_v18, %v2639_v41  ;;  %3287 = vmatpush.bf16.msrb.mxu2 %v3949_v40  ;;  %vm2699_vm0 = vcmp.eq.s32.totalorder %v4802_v28, %v2639_v41  ;;  %v3946_v41 = vld [vmem:[%s8707_s2 + $0x90] sm:$0xff] }
 0x33d   : > { %v8254_v63 = vpop.permute.xlu2 %2614  ;;  %v2828_v22 = vsel %vm2700_vm4, %v9391_v46, 0.0  ;;  %v2829_v56 = vsel %vm2701_vm2, %v9391_v46, 0.0  ;;  %v2830_v47 = vsel %vm2702_vm12, %v9391_v46, 0.0  ;;  %3336 = vmatpush.bf16.msrb.mxu3 %v3957_v59  ;;  %vm2706_vm4 = vcmp.eq.s32.totalorder %v4812_v18, %v8169_v14  ;;  %v3945_v14 = vld [vmem:[%s8707_s2 + $0x88] sm:$0xff] }
 0x33e   : > { %v8259_v51 = vadd.f32 %v2828_v22, %v2572_v4  ;;  %v8261_v10 = vadd.f32 %v2829_v56, %v2573_v36  ;;  %v8263_v15 = vadd.f32 %v2830_v47, %v2574_v23  ;;  %v3940_v4 = vld [vmem:[%s8707_s2 + $0x60] sm:$0xff]  ;;  %vm2668_vm3 = vcmp.eq.s32.totalorder %v4805_v19, %v8254_v63 }
 0x33f   : > { %v3948_v36 = vld [vmem:[%s8707_s2 + $0xa0] sm:$0xff]  ;;  %vm2669_vm11 = vcmp.eq.s32.totalorder %v4809_v38, %v8254_v63  ;;  %vm2670_vm1 = vcmp.eq.s32.totalorder %v4812_v18, %v8254_v63  ;;  %3239 = vmatpush.bf16.msrb.mxu1 %v3940_v4  ;;  %vm2347_vm2 = vcmp.eq.s32.totalorder %v4802_v28, %v8141_v2  ;;  %v2479_v2 = vsel %vm2351_vm14, %v8200_v48, 0.0 }
 0x340   : > { %9392 = vst [vmem:[#allocation120_spill] sm:$0xff] %v8263_v15  ;;  %3288 = vmatpush.bf16.msrb.mxu2 %v3948_v36  ;;  %vm2667_vm12 = vcmp.eq.s32.totalorder %v4802_v28, %v8254_v63  ;;  %v3944_v63 = vld [vmem:[%s8707_s2 + $0x80] sm:$0xff] }
 0x341   : > { %3337 = vmatpush.bf16.msrb.mxu3 %v3956_v62  ;;  %v3938_v62 = vld [vmem:[%s8707_s2 + $0x50] sm:$0xff] }
 0x343   : > { %3240 = vmatpush.bf16.msrb.mxu1 %v3939_v58 }
 0x344   : > { %v2413_v23 = vpop.permute.xlu1 %2412 }
 0x345   : > { %v2476_v33 = vsel %vm2348_vm9, %v2413_v23, 0.0  ;;  %v2477_v0 = vsel %vm2349_vm7, %v2413_v23, 0.0  ;;  %v2478_v31 = vsel %vm2350_vm13, %v2413_v23, 0.0  ;;  %v8297_v22 = vpop.permute.xlu2 %2732  ;;  %v2475_v58 = vsel %vm2347_vm2, %v2413_v23, 0.0 }
 0x346   : > { %v2540_v56 = vadd.f32 %v2476_v33, %v8147_v24  ;;  %v2796_v47 = vsel %vm2668_vm3, %v8297_v22, 0.0  ;;  %v2541_v21 = vadd.f32 %v2477_v0, %v8150_v16  ;;  %v2797_v40 = vsel %vm2669_vm11, %v8297_v22, 0.0  ;;  %v3947_v24 = vld [vmem:[%s8707_s2 + $0x98] sm:$0xff] }
 0x347   : > { %v2542_v26 = vadd.f32 %v2478_v31, %v8153_v25  ;;  %v2798_v59 = vsel %vm2670_vm1, %v8297_v22, 0.0  ;;  %v3955_v16 = vld [vmem:[%s8707_s2 + $0xd8] sm:$0xff]  ;;  %v2507_v25 = vsel %vm2379_vm6, %v8164_v61, 0.0  ;;  %3289 = vmatpush.bf16.msrb.mxu2 %v3947_v24  ;;  %v2575_v0 = vadd.f32 %v2511_v60, %v7889_v9  ;;  %v3954_v31 = vld [vmem:[%s8707_s2 + $0xd0] sm:$0xff]  ;;  %3241 = vmatpush.bf16.msrb.mxu1 %v3938_v62  ;;  %v3953_v24 = vld [vmem:[%s8707_s2 + $0xc8] sm:$0xff] }
 0x348   : > { %v8317_v4 = vadd.f32 %v2796_v47, %v2540_v56  ;;  %v8321_v6 = vadd.f32 %v2797_v40, %v2541_v21  ;;  %v2571_v33 = vadd.f32 %v2507_v25, %v8009_v54  ;;  %v2827_v61 = vsel %vm2699_vm0, %v9391_v46, 0.0  ;;  %3338 = vmatpush.bf16.msrb.mxu3 %v3955_v16  ;;  %v3937_v21 = vld [vmem:[%s8707_s2 + $0x48] sm:$0xff] }
 0x349   : > { %v8323_v36 = vadd.f32 %v2798_v59, %v2542_v26 }
 0x34a   : > { %v2891_v47 = vadd.f32 %v2827_v61, %v2571_v33  ;;  %v2543_v33 = vadd.f32 %v2479_v2, %v8079_v1  ;;  %v3952_v61 = vld [vmem:[%s8707_s2 + $0xc0] sm:$0xff] }
 0x34b   : > { %3290 = vmatpush.bf16.msrb.mxu2 %v3946_v41  ;;  %3242 = vmatpush.bf16.msrb.mxu1 %v3937_v21 }
 0x34c   : > { %3339 = vmatpush.bf16.msrb.mxu3 %v3954_v31 }
 0x34d   : > { %v2769_v56 = vpop.permute.xlu1 %2768 }
 0x34e   : > { %v2831_v9 = vsel %vm2703_vm8, %v2769_v56, 0.0  ;;  %v2832_v54 = vsel %vm2704_vm15, %v2769_v56, 0.0  ;;  %v2833_v60 = vsel %vm2705_vm5, %v2769_v56, 0.0  ;;  %v2834_v46 = vsel %vm2706_vm4, %v2769_v56, 0.0  ;;  %v2280_v23 = vpop.permute.xlu2 %2279 }
 0x34f   : > { %v2895_v40 = vadd.f32 %v2831_v9, %v2575_v0  ;;  %v8356_v26 = vadd.f32 %v2832_v54, %v8124_v55  ;;  %v8359_v59 = vadd.f32 %v2833_v60, %v8127_v27  ;;  %v8369_v16 = vadd.f32 %v2834_v46, %v8130_v53  ;;  %3291 = vmatpush.bf16.msrb.mxu2 %v3945_v14  ;;  %v9400_v55 = vld [vmem:[#allocation107_spill] sm:$0xff] }
 0x350   : > { %v2539_v53 = vadd.f32 %v2475_v58, %v8144_v50  ;;  %v2795_v0 = vsel %vm2667_vm12, %v8297_v22, 0.0  ;;  %3340 = vmatpush.bf16.msrb.mxu3 %v3953_v24  ;;  %v9393_v50 = vld [vmem:[#allocation81_spill] sm:$0xff]  ;;  %3243 = vmatpush.bf16.msrb.mxu1 %v3936_v30  ;;  %v2389_v58 = vpop.permute.xlu0 %2388  ;;  %vm2328_vm0 = vcmp.eq.s32.totalorder %v4805_v19, %v2280_v23  ;;  %vm2329_vm14 = vcmp.eq.s32.totalorder %v4809_v38, %v2280_v23 }
 0x351   : > { %v2927_v25 = vpack.c.bf16 %v2895_v40, %v2891_v47  ;;  %vm2330_vm15 = vcmp.eq.s32.totalorder %v4812_v18, %v2280_v23  ;;  %vm2327_vm12 = vcmp.eq.s32.totalorder %v4802_v28, %v2280_v23 }
 0x352   : > { %v2859_v56 = vadd.f32 %v2795_v0, %v2539_v53  ;;  %v9394_v53 = vld [vmem:[#allocation24_spill] sm:$0xff] }
 0x353   : > { %3230 = vmatmul.bf16.gmra.mxu3 %v2927_v25  ;;  %3292 = vmatpush.bf16.msrb.mxu2 %v3944_v63 }
 0x354   : > { %3341 = vmatpush.bf16.msrb.mxu3 %v3952_v61 }
 0x355   : > { %v2618_v62 = vpop.permute.xlu1 %2617 }
 0x356   : > { %vm2671_vm9 = vcmp.eq.s32.totalorder %v4802_v28, %v2618_v62  ;;  %vm2672_vm3 = vcmp.eq.s32.totalorder %v4805_v19, %v2618_v62  ;;  %vm2673_vm7 = vcmp.eq.s32.totalorder %v4809_v38, %v2618_v62  ;;  %vm2674_vm13 = vcmp.eq.s32.totalorder %v4812_v18, %v2618_v62 }
 0x357   : > { %v2799_v41 = vsel %vm2671_vm9, %v9393_v50, 0.0  ;;  %v2800_v1 = vsel %vm2672_vm3, %v9393_v50, 0.0  ;;  %v2801_v22 = vsel %vm2673_vm7, %v9393_v50, 0.0  ;;  %v2802_v31 = vsel %vm2674_vm13, %v9393_v50, 0.0 }
 0x358   : > { %v2863_v9 = vadd.f32 %v2799_v41, %v2543_v33  ;;  %v8400_v54 = vadd.f32 %v2800_v1, %v8219_v12  ;;  %v8403_v60 = vadd.f32 %v2801_v22, %v8222_v7  ;;  %v8406_v46 = vadd.f32 %v2802_v31, %v8225_v35  ;;  %v2597_v12 = vpop.permute.xlu2 %2596  ;;  %v9395_v41 = vld [vmem:[#allocation29_spill] sm:$0xff]  ;;  %v9396_v22 = vld [vmem:[#allocation14_spill] sm:$0xff]  ;;  %v2713_v40 = vpop.permute.xlu0 %2712 }
 0x359   : > { %vm2644_vm8 = vcmp.eq.s32.totalorder %v4805_v19, %v2597_v12  ;;  %vm2645_vm5 = vcmp.eq.s32.totalorder %v4809_v38, %v2597_v12  ;;  %vm2646_vm4 = vcmp.eq.s32.totalorder %v4812_v18, %v2597_v12  ;;  %vm2643_vm2 = vcmp.eq.s32.totalorder %v4802_v28, %v2597_v12 }
 0x35a   : > { %v2911_v47 = vpack.c.bf16 %v2863_v9, %v2859_v56 }
 0x35c   : > { %3210 = vmatmul.bf16.gmra.mxu1 %v2911_v47 }
 0x35e   : > { %v2277_v2 = vpop.permute.xlu1 %2276 }
 0x35f   : > { %vm2324_vm11 = vcmp.eq.s32.totalorder %v4805_v19, %v2277_v2  ;;  %vm2325_vm1 = vcmp.eq.s32.totalorder %v4809_v38, %v2277_v2  ;;  %vm2326_vm10 = vcmp.eq.s32.totalorder %v4812_v18, %v2277_v2  ;;  %vm2323_vm6 = vcmp.eq.s32.totalorder %v4802_v28, %v2277_v2  ;;  %v9397_v2 = vld [vmem:[#allocation64_spill] sm:$0xff] }
 0x360   : > { %v2452_v35 = vsel %vm2324_vm11, %v2389_v58, 0.0  ;;  %v2709_v24 = vpop.permute.xlu2 %2708  ;;  %v2453_v25 = vsel %vm2325_vm1, %v2389_v58, 0.0  ;;  %v2454_v30 = vsel %vm2326_vm10, %v2389_v58, 0.0  ;;  %v2451_v62 = vsel %vm2323_vm6, %v2389_v58, 0.0 }
 0x361   : > { %v2516_v63 = vadd.f32 %v2452_v35, %v9394_v53  ;;  %v2772_v33 = vsel %vm2644_vm8, %v2709_v24, 0.0  ;;  %v2517_v1 = vadd.f32 %v2453_v25, %v9395_v41  ;;  %v2518_v31 = vadd.f32 %v2454_v30, %v9396_v22  ;;  %v9398_v35 = vld [vmem:[#allocation104_spill] sm:$0xff]  ;;  %v9399_v53 = vld [vmem:[#allocation105_spill] sm:$0xff]  ;;  %v9401_v25 = vld [vmem:[#allocation15_spill] sm:$0xff] }
 0x362   : > { %v2773_v56 = vsel %vm2645_vm5, %v2709_v24, 0.0  ;;  %v2774_v9 = vsel %vm2646_vm4, %v2709_v24, 0.0  ;;  %v2515_v48 = vadd.f32 %v2451_v62, %v9397_v2  ;;  %v2771_v27 = vsel %vm2643_vm2, %v2709_v24, 0.0 }
 0x363   : > { %v2836_v14 = vadd.f32 %v2772_v33, %v2516_v63 }
 0x366   : > { %v2393_v7 = vpop.permute.xlu1 %2392 }
 0x367   : > { %v2456_v0 = vsel %vm2328_vm0, %v2393_v7, 0.0  ;;  %v2457_v61 = vsel %vm2329_vm14, %v2393_v7, 0.0  ;;  %v2458_v50 = vsel %vm2330_vm15, %v2393_v7, 0.0  ;;  %v2455_v47 = vsel %vm2327_vm12, %v2393_v7, 0.0 }
 0x368   : > { %v2520_v58 = vadd.f32 %v2456_v0, %v9398_v35  ;;  %v2521_v12 = vadd.f32 %v2457_v61, %v9399_v53  ;;  %v2522_v49 = vadd.f32 %v2458_v50, %v9400_v55  ;;  %v2519_v30 = vadd.f32 %v2455_v47, %v9401_v25  ;;  %v2286_v50 = vpop.permute.xlu2 %2285 }
 0x369   : > { %v2835_v0 = vadd.f32 %v2771_v27, %v2515_v48  ;;  %v2837_v61 = vadd.f32 %v2773_v56, %v2517_v1  ;;  %v2838_v55 = vadd.f32 %v2774_v9, %v2518_v31  ;;  %vm2335_vm11 = vcmp.eq.s32.totalorder %v4802_v28, %v2286_v50  ;;  %v2603_v27 = vpop.permute.xlu0 %2602 }
 0x36a   : > { %vm2336_vm1 = vcmp.eq.s32.totalorder %v4805_v19, %v2286_v50  ;;  %vm2337_vm10 = vcmp.eq.s32.totalorder %v4809_v38, %v2286_v50  ;;  %vm2338_vm6 = vcmp.eq.s32.totalorder %v4812_v18, %v2286_v50  ;;  %vm2651_vm5 = vcmp.eq.s32.totalorder %v4802_v28, %v2603_v27 }
 0x36b   : > { %vm2652_vm4 = vcmp.eq.s32.totalorder %v4805_v19, %v2603_v27  ;;  %vm2653_vm2 = vcmp.eq.s32.totalorder %v4809_v38, %v2603_v27  ;;  %vm2654_vm12 = vcmp.eq.s32.totalorder %v4812_v18, %v2603_v27 }
 0x36f   : > { %v2600_v37 = vpop.permute.xlu1 %2599 }
 0x370   : > { %vm2648_vm9 = vcmp.eq.s32.totalorder %v4805_v19, %v2600_v37  ;;  %vm2649_vm3 = vcmp.eq.s32.totalorder %v4809_v38, %v2600_v37  ;;  %vm2650_vm7 = vcmp.eq.s32.totalorder %v4812_v18, %v2600_v37  ;;  %vm2647_vm13 = vcmp.eq.s32.totalorder %v4802_v28, %v2600_v37  ;;  %v2401_v15 = vpop.permute.xlu2 %2400 }
 0x371   : > { %v2776_v23 = vsel %vm2648_vm9, %v2713_v40, 0.0  ;;  %v2777_v7 = vsel %vm2649_vm3, %v2713_v40, 0.0  ;;  %v2778_v24 = vsel %vm2650_vm7, %v2713_v40, 0.0  ;;  %v2775_v62 = vsel %vm2647_vm13, %v2713_v40, 0.0 }
 0x372   : > { %v2839_v63 = vadd.f32 %v2775_v62, %v2519_v30  ;;  %v2840_v33 = vadd.f32 %v2776_v23, %v2520_v58  ;;  %v2841_v41 = vadd.f32 %v2777_v7, %v2521_v12  ;;  %v2842_v22 = vadd.f32 %v2778_v24, %v2522_v49  ;;  %v9402_v58 = vld [vmem:[#allocation56_spill] sm:$0xff]  ;;  %v9403_v23 = vld [vmem:[#allocation93_spill] sm:$0xff] }
 0x373   : > { %v2463_v1 = vsel %vm2335_vm11, %v2401_v15, 0.0  ;;  %v2464_v31 = vsel %vm2336_vm1, %v2401_v15, 0.0  ;;  %v2465_v56 = vsel %vm2337_vm10, %v2401_v15, 0.0  ;;  %v2466_v9 = vsel %vm2338_vm6, %v2401_v15, 0.0  ;;  %v9404_v24 = vld [vmem:[#allocation61_spill] sm:$0xff]  ;;  %v9405_v30 = vld [vmem:[#allocation44_spill] sm:$0xff] }
 0x374   : > { %v2899_v2 = vpack.c.bf16 %v2839_v63, %v2835_v0  ;;  %v2900_v35 = vpack.c.bf16 %v2840_v33, %v2836_v14  ;;  %v2901_v53 = vpack.c.bf16 %v2841_v41, %v2837_v61  ;;  %v2902_v21 = vpack.c.bf16 %v2842_v22, %v2838_v55  ;;  %v9406_v0 = vld [vmem:[#allocation25_spill] sm:$0xff]  ;;  %v9407_v55 = vld [vmem:[#allocation68_spill] sm:$0xff] }
 0x375   : > { %v2527_v61 = vadd.f32 %v2463_v1, %v9406_v0  ;;  %v2528_v63 = vadd.f32 %v2464_v31, %v9407_v55  ;;  %v9408_v33 = vld [vmem:[#allocation116_spill] sm:$0xff]  ;;  %v9426_v0 = vld [vmem:[#allocation23_spill] sm:$0xff]  ;;  %vm3618_vm11 = vcmask 130112   ;;  %vm3622_vm1 = vcmask 195712  }
 0x376   : > { %3195 = vmatmul.bf16.vlgmr.msra.gmra.mxu0 %v2899_v2  ;;  %3244 = vmatmul.bf16.vlgmr.msrb.gmra.mxu1 %v2900_v35  ;;  %v2529_v41 = vadd.f32 %v2465_v56, %v9408_v33  ;;  %v9409_v22 = vld [vmem:[#allocation36_spill] sm:$0xff]  ;;  %v9430_v33 = vld [vmem:[#allocation119_spill] sm:$0xff]  ;;  %vm3626_vm10 = vcmask 261312   ;;  %vm3630_vm6 = vcmask 326912  }
 0x377   : > { %3293 = vmatmul.bf16.vlgmr.msrb.gmra.mxu2 %v2901_v53  ;;  %3342 = vmatmul.bf16.vlgmr.msrb.gmra.mxu3 %v2902_v21  ;;  %v2530_v2 = vadd.f32 %v2466_v9, %v9409_v22 }
 0x378   : > { %v2283_v37 = vpop.permute.xlu1 %2282 }
 0x379   : > { %vm2331_vm0 = vcmp.eq.s32.totalorder %v4802_v28, %v2283_v37  ;;  %vm2332_vm14 = vcmp.eq.s32.totalorder %v4805_v19, %v2283_v37  ;;  %vm2333_vm8 = vcmp.eq.s32.totalorder %v4809_v38, %v2283_v37  ;;  %vm2334_vm15 = vcmp.eq.s32.totalorder %v4812_v18, %v2283_v37  ;;  %v2717_v47 = vpop.permute.xlu2 %2716 }
 0x37a   : > { %v2779_v15 = vsel %vm2651_vm5, %v2717_v47, 0.0  ;;  %v2780_v50 = vsel %vm2652_vm4, %v2717_v47, 0.0  ;;  %v2781_v35 = vsel %vm2653_vm2, %v2717_v47, 0.0  ;;  %v2782_v53 = vsel %vm2654_vm12, %v2717_v47, 0.0 }
 0x37b   : > { %vm3650_vm5 = vcmask 654912   ;;  %vm3654_vm4 = vcmask 720512   ;;  %vm3658_vm2 = vcmask 786112   ;;  %vm3662_vm12 = vcmask 851712  }
 0x380   : > { %v2397_v49 = vpop.permute.xlu1 %2396 }
 0x381   : > { %v2459_v48 = vsel %vm2331_vm0, %v2397_v49, 0.0  ;;  %v2460_v21 = vsel %vm2332_vm14, %v2397_v49, 0.0  ;;  %v2461_v40 = vsel %vm2333_vm8, %v2397_v49, 0.0  ;;  %v2462_v14 = vsel %vm2334_vm15, %v2397_v49, 0.0 }
 0x382   : > { %v2523_v12 = vadd.f32 %v2459_v48, %v9402_v58  ;;  %v2524_v7 = vadd.f32 %v2460_v21, %v9403_v23  ;;  %v2525_v25 = vadd.f32 %v2461_v40, %v9404_v24  ;;  %v2526_v62 = vadd.f32 %v2462_v14, %v9405_v30  ;;  %v2721_v14 = vpop.permute.xlu0 %2720 }
 0x383   : > { %v9413_v30 = vpack.c.bf16 %v8400_v54, %v8317_v4  ;;  %v3966_v4 = vld [vmem:[%s8708_s3 + $0x30] sm:$0xff]  ;;  %vm3634_vm0 = vcmask 392512   ;;  %vm3638_vm14 = vcmask 458112   ;;  %vm3642_vm8 = vcmask 523712  }
 0x384   : > { %v2843_v49 = vadd.f32 %v2779_v15, %v2523_v12  ;;  %v2844_v48 = vadd.f32 %v2780_v50, %v2524_v7  ;;  %v2845_v21 = vadd.f32 %v2781_v35, %v2525_v25  ;;  %v2846_v40 = vadd.f32 %v2782_v53, %v2526_v62  ;;  %v3960_v15 = vld [vmem:[%s8708_s3] sm:$0xff] }
 0x385   : > { %v9414_v62 = vpack.c.bf16 %v8403_v60, %v8321_v6  ;;  %v8530_v6 = vpop.f32.mrf.mxu3  ;;  %vm3646_vm15 = vcmask 589312  }
 0x389   : > { %v2606_v37 = vpop.permute.xlu1 %2605 }
 0x38a   : > { %vm2655_vm9 = vcmp.eq.s32.totalorder %v4802_v28, %v2606_v37  ;;  %vm2656_vm3 = vcmp.eq.s32.totalorder %v4805_v19, %v2606_v37  ;;  %vm2657_vm7 = vcmp.eq.s32.totalorder %v4809_v38, %v2606_v37  ;;  %vm2658_vm13 = vcmp.eq.s32.totalorder %v4812_v18, %v2606_v37 }
 0x38b   : > { %v2783_v1 = vsel %vm2655_vm9, %v2721_v14, 0.0  ;;  %v2784_v31 = vsel %vm2656_vm3, %v2721_v14, 0.0  ;;  %v2785_v56 = vsel %vm2657_vm7, %v2721_v14, 0.0  ;;  %v2786_v9 = vsel %vm2658_vm13, %v2721_v14, 0.0 }
 0x38c   : > { %v2847_v27 = vadd.f32 %v2783_v1, %v2527_v61  ;;  %v2848_v47 = vadd.f32 %v2784_v31, %v2528_v63  ;;  %v2849_v58 = vadd.f32 %v2785_v56, %v2529_v41  ;;  %v2850_v12 = vadd.f32 %v2786_v9, %v2530_v2  ;;  %v9427_v61 = vld [vmem:[#allocation42_spill] sm:$0xff]  ;;  %v9429_v63 = vld [vmem:[#allocation31_spill] sm:$0xff] }
 0x38d   : > { %v9410_v19 = vpack.c.bf16 %v7907_v45, %v7831_v32  ;;  %v9411_v38 = vpack.c.bf16 %v7910_v13, %v7834_v52  ;;  %v9412_v18 = vpack.c.bf16 %v7913_v3, %v7837_v8  ;;  %v9415_v32 = vpack.c.bf16 %v8406_v46, %v8323_v36  ;;  %v9418_v45 = vld [vmem:[#allocation73_spill] sm:$0xff]  ;;  %v9424_v36 = vld [vmem:[#allocation94_spill] sm:$0xff]  ;;  %v8543_v46 = vpop.f32.mrf.mxu3 }
 0x38e   : > { %v2903_v23 = vpack.c.bf16 %v2847_v27, %v2843_v49  ;;  %v2904_v7 = vpack.c.bf16 %v2848_v47, %v2844_v48  ;;  %v2905_v24 = vpack.c.bf16 %v2849_v58, %v2845_v21  ;;  %v2906_v25 = vpack.c.bf16 %v2850_v12, %v2846_v40  ;;  %v3967_v3 = vld [vmem:[%s8708_s3 + $0x38] sm:$0xff]  ;;  %v3961_v2 = vld [vmem:[%s8708_s3 + $0x8] sm:$0xff] }
 0x38f   : > { %v9416_v52 = vpack.c.bf16 %v7502_v44, %v7404_v43  ;;  %v9417_v8 = vpack.c.bf16 %v7505_v42, %v7406_v39  ;;  %v9419_v13 = vpack.c.bf16 %v7513_v20, %v9418_v45  ;;  %3459 = vmatpush.bf16.msrb.mxu0 %v3967_v3  ;;  %v9420_v43 = vpack.c.bf16 %v8228_v11, %v8100_v29  ;;  %v8514_v39 = vpop.f32.mrf.mxu1  ;;  %v3965_v20 = vld [vmem:[%s8708_s3 + $0x28] sm:$0xff]  ;;  %v3964_v29 = vld [vmem:[%s8708_s3 + $0x20] sm:$0xff]  ;;  %v8528_v11 = vpop.f32.mrf.mxu2  ;;  %v9434_v48 = vld [vmem:[#allocation120_spill] sm:$0xff] }
 0x390   : > { %3200 = vmatmul.bf16.gmra.mxu0 %v2903_v23  ;;  %3249 = vmatmul.bf16.gmra.mxu1 %v2904_v7  ;;  %v9421_v44 = vpack.c.bf16 %v8231_v17, %v8102_v57  ;;  %v9422_v42 = vpack.c.bf16 %v8234_v34, %v8108_v5  ;;  %v3963_v5 = vld [vmem:[%s8708_s3 + $0x18] sm:$0xff]  ;;  %v3962_v17 = vld [vmem:[%s8708_s3 + $0x10] sm:$0xff]  ;;  %v9428_v55 = vpack.c.bf16 %v9426_v0, %v9427_v61  ;;  %vm3666_vm9 = vcmask 917312  }
 0x391   : > { %3298 = vmatmul.bf16.gmra.mxu2 %v2905_v24  ;;  %3347 = vmatmul.bf16.gmra.mxu3 %v2906_v25  ;;  %v9423_v34 = vld [vmem:[#allocation40_spill] sm:$0xff]  ;;  %v9431_v41 = vpack.c.bf16 %v9429_v63, %v9430_v33  ;;  %v9432_v37 = vpack.c.bf16 %v8356_v26, %v8259_v51  ;;  %v9433_v49 = vpack.c.bf16 %v8359_v59, %v8261_v10  ;;  %vm3670_vm3 = vcmask 982912  }
 0x392   : > { %v9425_v54 = vpack.c.bf16 %v9423_v34, %v9424_v36  ;;  %v9435_v21 = vpack.c.bf16 %v8369_v16, %v9434_v48  ;;  %vm3674_vm7 = vcmask 1048512  }
 0x393   : > { %3460 = vmatpush.bf16.msrb.mxu0 %v3966_v4 }
 0x397   : > { %3461 = vmatpush.bf16.msrb.mxu0 %v3965_v20  ;;  %v3208_v57 = vpop.f32.mrf.mxu1  ;;  %v8541_v60 = vpop.f32.mrf.mxu2 }
 0x39b   : > { %3462 = vmatpush.bf16.msrb.mxu0 %v3964_v29 }
 0x39f   : > { %3463 = vmatpush.bf16.msrb.mxu0 %v3963_v5 }
 0x3a0   : > { %3254 = vmatmul.bf16.gmra.mxu1 %v9410_v19 }
 0x3a1   : > { %3303 = vmatmul.bf16.gmra.mxu2 %v9411_v38  ;;  %3352 = vmatmul.bf16.gmra.mxu3 %v9412_v18 }
 0x3a3   : > { %3464 = vmatpush.bf16.msrb.mxu0 %v3962_v17 }
 0x3a7   : > { %3465 = vmatpush.bf16.msrb.mxu0 %v3961_v2 }
 0x3ab   : > { %3466 = vmatpush.bf16.msrb.mxu0 %v3960_v15 }
 0x3b0   : > { %3259 = vmatmul.bf16.gmra.mxu1 %v9413_v30 }
 0x3b1   : > { %3308 = vmatmul.bf16.gmra.mxu2 %v9414_v62  ;;  %3357 = vmatmul.bf16.gmra.mxu3 %v9415_v32 }
 0x3bc   : > { %v8559_v50 = vpop.f32.mrf.mxu2 }
 0x3c0   : > { %3264 = vmatmul.bf16.gmra.mxu1 %v9416_v52 }
 0x3c1   : > { %3313 = vmatmul.bf16.gmra.mxu2 %v9417_v8  ;;  %3362 = vmatmul.bf16.gmra.mxu3 %v9419_v13 }
 0x3c4   : > { %v8572_v40 = vpop.f32.mrf.mxu2 }
 0x3d0   : > { %3269 = vmatmul.bf16.gmra.mxu1 %v9420_v43 }
 0x3d1   : > { %3318 = vmatmul.bf16.gmra.mxu2 %v9421_v44  ;;  %3367 = vmatmul.bf16.gmra.mxu3 %v9422_v42 }
 0x3d6   : > { %v8561_v35 = vpop.f32.mrf.mxu3 }
 0x3d9   : > { %v8551_v22 = vpop.f32.mrf.mxu1 }
 0x3de   : > { %v8574_v14 = vpop.f32.mrf.mxu3 }
 0x3e0   : > { %3274 = vmatmul.bf16.gmra.mxu1 %v9425_v54 }
 0x3e1   : > { %3323 = vmatmul.bf16.gmra.mxu2 %v9428_v55  ;;  %3372 = vmatmul.bf16.gmra.mxu3 %v9431_v41  ;;  %v3213_v53 = vpop.f32.mrf.mxu1 }
 0x3f0   : > { %3279 = vmatmul.bf16.gmra.mxu1 %v9432_v37 }
 0x3f1   : > { %3328 = vmatmul.bf16.gmra.mxu2 %v9433_v49  ;;  %3377 = vmatmul.bf16.gmra.mxu3 %v9435_v21 }
 0x3f3   : > { %v3196_v1 = vpop.f32.mrf.mxu0  ;;  %v3245_v31 = vpop.f32.mrf.mxu1 }
 0x3f4   : > { %v3246_v51 = vadd.f32 %v3245_v31, %v3196_v1 }
 0x3fa   : > { %v3294_v56 = vpop.f32.mrf.mxu2  ;;  %v3343_v9 = vpop.f32.mrf.mxu3 }
 0x3fb   : > { %v3198_v27 = vpop.f32.mrf.mxu0  ;;  %v3247_v47 = vpop.f32.mrf.mxu1  ;;  %v3295_v26 = vadd.f32 %v3294_v56, %v3246_v51 }
 0x3fc   : > { %v3248_v58 = vadd.f32 %v3247_v47, %v3198_v27 }
 0x3fd   : > { %v3344_v23 = vadd.f32 %v3343_v9, %v3295_v26 }
 0x402   : > { %v3296_v12 = vpop.f32.mrf.mxu2  ;;  %v3345_v59 = vpop.f32.mrf.mxu3 }
 0x403   : > { %v3297_v10 = vadd.f32 %v3296_v12, %v3248_v58 }
 0x405   : > { %v3346_v7 = vadd.f32 %v3345_v59, %v3297_v10 }
 0x407   : > { %v3383_v16 = vpack.c.bf16 %v3346_v7, %v3344_v23 }
 0x409   : > { %3467 = vmatmul.bf16.vlgmr.msrb.gmra.mxu0 %v3383_v16 }
 0x40d   : > { %v3250_v24 = vpop.f32.mrf.mxu1  ;;  %v3201_v25 = vpop.f32.mrf.mxu0 }
 0x40e   : > { %v3251_v62 = vadd.f32 %v3250_v24, %v3201_v25 }
 0x414   : > { %v3299_v19 = vpop.f32.mrf.mxu2  ;;  %v3348_v38 = vpop.f32.mrf.mxu3 }
 0x415   : > { %v3252_v18 = vpop.f32.mrf.mxu1  ;;  %v3203_v30 = vpop.f32.mrf.mxu0  ;;  %v3300_v32 = vadd.f32 %v3299_v19, %v3251_v62 }
 0x416   : > { %v3253_v52 = vadd.f32 %v3252_v18, %v3203_v30 }
 0x417   : > { %v3349_v4 = vadd.f32 %v3348_v38, %v3300_v32 }
 0x41c   : > { %v3301_v8 = vpop.f32.mrf.mxu2  ;;  %v3350_v45 = vpop.f32.mrf.mxu3 }
 0x41d   : > { %v3302_v13 = vadd.f32 %v3301_v8, %v3253_v52  ;;  %v3255_v3 = vpop.f32.mrf.mxu1 }
 0x41e   : > { %v3256_v5 = vadd.f32 %v3255_v3, %v8514_v39 }
 0x41f   : > { %v3351_v43 = vadd.f32 %v3350_v45, %v3302_v13  ;;  %v3576_v45 = vld [vmem:[#allocation2] sm:$0x1] }
 0x420   : > { %3579 = vperm.xlu2 %4097, %v3576_v45  }
 0x421   : > { %v3384_v44 = vpack.c.bf16 %v3351_v43, %v3349_v4 }
 0x423   : > { %3472 = vmatmul.bf16.gmra.mxu0 %v3384_v44 }
 0x424   : > { %v3304_v42 = vpop.f32.mrf.mxu2  ;;  %v3353_v20 = vpop.f32.mrf.mxu3 }
 0x425   : > { %v3257_v29 = vpop.f32.mrf.mxu1  ;;  %v3305_v17 = vadd.f32 %v3304_v42, %v3256_v5 }
 0x426   : > { %v3258_v34 = vadd.f32 %v3257_v29, %v3208_v57 }
 0x427   : > { %v3354_v55 = vadd.f32 %v3353_v20, %v3305_v17 }
 0x42c   : > { %v3306_v36 = vpop.f32.mrf.mxu2  ;;  %v3355_v54 = vpop.f32.mrf.mxu3 }
 0x42d   : > { %v3307_v0 = vadd.f32 %v3306_v36, %v3258_v34  ;;  %v3260_v61 = vpop.f32.mrf.mxu1 }
 0x42e   : > { %v3261_v37 = vadd.f32 %v3260_v61, %v8551_v22 }
 0x42f   : > { %v3356_v63 = vadd.f32 %v3355_v54, %v3307_v0 }
 0x431   : > { %v3385_v33 = vpack.c.bf16 %v3356_v63, %v3354_v55 }
 0x433   : > { %3477 = vmatmul.bf16.gmra.mxu0 %v3385_v33 }
 0x434   : > { %v3309_v41 = vpop.f32.mrf.mxu2  ;;  %v3358_v2 = vpop.f32.mrf.mxu3 }
 0x435   : > { %v3262_v15 = vpop.f32.mrf.mxu1  ;;  %v3310_v49 = vadd.f32 %v3309_v41, %v3261_v37 }
 0x436   : > { %v3263_v48 = vadd.f32 %v3262_v15, %v3213_v53 }
 0x437   : > { %v3359_v57 = vadd.f32 %v3358_v2, %v3310_v49  ;;  %v8589_v49 = vld [vmem:[%s8709_s4] ss:$0 sm:$0xff] }
 0x43c   : > { %v3311_v21 = vpop.f32.mrf.mxu2  ;;  %v3360_v1 = vpop.f32.mrf.mxu3 }
 0x43d   : > { %v3312_v39 = vadd.f32 %v3311_v21, %v3263_v48  ;;  %v3265_v31 = vpop.f32.mrf.mxu1 }
 0x43e   : > { %v3266_v26 = vadd.f32 %v3265_v31, %v8528_v11 }
 0x43f   : > { %v3361_v56 = vadd.f32 %v3360_v1, %v3312_v39 }
 0x441   : > { %v3386_v9 = vpack.c.bf16 %v3361_v56, %v3359_v57 }
 0x443   : > { %3482 = vmatmul.bf16.gmra.mxu0 %v3386_v9 }
 0x444   : > { %v3314_v27 = vpop.f32.mrf.mxu2  ;;  %v3363_v47 = vpop.f32.mrf.mxu3 }
 0x445   : > { %v3267_v51 = vpop.f32.mrf.mxu1  ;;  %v3315_v58 = vadd.f32 %v3314_v27, %v3266_v26 }
 0x446   : > { %v3268_v12 = vadd.f32 %v3267_v51, %v8541_v60 }
 0x447   : > { %v3364_v23 = vadd.f32 %v3363_v47, %v3315_v58 }
 0x44c   : > { %v3316_v10 = vpop.f32.mrf.mxu2  ;;  %v3365_v22 = vpop.f32.mrf.mxu3 }
 0x44d   : > { %v3317_v59 = vadd.f32 %v3316_v10, %v3268_v12  ;;  %v3270_v53 = vpop.f32.mrf.mxu1 }
 0x44e   : > { %v3271_v38 = vadd.f32 %v3270_v53, %v8559_v50 }
 0x44f   : > { %v3366_v7 = vadd.f32 %v3365_v22, %v3317_v59 }
 0x451   : > { %v3387_v16 = vpack.c.bf16 %v3366_v7, %v3364_v23 }
 0x453   : > { %3487 = vmatmul.bf16.gmra.mxu0 %v3387_v16 }
 0x454   : > { %v3319_v24 = vpop.f32.mrf.mxu2  ;;  %v3368_v25 = vpop.f32.mrf.mxu3 }
 0x455   : > { %v3272_v19 = vpop.f32.mrf.mxu1  ;;  %v3320_v18 = vadd.f32 %v3319_v24, %v3271_v38 }
 0x456   : > { %v3273_v30 = vadd.f32 %v3272_v19, %v8572_v40 }
 0x457   : > { %v3369_v52 = vadd.f32 %v3368_v25, %v3320_v18 }
 0x45c   : > { %v3321_v11 = vpop.f32.mrf.mxu2  ;;  %v3370_v62 = vpop.f32.mrf.mxu3 }
 0x45d   : > { %v3322_v32 = vadd.f32 %v3321_v11, %v3273_v30  ;;  %v3275_v60 = vpop.f32.mrf.mxu1 }
 0x45e   : > { %v3276_v44 = vadd.f32 %v3275_v60, %v8530_v6 }
 0x45f   : > { %v3371_v8 = vadd.f32 %v3370_v62, %v3322_v32 }
 0x461   : > { %v3388_v13 = vpack.c.bf16 %v3371_v8, %v3369_v52 }
 0x463   : > { %3492 = vmatmul.bf16.gmra.mxu0 %v3388_v13 }
 0x464   : > { %v3324_v3 = vpop.f32.mrf.mxu2  ;;  %v3373_v4 = vpop.f32.mrf.mxu3 }
 0x465   : > { %v3277_v43 = vpop.f32.mrf.mxu1  ;;  %v3325_v42 = vadd.f32 %v3324_v3, %v3276_v44 }
 0x466   : > { %v3278_v50 = vadd.f32 %v3277_v43, %v8543_v46 }
 0x467   : > { %v3374_v17 = vadd.f32 %v3373_v4, %v3325_v42 }
 0x46c   : > { %v3326_v20 = vpop.f32.mrf.mxu2  ;;  %v3375_v40 = vpop.f32.mrf.mxu3 }
 0x46d   : > { %v3327_v29 = vadd.f32 %v3326_v20, %v3278_v50  ;;  %v3280_v5 = vpop.f32.mrf.mxu1 }
 0x46e   : > { %v3281_v55 = vadd.f32 %v3280_v5, %v8561_v35  ;;  %v8595_v35 = vld [vmem:[%s8710_s5] ss:$0 sm:$0xff] }
 0x46f   : > { %v3376_v34 = vadd.f32 %v3375_v40, %v3327_v29 }
 0x471   : > { %v3389_v36 = vpack.c.bf16 %v3376_v34, %v3374_v17 }
 0x473   : > { %3497 = vmatmul.bf16.gmra.mxu0 %v3389_v36 }
 0x474   : > { %v3329_v54 = vpop.f32.mrf.mxu2  ;;  %v3378_v0 = vpop.f32.mrf.mxu3 }
 0x475   : > { %v3282_v61 = vpop.f32.mrf.mxu1  ;;  %v3330_v63 = vadd.f32 %v3329_v54, %v3281_v55 }
 0x476   : > { %v3283_v33 = vadd.f32 %v3282_v61, %v8574_v14 }
 0x477   : > { %v3379_v46 = vadd.f32 %v3378_v0, %v3330_v63 }
 0x47c   : > { %v3331_v6 = vpop.f32.mrf.mxu2  ;;  %v3380_v2 = vpop.f32.mrf.mxu3 }
 0x47d   : > { %v3332_v41 = vadd.f32 %v3331_v6, %v3283_v33 }
 0x47f   : > { %v3381_v15 = vadd.f32 %v3380_v2, %v3332_v41 }
 0x481   : > { %v3390_v37 = vpack.c.bf16 %v3381_v15, %v3379_v46 }
 0x483   : > { %3502 = vmatmul.bf16.gmra.mxu0 %v3390_v37 }
 0x486   : > { %v3468_v48 = vpop.f32.mrf.mxu0 }
 0x487   : > { %v3469_v21 = vadd.f32 %v8589_v49, %v3468_v48 }
 0x489   : > { %v3508_v14 = vmax.f32 %v3469_v21, 0.0 }
 0x48b   : > { %v3528_v1 = vmul.f32 %v8595_v35, %v3508_v14 }
 0x48d   : > { %3544 = vadd.xlane.f32.xlu1 %v3528_v1  ;;  %v3580_v1 = vpop.permute.xlu2 %3579 }
 0x48e   : > { %v3470_v39 = vpop.f32.mrf.mxu0 }
 0x48f   : > { %v3471_v31 = vadd.f32 %v8589_v49, %v3470_v39 }
 0x491   : > { %v3509_v57 = vmax.f32 %v3471_v31, 0.0 }
 0x493   : > { %v3529_v56 = vmul.f32 %v8595_v35, %v3509_v57 }
 0x495   : > { %3546 = vadd.xlane.f32.xlu0 %v3529_v56 }
 0x4a0   : > { %v3473_v9 = vpop.f32.mrf.mxu0 }
 0x4a1   : > { %v3474_v27 = vadd.f32 %v8589_v49, %v3473_v9 }
 0x4a3   : > { %v3510_v47 = vmax.f32 %v3474_v27, 0.0 }
 0x4a5   : > { %v3530_v51 = vmul.f32 %v8595_v35, %v3510_v47 }
 0x4a7   : > { %3548 = vadd.xlane.f32.xlu2 %v3530_v51 }
 0x4a8   : > { %v3475_v26 = vpop.f32.mrf.mxu0 }
 0x4a9   : > { %v3476_v58 = vadd.f32 %v8589_v49, %v3475_v26 }
 0x4ab   : > { %v3511_v12 = vmax.f32 %v3476_v58, 0.0  ;;  %v8628_v58 = vperm.slane %v3580_v1, 0 }
 0x4ad   : > { %v3531_v10 = vmul.f32 %v8595_v35, %v3511_v12  ;;  %v3616_v12 = vadd.s32 4294967288, %v4802_v28 }
 0x4af   : > { %3550 = vadd.xlane.f32.xlu1 %v3531_v10 }
 0x4b0   : > { %v3478_v22 = vpop.f32.mrf.mxu0 }
 0x4b1   : > { %v3479_v59 = vadd.f32 %v8589_v49, %v3478_v22 }
 0x4b3   : > { %v3512_v53 = vmax.f32 %v3479_v59, 0.0  ;;  %v3624_v59 = vadd.s32 4294967272, %v4802_v28 }
 0x4b5   : > { %v3532_v23 = vmul.f32 %v8595_v35, %v3512_v53 }
 0x4b7   : > { %3552 = vadd.xlane.f32.xlu2 %v3532_v23 }
 0x4b8   : > { %v3480_v7 = vpop.f32.mrf.mxu0 }
 0x4b9   : > { %v3481_v16 = vadd.f32 %v8589_v49, %v3480_v7 }
 0x4bb   : > { %v3513_v24 = vmax.f32 %v3481_v16, 0.0 }
 0x4bd   : > { %v3533_v25 = vmul.f32 %v8595_v35, %v3513_v24  ;;  %v3628_v24 = vadd.s32 4294967264, %v4802_v28 }
 0x4bf   : > { %3554 = vadd.xlane.f32.xlu0 %v3533_v25 }
 0x4c0   : > { %v3483_v19 = vpop.f32.mrf.mxu0 }
 0x4c1   : > { %v3484_v38 = vadd.f32 %v8589_v49, %v3483_v19 }
 0x4c3   : > { %v3514_v18 = vmax.f32 %v3484_v38, 0.0 }
 0x4c5   : > { %v3534_v30 = vmul.f32 %v8595_v35, %v3514_v18 }
 0x4c7   : > { %3556 = vadd.xlane.f32.xlu1 %v3534_v30 }
 0x4c8   : > { %v3485_v11 = vpop.f32.mrf.mxu0 }
 0x4c9   : > { %v3486_v62 = vadd.f32 %v8589_v49, %v3485_v11  ;;  %v3632_v11 = vadd.s32 4294967256, %v4802_v28 }
 0x4cb   : > { %v3515_v32 = vmax.f32 %v3486_v62, 0.0 }
 0x4cd   : > { %v3535_v60 = vmul.f32 %v8595_v35, %v3515_v32 }
 0x4cf   : > { %3558 = vadd.xlane.f32.xlu2 %v3535_v60  ;;  %v3636_v60 = vadd.s32 4294967248, %v4802_v28 }
 0x4d0   : > { %v3488_v52 = vpop.f32.mrf.mxu0 }
 0x4d1   : > { %v3489_v8 = vadd.f32 %v8589_v49, %v3488_v52 }
 0x4d3   : > { %v3516_v45 = vmax.f32 %v3489_v8, 0.0 }
 0x4d5   : > { %v3536_v13 = vmul.f32 %v8595_v35, %v3516_v45  ;;  %v3640_v45 = vadd.s32 4294967240, %v4802_v28 }
 0x4d7   : > { %3560 = vadd.xlane.f32.xlu0 %v3536_v13 }
 0x4d8   : > { %v3490_v3 = vpop.f32.mrf.mxu0 }
 0x4d9   : > { %v3491_v4 = vadd.f32 %v8589_v49, %v3490_v3 }
 0x4db   : > { %v3517_v43 = vmax.f32 %v3491_v4, 0.0  ;;  %v3644_v4 = vadd.s32 4294967232, %v4802_v28 }
 0x4dd   : > { %v3537_v44 = vmul.f32 %v8595_v35, %v3517_v43 }
 0x4df   : > { %3562 = vadd.xlane.f32.xlu1 %v3537_v44 }
 0x4e0   : > { %v3493_v42 = vpop.f32.mrf.mxu0 }
 0x4e1   : > { %v3494_v50 = vadd.f32 %v8589_v49, %v3493_v42 }
 0x4e3   : > { %v3518_v20 = vmax.f32 %v3494_v50, 0.0  ;;  %v3648_v50 = vadd.s32 4294967224, %v4802_v28 }
 0x4e5   : > { %v3538_v40 = vmul.f32 %v8595_v35, %v3518_v20 }
 0x4e7   : > { %3564 = vadd.xlane.f32.xlu2 %v3538_v40 }
 0x4e8   : > { %v3495_v29 = vpop.f32.mrf.mxu0 }
 0x4e9   : > { %v3496_v5 = vadd.f32 %v8589_v49, %v3495_v29 }
 0x4eb   : > { %v3519_v17 = vmax.f32 %v3496_v5, 0.0  ;;  %v3652_v5 = vadd.s32 4294967216, %v4802_v28 }
 0x4ed   : > { %v3539_v34 = vmul.f32 %v8595_v35, %v3519_v17 }
 0x4ef   : > { %3566 = vadd.xlane.f32.xlu0 %v3539_v34 }
 0x4f0   : > { %v3498_v36 = vpop.f32.mrf.mxu0 }
 0x4f1   : > { %v3499_v54 = vadd.f32 %v8589_v49, %v3498_v36 }
 0x4f3   : > { %v3520_v0 = vmax.f32 %v3499_v54, 0.0 }
 0x4f5   : > { %v3540_v61 = vmul.f32 %v8595_v35, %v3520_v0  ;;  %v3656_v0 = vadd.s32 4294967208, %v4802_v28 }
 0x4f7   : > { %3568 = vadd.xlane.f32.xlu1 %v3540_v61 }
 0x4f8   : > { %v3500_v55 = vpop.f32.mrf.mxu0 }
 0x4f9   : > { %v3501_v63 = vadd.f32 %v8589_v49, %v3500_v55 }
 0x4fb   : > { %v3521_v33 = vmax.f32 %v3501_v63, 0.0 }
 0x4fd   : > { %v3541_v6 = vmul.f32 %v8595_v35, %v3521_v33  ;;  %v3660_v33 = vadd.s32 4294967200, %v4802_v28 }
 0x4ff   : > { %3570 = vadd.xlane.f32.xlu2 %v3541_v6 }
 0x500   : > { %v3503_v41 = vpop.f32.mrf.mxu0  ;;  %v3545_v39 = vpop.xlane.xlu1 %3544 }
 0x501   : > { %v3504_v2 = vadd.f32 %v8589_v49, %v3503_v41  ;;  %v3583_v10 = vadd.f32 %v8628_v58, %v3545_v39 }
 0x503   : > { %v3522_v46 = vmax.f32 %v3504_v2, 0.0  ;;  %v3615_v38 = vperm.slane %v3583_v10, %v4802_v28 }
 0x505   : > { %v3542_v15 = vmul.f32 %v8595_v35, %v3522_v46  ;;  %v3664_v46 = vadd.s32 4294967192, %v4802_v28 }
 0x507   : > { %3572 = vadd.xlane.f32.xlu0 %v3542_v15 }
 0x508   : > { %v3505_v37 = vpop.f32.mrf.mxu0  ;;  %v3547_v57 = vpop.xlane.xlu0 %3546 }
 0x509   : > { %v3506_v48 = vadd.f32 %v8589_v49, %v3505_v37  ;;  %v3584_v49 = vadd.f32 %v8628_v58, %v3547_v57 }
 0x50b   : > { %v3523_v21 = vmax.f32 %v3506_v48, 0.0  ;;  %v3617_v7 = vperm.slane %v3584_v49, %v3616_v12 }
 0x50d   : > { %v3543_v14 = vmul.f32 %v8595_v35, %v3523_v21  ;;  %v3620_v35 = vadd.s32 4294967280, %v4802_v28  ;;  %v3619_v32 = vsel %vm3618_vm11, %v3617_v7, %v3615_v38  ;;  %v3668_v21 = vadd.s32 4294967184, %v4802_v28 }
 0x50f   : > { %3574 = vadd.xlane.f32.xlu1 %v3543_v14 }
 0x51a   : > { %v3549_v31 = vpop.xlane.xlu2 %3548 }
 0x51b   : > { %v3585_v22 = vadd.f32 %v8628_v58, %v3549_v31 }
 0x51d   : > { %v3621_v18 = vperm.slane %v3585_v22, %v3620_v35 }
 0x51f   : > { %v3623_v3 = vsel %vm3622_vm1, %v3621_v18, %v3619_v32 }
 0x522   : > { %v3551_v56 = vpop.xlane.xlu1 %3550 }
 0x523   : > { %v3586_v53 = vadd.f32 %v8628_v58, %v3551_v56 }
 0x525   : > { %v3625_v30 = vperm.slane %v3586_v53, %v3624_v59 }
 0x527   : > { %v3627_v44 = vsel %vm3626_vm10, %v3625_v30, %v3623_v3 }
 0x52a   : > { %v3553_v9 = vpop.xlane.xlu2 %3552 }
 0x52b   : > { %v3587_v25 = vadd.f32 %v8628_v58, %v3553_v9 }
 0x52d   : > { %v3629_v8 = vperm.slane %v3587_v25, %v3628_v24 }
 0x52f   : > { %v3631_v36 = vsel %vm3630_vm6, %v3629_v8, %v3627_v44 }
 0x532   : > { %v3555_v27 = vpop.xlane.xlu0 %3554 }
 0x533   : > { %v3588_v62 = vadd.f32 %v8628_v58, %v3555_v27  ;;  %v3672_v27 = vadd.s32 4294967176, %v4802_v28 }
 0x535   : > { %v3633_v42 = vperm.slane %v3588_v62, %v3632_v11 }
 0x537   : > { %v3635_v41 = vsel %vm3634_vm0, %v3633_v42, %v3631_v36 }
 0x53a   : > { %v3557_v47 = vpop.xlane.xlu1 %3556 }
 0x53b   : > { %v3589_v52 = vadd.f32 %v8628_v58, %v3557_v47 }
 0x53d   : > { %v3637_v29 = vperm.slane %v3589_v52, %v3636_v60 }
 0x53f   : > { %v3639_v37 = vsel %vm3638_vm14, %v3637_v29, %v3635_v41 }
 0x542   : > { %v3559_v51 = vpop.xlane.xlu2 %3558 }
 0x543   : > { %v3590_v13 = vadd.f32 %v8628_v58, %v3559_v51 }
 0x545   : > { %v3641_v54 = vperm.slane %v3590_v13, %v3640_v45 }
 0x547   : > { %v3643_v1 = vsel %vm3642_vm8, %v3641_v54, %v3639_v37 }
 0x54a   : > { %v3561_v26 = vpop.xlane.xlu0 %3560 }
 0x54b   : > { %v3591_v43 = vadd.f32 %v8628_v58, %v3561_v26 }
 0x54d   : > { %v3645_v63 = vperm.slane %v3591_v43, %v3644_v4 }
 0x54f   : > { %v3647_v31 = vsel %vm3646_vm15, %v3645_v63, %v3643_v1 }
 0x552   : > { %v3563_v23 = vpop.xlane.xlu1 %3562 }
 0x553   : > { %v3592_v20 = vadd.f32 %v8628_v58, %v3563_v23 }
 0x555   : > { %v3649_v2 = vperm.slane %v3592_v20, %v3648_v50 }
 0x557   : > { %v3651_v56 = vsel %vm3650_vm5, %v3649_v2, %v3647_v31 }
 0x55a   : > { %v3565_v16 = vpop.xlane.xlu2 %3564 }
 0x55b   : > { %v3593_v17 = vadd.f32 %v8628_v58, %v3565_v16 }
 0x55d   : > { %v3653_v48 = vperm.slane %v3593_v17, %v3652_v5 }
 0x55f   : > { %v3655_v47 = vsel %vm3654_vm4, %v3653_v48, %v3651_v56 }
 0x562   : > { %v3567_v19 = vpop.xlane.xlu0 %3566 }
 0x563   : > { %v3594_v61 = vadd.f32 %v8628_v58, %v3567_v19 }
 0x565   : > { %v3657_v39 = vperm.slane %v3594_v61, %v3656_v0 }
 0x567   : > { %v3659_v12 = vsel %vm3658_vm2, %v3657_v39, %v3655_v47 }
 0x56a   : > { %v3569_v40 = vpop.xlane.xlu1 %3568 }
 0x56b   : > { %v3595_v6 = vadd.f32 %v8628_v58, %v3569_v40 }
 0x56d   : > { %v3661_v57 = vperm.slane %v3595_v6, %v3660_v33 }
 0x56f   : > { %v3663_v10 = vsel %vm3662_vm12, %v3661_v57, %v3659_v12 }
 0x572   : > { %v3571_v34 = vpop.xlane.xlu2 %3570 }
 0x573   : > { %v3596_v15 = vadd.f32 %v8628_v58, %v3571_v34 }
 0x575   : > { %v3665_v9 = vperm.slane %v3596_v15, %v3664_v46 }
 0x577   : > { %v3667_v35 = vsel %vm3666_vm9, %v3665_v9, %v3663_v10 }
 0x57a   : > { %v3573_v55 = vpop.xlane.xlu0 %3572 }
 0x57b   : > { %v3597_v14 = vadd.f32 %v8628_v58, %v3573_v55 }
 0x57d   : > { %v3669_v51 = vperm.slane %v3597_v14, %v3668_v21 }
 0x57f   : > { %v3671_v59 = vsel %vm3670_vm3, %v3669_v51, %v3667_v35 }
 0x582   : > { %v3575_v26 = vpop.xlane.xlu1 %3574 }
 0x583   : > { %v3598_v49 = vadd.f32 %v8628_v58, %v3575_v26 }
 0x585   : > { %v3673_v22 = vperm.slane %v3598_v49, %v3672_v27 }
 0x587   : > { %v3675_v28 = vsel %vm3674_vm7, %v3673_v22, %v3671_v59 }
 0x588   : > { %3677 = vst [vmem:[%s289_s22] sm:$0x1] %v3675_v28 }
 0x589   : > { %4177 = shalt.err (!%p4174_p3)
}
 0x58a   : > { %3992 = dma.vmem_to_hbm [thread:$0]  (%p4303_p5), %s3690_s23, 16, %s3692_s6, %s3679_s24  }
 0x58b PF: > { %p3998_p4 = scmp.ge.s32.totalorder %s4212_s29, 2  ;;  %s3703_s15 = sand.u32 1, %s4200_s26  }
 0x58c   : > { %s3704_s16 = scalar_lea.sflag [#allocation4], %s3703_s15 }
 0x58d   : > { %p3995_p7 = pnand %p3998_p4, %p4307_p6 }
 0x58f   : > { %p3996_p8 = pneg %p3995_p7 }
 0x591   : > { %4195 = dma.done.wait (%p3996_p8), %s3704_s16, 16  }
 0x592   : > { %4197 = vsyncadd (%p3996_p8), %s3704_s16, 4294967280  ;;  %p19_p9 = scmp.ge.s32.totalorder %s4290_s8, 4   ;;  %s9436_s26 = smov %s4204_s27 }
 0x593   : > { %s9437_s27 = smov %s4208_s28  ;;  %s9438_s28 = smov %s4301_s11 }
 0x594   : > { %s9439_s29 = smov %s4290_s8  ;;  %21 = sbr.rel (!%p19_p9) target bundleno = 6 (0x6), region = 86 }
 0x599   :  { %3709 = vsyncpa [#allocation4], 1 }
 0x59a   :  { %3711 = vsyncpa [#allocation4 + $0x1], 1 }

</bundles_post_ra>
